<compile_context>
chip_gen: v7x
topology: tpu7x:2x2x1
jax: 0.10.0
libtpu: 0.0.40
codegen_flags: <defaults>
</compile_context>

<pallas_src>
import functools

import jax
import jax.numpy as jnp
from jax import lax
from jax.experimental import pallas as pl
from jax.experimental.pallas import tpu as pltpu

_EPS = 1e-8
_LOG2 = 0.6931471805599453


def _ssp(x):
    # ShiftedSoftplus: softplus(x) - log(2), numerically stable.
    return jnp.maximum(x, 0.0) + jnp.log1p(jnp.exp(-jnp.abs(x))) - _LOG2


def _mm(a, w):
    # MXU matmul with f32 accumulation; operand cast follows the (possibly
    # bf16) weight dtype -- a no-op on the default f32 path.
    return jnp.dot(a.astype(w.dtype), w, preferred_element_type=jnp.float32)


def _rsqrt(x):
    # EUP rsqrt + one Newton step -> ~f32 accuracy while freeing VALU cycles.
    y = lax.rsqrt(x)
    return y * (1.5 - 0.5 * x * y * y)


def _round_up(x, m):
    return ((x + m - 1) // m) * m


def _pad_rows(a, rows, axis=0):
    pad = rows - a.shape[axis]
    if pad == 0:
        return a
    widths = [(0, 0)] * a.ndim
    widths[axis] = (0, pad)
    return jnp.pad(a, widths)


def _scatter_mean(data, idx, n):
    """Scatter-mean over leading axis (empty segments -> 0). Reference only."""
    seg_sum = jax.ops.segment_sum(data, idx, num_segments=n)
    cnt = jax.ops.segment_sum(jnp.ones((idx.shape[0],), data.dtype), idx,
                              num_segments=n)
    cnt = jnp.maximum(cnt, 1.0)
    return seg_sum / cnt.reshape((n,) + (1,) * (data.ndim - 1))


# --------------------------------------------------------------------------
# Kernel 1: per-edge message.
#   phi = ms2(ssp(ms1(sj)));  w = fc(r) * mv(rbf(r));  pw = phi * w
#   ds = pw_s ; dv_k = vj_k * pw_v + pw_r * (ev_k / r)
#   Output fused lane-dense as (te, 4C) = [ds | dv_x | dv_y | dv_z].
# --------------------------------------------------------------------------
def _edge_message_kernel(sj_ref, vj_ref, ev_ref,
                         wm1_ref, bm1_ref, wm2_ref, bm2_ref,
                         wmv_ref, bmv_ref, out_ref, *, l, rc, eps):
    sj = sj_ref[...]                                           # (TE, C)
    ev = ev_ref[...].astype(jnp.float32)                       # (TE, 3)

    sumsq = jnp.sum(ev * ev, axis=-1, keepdims=True) + eps     # (TE, 1)
    inv_r = _rsqrt(sumsq)                                      # 1/sqrt(.)
    r = sumsq * inv_r                                          # sqrt(.)

    # phi-branch: ms1 -> ssp -> (pre-split) ms2, all MXU / f32 accumulate.
    h = _ssp(_mm(sj, wm1_ref[...]) + bm1_ref[...])

    # RBF(r) = sin(n*pi*r/rc)/r, n = 1..l ; cosine cutoff fc(r).
    n = lax.broadcasted_iota(jnp.int32, (1, l), 1).astype(jnp.float32) + 1.0
    rbf = jnp.sin(n * (jnp.pi / rc) * r) * inv_r               # (TE, l)
    fc = jnp.where(r < rc, 0.5 * (jnp.cos((jnp.pi / rc) * r) + 1.0), 0.0)

    # Pre-split 3C weight columns -> three lane-dense (TE, C) results each;
    # no sub-vreg lane slices of a (TE, 3C) tensor.
    phi_v = _mm(h, wm2_ref[0]) + bm2_ref[0]
    phi_s = _mm(h, wm2_ref[1]) + bm2_ref[1]
    phi_r = _mm(h, wm2_ref[2]) + bm2_ref[2]

    w_v = fc * (_mm(rbf, wmv_ref[0]) + bmv_ref[0])
    w_s = fc * (_mm(rbf, wmv_ref[1]) + bmv_ref[1])
    w_r = fc * (_mm(rbf, wmv_ref[2]) + bmv_ref[2])

    v_ = phi_v * w_v
    s_ = phi_s * w_s
    r_ = phi_r * w_r

    u0 = ev[:, 0:1] * inv_r                                    # unit vector comps
    u1 = ev[:, 1:2] * inv_r
    u2 = ev[:, 2:3] * inv_r

    dv0 = vj_ref[0].astype(jnp.float32) * v_ + r_ * u0
    dv1 = vj_ref[1].astype(jnp.float32) * v_ + r_ * u1
    dv2 = vj_ref[2].astype(jnp.float32) * v_ + r_ * u2

    # Single lane-dense store (4C lanes; = 128 lanes at C=32).
    out = jnp.concatenate([s_, dv0, dv1, dv2], axis=-1)
    out_ref[...] = out.astype(out_ref.dtype)


def _edge_message(sj, vj3, ev, wm1, bm1, wm2_3, bm2_3, wmv_3, bmv_3,
                  *, C, l, rc, tile, out_dtype):
    E = sj.shape[0]
    te = min(tile, _round_up(E, 8))
    E_pad = _round_up(E, te)
    sj_p = _pad_rows(sj, E_pad)
    vj_p = _pad_rows(vj3, E_pad, axis=1)
    ev_p = _pad_rows(ev, E_pad)

    kernel = functools.partial(_edge_message_kernel, l=l, rc=rc, eps=_EPS)
    out = pl.pallas_call(
        kernel,
        out_shape=jax.ShapeDtypeStruct((E_pad, 4 * C), out_dtype),
        grid_spec=pltpu.PrefetchScalarGridSpec(
            num_scalar_prefetch=0,
            grid=(E_pad // te,),
            in_specs=[
                pl.BlockSpec((te, C), lambda i: (i, 0)),          # sj tile
                pl.BlockSpec((3, te, C), lambda i: (0, i, 0)),    # vj tile
                pl.BlockSpec((te, 3), lambda i: (i, 0)),          # edge_vec tile
                pl.BlockSpec((C, C), lambda i: (0, 0)),           # ms1 W
                pl.BlockSpec((1, C), lambda i: (0, 0)),           # ms1 b
                pl.BlockSpec((3, C, C), lambda i: (0, 0, 0)),     # ms2 W (split)
                pl.BlockSpec((3, 1, C), lambda i: (0, 0, 0)),     # ms2 b (split)
                pl.BlockSpec((3, l, C), lambda i: (0, 0, 0)),     # mv W (split)
                pl.BlockSpec((3, 1, C), lambda i: (0, 0, 0)),     # mv b (split)
            ],
            out_specs=pl.BlockSpec((te, 4 * C), lambda i: (i, 0)),
        ),
        compiler_params=pltpu.CompilerParams(
            dimension_semantics=("parallel",)),
    )(sj_p, vj_p, ev_p, wm1, bm1, wm2_3, bm2_3, wmv_3, bmv_3)
    return out[:E]


# --------------------------------------------------------------------------
# Kernel 2: per-edge update  sj_out = us2(ssp(us1(cat([|vj|, sj]))))
#           (concat + matmul rewritten as two matmuls on pre-split us1)
# --------------------------------------------------------------------------
def _edge_update_kernel(sj_ref, vj_ref, wu1_ref, bu1_ref, wu2_ref, bu2_ref,
                        out_ref, *, eps):
    sj = sj_ref[...]                                           # (TE, C)
    v0 = vj_ref[0].astype(jnp.float32)
    v1 = vj_ref[1].astype(jnp.float32)
    v2 = vj_ref[2].astype(jnp.float32)
    sumsq = v0 * v0 + v1 * v1 + v2 * v2 + eps
    vnorm = sumsq * _rsqrt(sumsq)                              # sqrt via EUP

    h = _mm(vnorm, wu1_ref[0]) + _mm(sj, wu1_ref[1]) + bu1_ref[...]
    h = _ssp(h)
    out = _mm(h, wu2_ref[...]) + bu2_ref[...]
    out_ref[...] = out.astype(out_ref.dtype)


def _edge_update(sj, vj3, wu1_2, bu1, wu2, bu2, *, C, tile, out_dtype):
    E = sj.shape[0]
    te = min(tile, _round_up(E, 8))
    E_pad = _round_up(E, te)
    sj_p = _pad_rows(sj, E_pad)
    vj_p = _pad_rows(vj3, E_pad, axis=1)

    kernel = functools.partial(_edge_update_kernel, eps=_EPS)
    out = pl.pallas_call(
        kernel,
        out_shape=jax.ShapeDtypeStruct((E_pad, 3 * C), out_dtype),
        grid_spec=pltpu.PrefetchScalarGridSpec(
            num_scalar_prefetch=0,
            grid=(E_pad // te,),
            in_specs=[
                pl.BlockSpec((te, C), lambda i: (i, 0)),
                pl.BlockSpec((3, te, C), lambda i: (0, i, 0)),
                pl.BlockSpec((2, C, C), lambda i: (0, 0, 0)),     # us1 W (split)
                pl.BlockSpec((1, C), lambda i: (0, 0)),
                pl.BlockSpec((C, 3 * C), lambda i: (0, 0)),
                pl.BlockSpec((1, 3 * C), lambda i: (0, 0)),
            ],
            out_specs=pl.BlockSpec((te, 3 * C), lambda i: (i, 0)),
        ),
        compiler_params=pltpu.CompilerParams(
            dimension_semantics=("parallel",)),
    )(sj_p, vj_p, wu1_2, bu1, wu2, bu2)
    return out[:E]


# --------------------------------------------------------------------------
# Kernel 3: per-node final update
#   ds = sum((uv/|uv|)^2) * asv + ass ;  dv = uv * avv ;  x += (ds, dv)
#   avv/asv/ass arrive pre-split as (3, N, C) (no lane slicing of (N, 3C)).
# --------------------------------------------------------------------------
def _node_update_kernel(sm_ref, uv_ref, xs_ref, xv_ref, os_ref, ov_ref, *, eps):
    u0 = uv_ref[0]
    u1 = uv_ref[1]
    u2 = uv_ref[2]                                             # (TN, C) each
    sumsq = u0 * u0 + u1 * u1 + u2 * u2
    frac = sumsq / (sumsq + eps)   # == sum_k (uv_k / sqrt(sumsq+eps))^2

    avv = sm_ref[0]
    asv = sm_ref[1]
    ass = sm_ref[2]

    os_ref[...] = (xs_ref[...] + frac * asv + ass).astype(os_ref.dtype)
    ov_ref[0] = (xv_ref[0] + u0 * avv).astype(ov_ref.dtype)
    ov_ref[1] = (xv_ref[1] + u1 * avv).astype(ov_ref.dtype)
    ov_ref[2] = (xv_ref[2] + u2 * avv).astype(ov_ref.dtype)


def _node_update(smean3, uv3, xs, xv3, *, tile):
    N, C = xs.shape
    tn = min(tile, _round_up(N, 8))
    N_pad = _round_up(N, tn)
    sm_p = _pad_rows(smean3, N_pad, axis=1)
    uv_p = _pad_rows(uv3, N_pad, axis=1)
    xs_p = _pad_rows(xs, N_pad)
    xv_p = _pad_rows(xv3, N_pad, axis=1)

    kernel = functools.partial(_node_update_kernel, eps=_EPS)
    os_, ov_ = pl.pallas_call(
        kernel,
        out_shape=(jax.ShapeDtypeStruct((N_pad, C), xs.dtype),
                   jax.ShapeDtypeStruct((3, N_pad, C), xs.dtype)),
        grid_spec=pltpu.PrefetchScalarGridSpec(
            num_scalar_prefetch=0,
            grid=(N_pad // tn,),
            in_specs=[
                pl.BlockSpec((3, tn, C), lambda i: (0, i, 0)),
                pl.BlockSpec((3, tn, C), lambda i: (0, i, 0)),
                pl.BlockSpec((tn, C), lambda i: (i, 0)),
                pl.BlockSpec((3, tn, C), lambda i: (0, i, 0)),
            ],
            out_specs=(pl.BlockSpec((tn, C), lambda i: (i, 0)),
                       pl.BlockSpec((3, tn, C), lambda i: (0, i, 0))),
        ),
        compiler_params=pltpu.CompilerParams(
            dimension_semantics=("parallel",)),
    )(sm_p, uv_p, xs_p, xv_p)
    return os_[:N], ov_[:, :N]


# --------------------------------------------------------------------------
# Full PAINN forward (normalization=None, inference).
# --------------------------------------------------------------------------
def painn_forward(node_s, node_v, edge_index, edge_vec, params, *, rc, l,
                  tile_edges=1024, tile_nodes=1024, mxu_dtype=None):
    """node_s: (N, C); node_v: (N, C, 3); edge_index: (2, E) int32; edge_vec: (E, 3).

    mxu_dtype: optional matmul-operand dtype (e.g. jnp.bfloat16 on v6e/v7x);
    defaults to node_s.dtype. Elementwise math and accumulation stay f32.
    """
    N, C = node_s.shape
    E = edge_vec.shape[0]
    dst = edge_index[0]
    src = edge_index[1]
    out_dtype = node_s.dtype
    mxu_dtype = out_dtype if mxu_dtype is None else mxu_dtype

    # Weight prep (tiny, once per call): cast matmul weights to mxu_dtype,
    # keep biases f32, and pre-split the 3C / 2C dims so kernels never take
    # sub-vreg lane slices.
    f32 = jnp.float32
    wm1 = params['wm1'].astype(mxu_dtype)
    bm1 = params['bm1'].astype(f32)
    wm2_3 = jnp.stack(jnp.split(params['wm2'].astype(mxu_dtype), 3, axis=1))
    bm2_3 = jnp.stack(jnp.split(params['bm2'].astype(f32), 3, axis=1))
    wmv_3 = jnp.stack(jnp.split(params['wmv'].astype(mxu_dtype), 3, axis=1))
    bmv_3 = jnp.stack(jnp.split(params['bmv'].astype(f32), 3, axis=1))
    wu1_2 = jnp.stack(jnp.split(params['wu1'].astype(mxu_dtype), 2, axis=0))
    bu1 = params['bu1'].astype(f32)
    wu2 = params['wu2'].astype(mxu_dtype)
    bu2 = params['bu2'].astype(f32)

    # Lane-dense layout for vector features: (3, N, C).
    v3 = jnp.transpose(node_v, (2, 0, 1))

    # Scatter-mean denominator (dst is the same index for every scatter).
    cnt = jnp.maximum(
        jax.ops.segment_sum(jnp.ones((E,), f32), dst, num_segments=N), 1.0)
    inv_cnt = (1.0 / cnt).astype(out_dtype)                    # (N,)

    # --- message phase ---------------------------------------------------
    # TODO(synk): gather x[edge_index[1]] / scatter-mean by edge_index[0] are
    # data-dependent index ops with no clean tiled BlockSpec; they stay in
    # XLA (jnp.take / segment_sum).
    sj = jnp.take(node_s.astype(mxu_dtype), src, axis=0)       # (E, C)
    vj = jnp.take(v3, src, axis=1)                             # (3, E, C)

    msg = _edge_message(sj, vj, edge_vec, wm1, bm1, wm2_3, bm2_3, wmv_3,
                        bmv_3, C=C, l=l, rc=rc, tile=tile_edges,
                        out_dtype=out_dtype)                   # (E, 4C)

    # One scatter-mean over the fused (E, 4C) block, then split at node level.
    agg = jax.ops.segment_sum(msg, dst, num_segments=N) * inv_cnt[:, None]
    ds = agg[:, 0:C]
    dv = jnp.stack([agg[:, C:2 * C], agg[:, 2 * C:3 * C], agg[:, 3 * C:4 * C]])

    s1 = node_s + ds
    v1 = v3 + dv

    # --- update phase ----------------------------------------------------
    sj2 = jnp.take(s1.astype(mxu_dtype), src, axis=0)          # (E, C)
    vj2 = jnp.take(v1, src, axis=1)                            # (3, E, C)

    sj_out = _edge_update(sj2, vj2, wu1_2, bu1, wu2, bu2, C=C,
                          tile=tile_edges, out_dtype=out_dtype)  # (E, 3C)

    # Per-component segment sums: no (3,E,C) transposes.
    uv = jnp.stack([jax.ops.segment_sum(vj2[k], dst, num_segments=N)
                    for k in range(3)]) * inv_cnt[None, :, None]   # (3, N, C)
    s_mean = jax.ops.segment_sum(sj_out, dst, num_segments=N) * inv_cnt[:, None]
    smean3 = jnp.transpose(s_mean.reshape(N, 3, C), (1, 0, 2))     # (3, N, C)

    out_s, out_v3 = _node_update(smean3, uv, s1, v1, tile=tile_nodes)
    return out_s, jnp.transpose(out_v3, (1, 2, 0))             # (N, C), (N, C, 3)


# --------------------------------------------------------------------------
# Pure-JAX reference (mirrors the PyTorch forward exactly).
# --------------------------------------------------------------------------
def _reference(node_s, node_v, edge_index, edge_vec, p, rc, l):
    eps = _EPS
    N, C = node_s.shape
    dst, src = edge_index[0], edge_index[1]

    def ssp(x):
        return jax.nn.softplus(x) - jnp.log(2.0)

    def lin(x, w, b):
        return x @ w + b

    r = jnp.sqrt(jnp.sum(edge_vec ** 2, -1) + eps)[:, None]        # (E, 1)
    sj = node_s[src]
    vj = node_v[src]                                               # (E, C, 3)
    phi = lin(ssp(lin(sj, p['wm1'], p['bm1'])), p['wm2'], p['bm2'])
    n = jnp.arange(1, l + 1, dtype=node_s.dtype)[None, :]
    rbf = jnp.sin(n * jnp.pi * r / rc) / r
    fc = jnp.where(r < rc, 0.5 * (jnp.cos(jnp.pi * r / rc) + 1.0), 0.0)
    w = fc * lin(rbf, p['wmv'], p['bmv'])
    v_, s_, r_ = jnp.split(phi * w, 3, axis=-1)
    ds_update = s_
    dv_update = vj * v_[..., None] + r_[..., None] * (edge_vec / r)[:, None, :]
    ds = _scatter_mean(ds_update, dst, N)
    dv = _scatter_mean(dv_update, dst, N)
    s1 = node_s + ds
    v1 = node_v + dv
    sj = s1[src]
    vj = v1[src]
    norm = jnp.sqrt(jnp.sum(vj ** 2, -1) + eps)                    # (E, C)
    s = jnp.concatenate([norm, sj], -1)
    sj_o = lin(ssp(lin(s, p['wu1'], p['bu1'])), p['wu2'], p['bu2'])
    uv = _scatter_mean(vj, dst, N)                                 # (N, C, 3)
    norm = jnp.sqrt(jnp.sum(uv ** 2, -1) + eps)[..., None]
    s_m = _scatter_mean(sj_o, dst, N)
    avv, asv, ass = jnp.split(s_m, 3, axis=-1)
    ds = jnp.sum((uv / norm) ** 2, -1) * asv + ass
    dv = uv * avv[..., None]
    return s1 + ds, v1 + dv


if __name__ == "__main__":
    # Small shapes consistent with the module.
    N = 16            # nodes (atoms)
    C = 32            # in_features
    E = 64            # edges
    l = 16            # RBF basis size
    rc = 6.0          # cutoff radius

    key = jax.random.PRNGKey(0)
    keys = jax.random.split(key, 16)

    node_s = jax.random.normal(keys[0], (N, C), jnp.float32)
    node_v = jax.random.normal(keys[1], (N, C, 3), jnp.float32) * 0.1
    src = jax.random.randint(keys[2], (E,), 0, N).astype(jnp.int32)
    dst = jax.random.randint(keys[3], (E,), 0, N).astype(jnp.int32)
    edge_index = jnp.stack([dst, src])                    # [0]=target, [1]=source
    edge_vec = jax.random.normal(keys[4], (E, 3), jnp.float32)

    sc = 0.1
    params = dict(
        wm1=jax.random.normal(keys[5], (C, C), jnp.float32) * sc,
        bm1=jax.random.normal(keys[6], (1, C), jnp.float32) * sc,
        wm2=jax.random.normal(keys[7], (C, 3 * C), jnp.float32) * sc,
        bm2=jax.random.normal(keys[8], (1, 3 * C), jnp.float32) * sc,
        wmv=jax.random.normal(keys[9], (l, 3 * C), jnp.float32) * sc,
        bmv=jax.random.normal(keys[10], (1, 3 * C), jnp.float32) * sc,
        wu1=jax.random.normal(keys[11], (2 * C, C), jnp.float32) * sc,
        bu1=jax.random.normal(keys[12], (1, C), jnp.float32) * sc,
        wu2=jax.random.normal(keys[13], (C, 3 * C), jnp.float32) * sc,
        bu2=jax.random.normal(keys[14], (1, 3 * C), jnp.float32) * sc,
    )

    out_s, out_v = painn_forward(node_s, node_v, edge_index, edge_vec, params,
                                 rc=rc, l=l)
    out_s = jax.block_until_ready(out_s)
    out_v = jax.block_until_ready(out_v)

    ref_s, ref_v = _reference(node_s, node_v, edge_index, edge_vec, params, rc, l)
    assert out_s.shape == (N, C) and out_v.shape == (N, C, 3)
    assert jnp.allclose(out_s, ref_s, atol=1e-4, rtol=1e-4), "node_fea_s mismatch"
    assert jnp.allclose(out_v, ref_v, atol=1e-4, rtol=1e-4), "node_fea_v mismatch"
    print("KERNEL_OK")
</pallas_src>

<mosaic_0001>
module attributes {stable_mosaic.version = 11 : i64} {
  func.func @_edge_message_kernel(%arg0: i32, %arg1: memref<64x32xf32, #tpu.memory_space<vmem>>, %arg2: memref<3x64x32xf32, #tpu.memory_space<vmem>>, %arg3: memref<64x3xf32, #tpu.memory_space<vmem>>, %arg4: memref<32x32xf32, #tpu.memory_space<vmem>>, %arg5: memref<1x32xf32, #tpu.memory_space<vmem>>, %arg6: memref<3x32x32xf32, #tpu.memory_space<vmem>>, %arg7: memref<3x1x32xf32, #tpu.memory_space<vmem>>, %arg8: memref<3x16x32xf32, #tpu.memory_space<vmem>>, %arg9: memref<3x1x32xf32, #tpu.memory_space<vmem>>, %arg10: memref<64x128xf32, #tpu.memory_space<vmem>>) attributes {dimension_semantics = [#tpu.dimension_semantics<parallel>], iteration_bounds = array<i64: 1>, scalar_prefetch = 0 : i64, scratch_operands = 0 : i64, tpu.core_type = #tpu.core_type<tc>, window_params = [{transform_indices = @transform_0, window_bounds = array<i64: 64, 32>}, {transform_indices = @transform_1, window_bounds = array<i64: 3, 64, 32>}, {transform_indices = @transform_2, window_bounds = array<i64: 64, 3>}, {pipeline_mode = #tpu.pipeline_mode<synchronous>, transform_indices = @transform_3, window_bounds = array<i64: 32, 32>}, {pipeline_mode = #tpu.pipeline_mode<synchronous>, transform_indices = @transform_4, window_bounds = array<i64: 1, 32>}, {pipeline_mode = #tpu.pipeline_mode<synchronous>, transform_indices = @transform_5, window_bounds = array<i64: 3, 32, 32>}, {pipeline_mode = #tpu.pipeline_mode<synchronous>, transform_indices = @transform_6, window_bounds = array<i64: 3, 1, 32>}, {pipeline_mode = #tpu.pipeline_mode<synchronous>, transform_indices = @transform_7, window_bounds = array<i64: 3, 16, 32>}, {pipeline_mode = #tpu.pipeline_mode<synchronous>, transform_indices = @transform_8, window_bounds = array<i64: 3, 1, 32>}, {transform_indices = @transform_9, window_bounds = array<i64: 64, 128>}]} {
    %c0 = arith.constant 0 : index
    %c0_0 = arith.constant 0 : index
    %0 = vector.load %arg1[%c0, %c0_0] : memref<64x32xf32, #tpu.memory_space<vmem>>, vector<64x32xf32>
    %c0_1 = arith.constant 0 : index
    %c0_2 = arith.constant 0 : index
    %1 = vector.load %arg3[%c0_1, %c0_2] : memref<64x3xf32, #tpu.memory_space<vmem>>, vector<64x3xf32>
    %2 = arith.mulf %1, %1 : vector<64x3xf32>
    %cst = arith.constant dense<0.000000e+00> : vector<64xf32>
    %3 = vector.multi_reduction <add>, %2, %cst [1] : vector<64x3xf32> to vector<64xf32>
    %4 = vector.shape_cast %3 : vector<64xf32> to vector<64x1xf32>
    %cst_3 = arith.constant 9.99999993E-9 : f32
    %5 = vector.broadcast %cst_3 : f32 to vector<64x1xf32>
    %6 = arith.addf %4, %5 : vector<64x1xf32>
    %7 = math.rsqrt %6 : vector<64x1xf32>
    %cst_4 = arith.constant 5.000000e-01 : f32
    %8 = vector.broadcast %cst_4 : f32 to vector<64x1xf32>
    %9 = arith.mulf %8, %6 : vector<64x1xf32>
    %10 = arith.mulf %9, %7 : vector<64x1xf32>
    %11 = arith.mulf %10, %7 : vector<64x1xf32>
    %cst_5 = arith.constant 1.500000e+00 : f32
    %12 = vector.broadcast %cst_5 : f32 to vector<64x1xf32>
    %13 = arith.subf %12, %11 : vector<64x1xf32>
    %14 = arith.mulf %7, %13 : vector<64x1xf32>
    %15 = arith.mulf %6, %14 : vector<64x1xf32>
    %c0_6 = arith.constant 0 : index
    %c0_7 = arith.constant 0 : index
    %16 = vector.load %arg4[%c0_6, %c0_7] : memref<32x32xf32, #tpu.memory_space<vmem>>, vector<32x32xf32>
    %cst_8 = arith.constant dense<0.000000e+00> : vector<64x32xf32>
    %17 = tpu.matmul %0, %16, %cst_8 {dimension_numbers = #tpu.dot_dimension_numbers<[1], [0], [0], [1], [0, 0, 1, 1], [], []>} : vector<64x32xf32>, vector<32x32xf32>, vector<64x32xf32> -> vector<64x32xf32>
    %c0_9 = arith.constant 0 : index
    %c0_10 = arith.constant 0 : index
    %18 = vector.load %arg5[%c0_9, %c0_10] : memref<1x32xf32, #tpu.memory_space<vmem>>, vector<1x32xf32>
    %19 = vector.broadcast %18 : vector<1x32xf32> to vector<64x32xf32>
    %20 = arith.addf %17, %19 : vector<64x32xf32>
    %cst_11 = arith.constant 0.000000e+00 : f32
    %21 = vector.broadcast %cst_11 : f32 to vector<64x32xf32>
    %22 = arith.maximumf %20, %21 : vector<64x32xf32>
    %23 = math.absf %20 : vector<64x32xf32>
    %cst_12 = arith.constant 0.000000e+00 : f32
    %24 = vector.broadcast %cst_12 : f32 to vector<64x32xf32>
    %25 = arith.subf %24, %23 : vector<64x32xf32>
    %26 = math.exp %25 : vector<64x32xf32>
    %27 = math.log1p %26 : vector<64x32xf32>
    %28 = arith.addf %22, %27 : vector<64x32xf32>
    %cst_13 = arith.constant 0.693147182 : f32
    %29 = vector.broadcast %cst_13 : f32 to vector<64x32xf32>
    %30 = arith.subf %28, %29 : vector<64x32xf32>
    %31 = tpu.iota {dimensions = array<i32: 1>} : vector<1x16xi32>
    %32 = arith.sitofp %31 : vector<1x16xi32> to vector<1x16xf32>
    %cst_14 = arith.constant 1.000000e+00 : f32
    %33 = vector.broadcast %cst_14 : f32 to vector<1x16xf32>
    %34 = arith.addf %32, %33 : vector<1x16xf32>
    %cst_15 = arith.constant 0.52359879 : f32
    %35 = vector.broadcast %cst_15 : f32 to vector<1x16xf32>
    %36 = arith.mulf %34, %35 : vector<1x16xf32>
    %37 = vector.broadcast %36 : vector<1x16xf32> to vector<64x16xf32>
    %38 = vector.broadcast %15 : vector<64x1xf32> to vector<64x16xf32>
    %39 = arith.mulf %37, %38 : vector<64x16xf32>
    %40 = math.sin %39 : vector<64x16xf32>
    %41 = vector.broadcast %14 : vector<64x1xf32> to vector<64x16xf32>
    %42 = arith.mulf %40, %41 : vector<64x16xf32>
    %cst_16 = arith.constant 6.000000e+00 : f32
    %43 = vector.broadcast %cst_16 : f32 to vector<64x1xf32>
    %44 = arith.cmpf olt, %15, %43 : vector<64x1xf32>
    %cst_17 = arith.constant 0.52359879 : f32
    %45 = vector.broadcast %cst_17 : f32 to vector<64x1xf32>
    %46 = arith.mulf %45, %15 : vector<64x1xf32>
    %47 = math.cos %46 : vector<64x1xf32>
    %cst_18 = arith.constant 1.000000e+00 : f32
    %48 = vector.broadcast %cst_18 : f32 to vector<64x1xf32>
    %49 = arith.addf %47, %48 : vector<64x1xf32>
    %cst_19 = arith.constant 5.000000e-01 : f32
    %50 = vector.broadcast %cst_19 : f32 to vector<64x1xf32>
    %51 = arith.mulf %50, %49 : vector<64x1xf32>
    %cst_20 = arith.constant 0.000000e+00 : f32
    %52 = vector.broadcast %cst_20 : f32 to vector<64x1xf32>
    %53 = arith.select %44, %51, %52 : vector<64x1xi1>, vector<64x1xf32>
    %c0_21 = arith.constant 0 : index
    %c0_22 = arith.constant 0 : index
    %c0_23 = arith.constant 0 : index
    %54 = vector.load %arg6[%c0_21, %c0_22, %c0_23] : memref<3x32x32xf32, #tpu.memory_space<vmem>>, vector<1x32x32xf32>
    %55 = vector.shape_cast %54 : vector<1x32x32xf32> to vector<32x32xf32>
    %cst_24 = arith.constant dense<0.000000e+00> : vector<64x32xf32>
    %56 = tpu.matmul %30, %55, %cst_24 {dimension_numbers = #tpu.dot_dimension_numbers<[1], [0], [0], [1], [0, 0, 1, 1], [], []>} : vector<64x32xf32>, vector<32x32xf32>, vector<64x32xf32> -> vector<64x32xf32>
    %c0_25 = arith.constant 0 : index
    %c0_26 = arith.constant 0 : index
    %c0_27 = arith.constant 0 : index
    %57 = vector.load %arg7[%c0_25, %c0_26, %c0_27] : memref<3x1x32xf32, #tpu.memory_space<vmem>>, vector<1x1x32xf32>
    %58 = vector.shape_cast %57 : vector<1x1x32xf32> to vector<1x32xf32>
    %59 = vector.broadcast %58 : vector<1x32xf32> to vector<64x32xf32>
    %60 = arith.addf %56, %59 : vector<64x32xf32>
    %c1 = arith.constant 1 : index
    %c0_28 = arith.constant 0 : index
    %c0_29 = arith.constant 0 : index
    %61 = vector.load %arg6[%c1, %c0_28, %c0_29] : memref<3x32x32xf32, #tpu.memory_space<vmem>>, vector<1x32x32xf32>
    %62 = vector.shape_cast %61 : vector<1x32x32xf32> to vector<32x32xf32>
    %cst_30 = arith.constant dense<0.000000e+00> : vector<64x32xf32>
    %63 = tpu.matmul %30, %62, %cst_30 {dimension_numbers = #tpu.dot_dimension_numbers<[1], [0], [0], [1], [0, 0, 1, 1], [], []>} : vector<64x32xf32>, vector<32x32xf32>, vector<64x32xf32> -> vector<64x32xf32>
    %c1_31 = arith.constant 1 : index
    %c0_32 = arith.constant 0 : index
    %c0_33 = arith.constant 0 : index
    %64 = vector.load %arg7[%c1_31, %c0_32, %c0_33] : memref<3x1x32xf32, #tpu.memory_space<vmem>>, vector<1x1x32xf32>
    %65 = vector.shape_cast %64 : vector<1x1x32xf32> to vector<1x32xf32>
    %66 = vector.broadcast %65 : vector<1x32xf32> to vector<64x32xf32>
    %67 = arith.addf %63, %66 : vector<64x32xf32>
    %c2 = arith.constant 2 : index
    %c0_34 = arith.constant 0 : index
    %c0_35 = arith.constant 0 : index
    %68 = vector.load %arg6[%c2, %c0_34, %c0_35] : memref<3x32x32xf32, #tpu.memory_space<vmem>>, vector<1x32x32xf32>
    %69 = vector.shape_cast %68 : vector<1x32x32xf32> to vector<32x32xf32>
    %cst_36 = arith.constant dense<0.000000e+00> : vector<64x32xf32>
    %70 = tpu.matmul %30, %69, %cst_36 {dimension_numbers = #tpu.dot_dimension_numbers<[1], [0], [0], [1], [0, 0, 1, 1], [], []>} : vector<64x32xf32>, vector<32x32xf32>, vector<64x32xf32> -> vector<64x32xf32>
    %c2_37 = arith.constant 2 : index
    %c0_38 = arith.constant 0 : index
    %c0_39 = arith.constant 0 : index
    %71 = vector.load %arg7[%c2_37, %c0_38, %c0_39] : memref<3x1x32xf32, #tpu.memory_space<vmem>>, vector<1x1x32xf32>
    %72 = vector.shape_cast %71 : vector<1x1x32xf32> to vector<1x32xf32>
    %73 = vector.broadcast %72 : vector<1x32xf32> to vector<64x32xf32>
    %74 = arith.addf %70, %73 : vector<64x32xf32>
    %c0_40 = arith.constant 0 : index
    %c0_41 = arith.constant 0 : index
    %c0_42 = arith.constant 0 : index
    %75 = vector.load %arg8[%c0_40, %c0_41, %c0_42] : memref<3x16x32xf32, #tpu.memory_space<vmem>>, vector<1x16x32xf32>
    %76 = vector.shape_cast %75 : vector<1x16x32xf32> to vector<16x32xf32>
    %cst_43 = arith.constant dense<0.000000e+00> : vector<64x32xf32>
    %77 = tpu.matmul %42, %76, %cst_43 {dimension_numbers = #tpu.dot_dimension_numbers<[1], [0], [0], [1], [0, 0, 1, 1], [], []>} : vector<64x16xf32>, vector<16x32xf32>, vector<64x32xf32> -> vector<64x32xf32>
    %c0_44 = arith.constant 0 : index
    %c0_45 = arith.constant 0 : index
    %c0_46 = arith.constant 0 : index
    %78 = vector.load %arg9[%c0_44, %c0_45, %c0_46] : memref<3x1x32xf32, #tpu.memory_space<vmem>>, vector<1x1x32xf32>
    %79 = vector.shape_cast %78 : vector<1x1x32xf32> to vector<1x32xf32>
    %80 = vector.broadcast %79 : vector<1x32xf32> to vector<64x32xf32>
    %81 = arith.addf %77, %80 : vector<64x32xf32>
    %82 = vector.broadcast %53 : vector<64x1xf32> to vector<64x32xf32>
    %83 = arith.mulf %82, %81 : vector<64x32xf32>
    %c1_47 = arith.constant 1 : index
    %c0_48 = arith.constant 0 : index
    %c0_49 = arith.constant 0 : index
    %84 = vector.load %arg8[%c1_47, %c0_48, %c0_49] : memref<3x16x32xf32, #tpu.memory_space<vmem>>, vector<1x16x32xf32>
    %85 = vector.shape_cast %84 : vector<1x16x32xf32> to vector<16x32xf32>
    %cst_50 = arith.constant dense<0.000000e+00> : vector<64x32xf32>
    %86 = tpu.matmul %42, %85, %cst_50 {dimension_numbers = #tpu.dot_dimension_numbers<[1], [0], [0], [1], [0, 0, 1, 1], [], []>} : vector<64x16xf32>, vector<16x32xf32>, vector<64x32xf32> -> vector<64x32xf32>
    %c1_51 = arith.constant 1 : index
    %c0_52 = arith.constant 0 : index
    %c0_53 = arith.constant 0 : index
    %87 = vector.load %arg9[%c1_51, %c0_52, %c0_53] : memref<3x1x32xf32, #tpu.memory_space<vmem>>, vector<1x1x32xf32>
    %88 = vector.shape_cast %87 : vector<1x1x32xf32> to vector<1x32xf32>
    %89 = vector.broadcast %88 : vector<1x32xf32> to vector<64x32xf32>
    %90 = arith.addf %86, %89 : vector<64x32xf32>
    %91 = vector.broadcast %53 : vector<64x1xf32> to vector<64x32xf32>
    %92 = arith.mulf %91, %90 : vector<64x32xf32>
    %c2_54 = arith.constant 2 : index
    %c0_55 = arith.constant 0 : index
    %c0_56 = arith.constant 0 : index
    %93 = vector.load %arg8[%c2_54, %c0_55, %c0_56] : memref<3x16x32xf32, #tpu.memory_space<vmem>>, vector<1x16x32xf32>
    %94 = vector.shape_cast %93 : vector<1x16x32xf32> to vector<16x32xf32>
    %cst_57 = arith.constant dense<0.000000e+00> : vector<64x32xf32>
    %95 = tpu.matmul %42, %94, %cst_57 {dimension_numbers = #tpu.dot_dimension_numbers<[1], [0], [0], [1], [0, 0, 1, 1], [], []>} : vector<64x16xf32>, vector<16x32xf32>, vector<64x32xf32> -> vector<64x32xf32>
    %c2_58 = arith.constant 2 : index
    %c0_59 = arith.constant 0 : index
    %c0_60 = arith.constant 0 : index
    %96 = vector.load %arg9[%c2_58, %c0_59, %c0_60] : memref<3x1x32xf32, #tpu.memory_space<vmem>>, vector<1x1x32xf32>
    %97 = vector.shape_cast %96 : vector<1x1x32xf32> to vector<1x32xf32>
    %98 = vector.broadcast %97 : vector<1x32xf32> to vector<64x32xf32>
    %99 = arith.addf %95, %98 : vector<64x32xf32>
    %100 = vector.broadcast %53 : vector<64x1xf32> to vector<64x32xf32>
    %101 = arith.mulf %100, %99 : vector<64x32xf32>
    %102 = arith.mulf %60, %83 : vector<64x32xf32>
    %103 = arith.mulf %67, %92 : vector<64x32xf32>
    %104 = arith.mulf %74, %101 : vector<64x32xf32>
    %105 = vector.extract_strided_slice %1 {offsets = [0, 0], sizes = [64, 1], strides = [1, 1]} : vector<64x3xf32> to vector<64x1xf32>
    %106 = arith.mulf %105, %14 : vector<64x1xf32>
    %107 = vector.extract_strided_slice %1 {offsets = [0, 1], sizes = [64, 1], strides = [1, 1]} : vector<64x3xf32> to vector<64x1xf32>
    %108 = arith.mulf %107, %14 : vector<64x1xf32>
    %109 = vector.extract_strided_slice %1 {offsets = [0, 2], sizes = [64, 1], strides = [1, 1]} : vector<64x3xf32> to vector<64x1xf32>
    %110 = arith.mulf %109, %14 : vector<64x1xf32>
    %c0_61 = arith.constant 0 : index
    %c0_62 = arith.constant 0 : index
    %c0_63 = arith.constant 0 : index
    %111 = vector.load %arg2[%c0_61, %c0_62, %c0_63] : memref<3x64x32xf32, #tpu.memory_space<vmem>>, vector<1x64x32xf32>
    %112 = vector.shape_cast %111 : vector<1x64x32xf32> to vector<64x32xf32>
    %113 = arith.mulf %112, %102 : vector<64x32xf32>
    %114 = vector.broadcast %106 : vector<64x1xf32> to vector<64x32xf32>
    %115 = arith.mulf %104, %114 : vector<64x32xf32>
    %116 = arith.addf %113, %115 : vector<64x32xf32>
    %c1_64 = arith.constant 1 : index
    %c0_65 = arith.constant 0 : index
    %c0_66 = arith.constant 0 : index
    %117 = vector.load %arg2[%c1_64, %c0_65, %c0_66] : memref<3x64x32xf32, #tpu.memory_space<vmem>>, vector<1x64x32xf32>
    %118 = vector.shape_cast %117 : vector<1x64x32xf32> to vector<64x32xf32>
    %119 = arith.mulf %118, %102 : vector<64x32xf32>
    %120 = vector.broadcast %108 : vector<64x1xf32> to vector<64x32xf32>
    %121 = arith.mulf %104, %120 : vector<64x32xf32>
    %122 = arith.addf %119, %121 : vector<64x32xf32>
    %c2_67 = arith.constant 2 : index
    %c0_68 = arith.constant 0 : index
    %c0_69 = arith.constant 0 : index
    %123 = vector.load %arg2[%c2_67, %c0_68, %c0_69] : memref<3x64x32xf32, #tpu.memory_space<vmem>>, vector<1x64x32xf32>
    %124 = vector.shape_cast %123 : vector<1x64x32xf32> to vector<64x32xf32>
    %125 = arith.mulf %124, %102 : vector<64x32xf32>
    %126 = vector.broadcast %110 : vector<64x1xf32> to vector<64x32xf32>
    %127 = arith.mulf %104, %126 : vector<64x32xf32>
    %128 = arith.addf %125, %127 : vector<64x32xf32>
    %129 = tpu.concatenate %103, %116, %122, %128 in 1 : vector<64x32xf32>, vector<64x32xf32>, vector<64x32xf32>, vector<64x32xf32> -> vector<64x128xf32>
    %c0_70 = arith.constant 0 : index
    %c0_71 = arith.constant 0 : index
    %130 = vector.load %arg10[%c0_70, %c0_71] : memref<64x128xf32, #tpu.memory_space<vmem>>, vector<64x128xf32>
    tpu.vector_store %arg10[%c0_70, %c0_71], %129 {strides = array<i32>} : memref<64x128xf32, #tpu.memory_space<vmem>>, vector<64x128xf32>,
    return
  }
  func.func @transform_0(%arg0: i32) -> (i32, i32) {
    %c0_i32 = arith.constant 0 : i32
    %c0_i32_0 = arith.constant 0 : i32
    return %arg0, %c0_i32 : i32, i32
  }
  func.func @transform_1(%arg0: i32) -> (i32, i32, i32) {
    %c0_i32 = arith.constant 0 : i32
    %c0_i32_0 = arith.constant 0 : i32
    %c0_i32_1 = arith.constant 0 : i32
    return %c0_i32, %arg0, %c0_i32_0 : i32, i32, i32
  }
  func.func @transform_2(%arg0: i32) -> (i32, i32) {
    %c0_i32 = arith.constant 0 : i32
    %c0_i32_0 = arith.constant 0 : i32
    return %arg0, %c0_i32 : i32, i32
  }
  func.func @transform_3(%arg0: i32) -> (i32, i32) {
    %c0_i32 = arith.constant 0 : i32
    %c0_i32_0 = arith.constant 0 : i32
    %c0_i32_1 = arith.constant 0 : i32
    return %c0_i32, %c0_i32_0 : i32, i32
  }
  func.func @transform_4(%arg0: i32) -> (i32, i32) {
    %c0_i32 = arith.constant 0 : i32
    %c0_i32_0 = arith.constant 0 : i32
    %c0_i32_1 = arith.constant 0 : i32
    return %c0_i32, %c0_i32_0 : i32, i32
  }
  func.func @transform_5(%arg0: i32) -> (i32, i32, i32) {
    %c0_i32 = arith.constant 0 : i32
    %c0_i32_0 = arith.constant 0 : i32
    %c0_i32_1 = arith.constant 0 : i32
    %c0_i32_2 = arith.constant 0 : i32
    return %c0_i32, %c0_i32_0, %c0_i32_1 : i32, i32, i32
  }
  func.func @transform_6(%arg0: i32) -> (i32, i32, i32) {
    %c0_i32 = arith.constant 0 : i32
    %c0_i32_0 = arith.constant 0 : i32
    %c0_i32_1 = arith.constant 0 : i32
    %c0_i32_2 = arith.constant 0 : i32
    return %c0_i32, %c0_i32_0, %c0_i32_1 : i32, i32, i32
  }
  func.func @transform_7(%arg0: i32) -> (i32, i32, i32) {
    %c0_i32 = arith.constant 0 : i32
    %c0_i32_0 = arith.constant 0 : i32
    %c0_i32_1 = arith.constant 0 : i32
    %c0_i32_2 = arith.constant 0 : i32
    return %c0_i32, %c0_i32_0, %c0_i32_1 : i32, i32, i32
  }
  func.func @transform_8(%arg0: i32) -> (i32, i32, i32) {
    %c0_i32 = arith.constant 0 : i32
    %c0_i32_0 = arith.constant 0 : i32
    %c0_i32_1 = arith.constant 0 : i32
    %c0_i32_2 = arith.constant 0 : i32
    return %c0_i32, %c0_i32_0, %c0_i32_1 : i32, i32, i32
  }
  func.func @transform_9(%arg0: i32) -> (i32, i32) {
    %c0_i32 = arith.constant 0 : i32
    %c0_i32_0 = arith.constant 0 : i32
    return %arg0, %c0_i32 : i32, i32
  }
}

</mosaic_0001>

<bundles_post_ra>
// kernel: tpu_custom_call.1
= control target key start
LH: loop header
LB: loop body
LE: loop exit
PB: predicated region body
PF: predicated region fallthrough
CT: control target
= control target key end

     0   :  { %vm57_vm0 = vcmask 23552   ;;  %vm157_vm1 = vcmask 261120   ;;  %s7024_s0 = inlined_call_operand.vmem [shape: f32[64,32], index: 0, kind: input, shape index: {}]   ;;  %s7025_s1 = inlined_call_operand.vmem [shape: f32[3,64,32], index: 1, kind: input, shape index: {}]   ;;  %s7026_s2 = inlined_call_operand.vmem [shape: f32[64,3], index: 2, kind: input, shape index: {}]   ;;  %s7027_s3 = inlined_call_operand.vmem [shape: f32[32,32], index: 3, kind: input, shape index: {}]   ;;  %s7028_s4 = inlined_call_operand.vmem [shape: f32[1,32], index: 4, kind: input, shape index: {}]   ;;  %s7029_s5 = inlined_call_operand.vmem [shape: f32[3,32,32], index: 5, kind: input, shape index: {}]   ;;  %s7030_s6 = inlined_call_operand.vmem [shape: f32[3,1,32], index: 6, kind: input, shape index: {}]   ;;  %s7031_s7 = inlined_call_operand.vmem [shape: f32[3,16,32], index: 7, kind: input, shape index: {}]   ;;  %s7032_s8 = inlined_call_operand.vmem [shape: f32[3,1,32], index: 8, kind: input, shape index: {}]   ;;  %s7033_s9 = inlined_call_operand.hbm [shape: f32[64,128], index: 9, kind: output, shape index: {}]  }
   0x1   :  { %v146_v0 = vld [vmem:[%s7027_s3] sm:$0xff]  ;;  %v147_v1 = vld [vmem:[%s7027_s3 + $0x8] sm:$0xff]  ;;  %v3999_v2 = vld [vmem:[%s7026_s2 + $0x10] sm:$0xff] }
   0x2   :  { %v3656_v3 = vpack.c.bf16 %v147_v1, %v146_v0  ;;  %v51_v4 = vmul.f32 %v3999_v2, %v3999_v2  ;;  %v4006_v5 = vld [vmem:[%s7026_s2] sm:$0xff]  ;;  %v148_v6 = vld [vmem:[%s7027_s3 + $0x10] sm:$0xff]  ;;  %v149_v7 = vld [vmem:[%s7027_s3 + $0x18] sm:$0xff] }
   0x3   :  { %v49_v8 = vmul.f32 %v4006_v5, %v4006_v5  ;;  %v3660_v9 = vpack.c.bf16 %v149_v7, %v148_v6  ;;  %v4019_v10 = vld [vmem:[%s7026_s2 + $0x18] sm:$0xff]  ;;  %v4024_v11 = vld [vmem:[%s7026_s2 + $0x8] sm:$0xff]  ;;  %v33_v15 = vld [vmem:[%s7024_s0] sm:$0xff] }
   0x4   :  { %3657 = vmatprep.subr.bf16.mxu0 %v3656_v3  ;;  %3700 = vmatprep.subr.bf16.mxu1 %v3656_v3  ;;  %v64_v12 = vsel %vm57_vm0, %v51_v4, 0.0  ;;  %v52_v13 = vmul.f32 %v4019_v10, %v4019_v10  ;;  %v50_v14 = vmul.f32 %v4024_v11, %v4024_v11  ;;  %v37_v17 = vld [vmem:[%s7024_s0 + $0x20] sm:$0xff]  ;;  %v4041_v18 = vld [vmem:[%s7026_s2 + $0x28] sm:$0xff] }
   0x5   :  { %3659 = vmatpush3.bf16.msra.mxu0 %v3656_v3  ;;  %3702 = vmatpush3.bf16.msra.mxu1 %v3656_v3  ;;  %v58_v16 = vsel %vm57_vm0, %v49_v8, 0.0  ;;  %v4046_v19 = vld [vmem:[%s7026_s2 + $0x20] sm:$0xff]  ;;  %v54_v22 = vmul.f32 %v4041_v18, %v4041_v18 }
   0x6   :  { %65 = vadd.xlane.f32.xlu1 %v64_v12  ;;  %59 = vadd.xlane.f32.xlu0 %v58_v16  ;;  %v67_v20 = vsel %vm57_vm0, %v52_v13, 0.0  ;;  %v61_v21 = vsel %vm57_vm0, %v50_v14, 0.0  ;;  %v53_v23 = vmul.f32 %v4046_v19, %v4046_v19 }
   0x7   :  { %3661 = vmatprep.subr.bf16.mxu0 %v3660_v9  ;;  %3701 = vmatprep.subr.bf16.mxu1 %v3660_v9 }
   0x8   :  { %14 = vsyncpa [#allocation3], 0  ;;  %3536 = vmatprep.mubr.msk.f32.mxu0 %vm157_vm1, %v33_v15  ;;  %3542 = vmatprep.mubr.msk.f32.mxu1 %vm157_vm1, %v37_v17  ;;  %v4059_v24 = vld [vmem:[%s7026_s2 + $0x38] sm:$0xff]  ;;  %v4064_v25 = vld [vmem:[%s7026_s2 + $0x30] sm:$0xff]  ;;  %v73_v30 = vsel %vm57_vm0, %v54_v22, 0.0  ;;  %v70_v31 = vsel %vm57_vm0, %v53_v23, 0.0  ;;  %v415_v54 = vlaneseq }
   0x9   :  { %3663 = vmatpush3.bf16.msra.mxu0 %v3660_v9  ;;  %3703 = vmatpush3.bf16.msra.mxu1 %v3660_v9  ;;  %v34_v26 = vld [vmem:[%s7024_s0 + $0x8] sm:$0xff]  ;;  %v35_v28 = vld [vmem:[%s7024_s0 + $0x10] sm:$0xff]  ;;  %v56_v32 = vmul.f32 %v4059_v24, %v4059_v24  ;;  %v55_v33 = vmul.f32 %v4064_v25, %v4064_v25  ;;  %v36_v34 = vld [vmem:[%s7024_s0 + $0x18] sm:$0xff]  ;;  %v3925_v38 = vmov 0   ;;  %v7038_v12 = vmov 1   ;;  %s3934_s14 = smov 32  }
   0xa   :  { %v38_v27 = vld [vmem:[%s7024_s0 + $0x28] sm:$0xff]  ;;  %68 = vadd.xlane.f32.xlu1 %v67_v20  ;;  %62 = vadd.xlane.f32.xlu0 %v61_v21  ;;  %v39_v29 = vld [vmem:[%s7024_s0 + $0x30] sm:$0xff]  ;;  %v40_v35 = vld [vmem:[%s7024_s0 + $0x38] sm:$0xff]  ;;  %v416_v62 = vand.u32 127, %v415_v54  ;;  %s3935_s15 = smov 64   ;;  %s3936_s18 = smov 96  }
   0xb   :  { %v79_v36 = vsel %vm57_vm0, %v56_v32, 0.0  ;;  %v76_v37 = vsel %vm57_vm0, %v55_v33, 0.0  ;;  %3783 = vset.pattern.permute.xlu0 %v3925_v38  ;;  %3784 = vset.pattern.permute.xlu1 %v3925_v38 }
   0xc   :  { %3537 = vmatmul.mubr.msk.f32.vlgmr.msra.gmra.mrb[0].mxu0 %vm157_vm1, %v34_v26  ;;  %3543 = vmatmul.mubr.msk.f32.vlgmr.msra.gmra.mrb[0].mxu1 %vm157_vm1, %v38_v27  ;;  %v417_v6 = vcvt.s32.f32 %v416_v62 }
   0xd   :  { %3539 = vmatprep.mubr.msk.f32.mxu0 %vm157_vm1, %v35_v28  ;;  %3545 = vmatprep.mubr.msk.f32.mxu1 %vm157_vm1, %v39_v29 }
   0xe   :  { %74 = vadd.xlane.f32.xlu1 %v73_v30  ;;  %71 = vadd.xlane.f32.xlu0 %v70_v31 }
  0x10   :  { %3540 = vmatmul.mubr.msk.f32.gmra.mrb[2].mxu0 %vm157_vm1, %v36_v34  ;;  %3546 = vmatmul.mubr.msk.f32.gmra.mrb[2].mxu1 %vm157_vm1, %v40_v35 }
  0x12   :  { %80 = vadd.xlane.f32.xlu1 %v79_v36  ;;  %77 = vadd.xlane.f32.xlu0 %v76_v37 }
  0x93   :  { %v66_v39 = vpop.xlane.xlu1 %65  ;;  %v60_v40 = vpop.xlane.xlu0 %59 }
  0x94   :  { %v82_v41 = vadd.f32 1e-08, %v60_v40  ;;  %v84_v42 = vadd.f32 1e-08, %v66_v39 }
  0x96   :  { %3789 = vrsqrt.f32 %v82_v41  ;;  %v98_v45 = vmul.f32 0.5, %v82_v41  ;;  %v100_v50 = vmul.f32 0.5, %v84_v42 }
  0x97   :  { %v63_v43 = vpop.xlane.xlu0 %62  ;;  %3791 = vrsqrt.f32 %v84_v42  ;;  %v69_v48 = vpop.xlane.xlu1 %68 }
  0x98   :  { %v83_v44 = vadd.f32 1e-08, %v63_v43  ;;  %v4098_v55 = vadd.f32 1e-08, %v69_v48 }
  0x9a   :  { %3793 = vrsqrt.f32 %v83_v44  ;;  %v99_v49 = vmul.f32 0.5, %v83_v44  ;;  %v101_v13 = vmul.f32 0.5, %v4098_v55 }
  0x9b   :  { %v75_v61 = vpop.xlane.xlu1 %74  ;;  %3795 = vrsqrt.f32 %v4098_v55  ;;  %v72_v4 = vpop.xlane.xlu0 %71 }
  0x9c   :  { %v4107_v3 = vadd.f32 1e-08, %v75_v61  ;;  %v4113_v9 = vadd.f32 1e-08, %v72_v4 }
  0x9e   :  { %3797 = vrsqrt.f32 %v4107_v3  ;;  %v103_v23 = vmul.f32 0.5, %v4107_v3  ;;  %v102_v32 = vmul.f32 0.5, %v4113_v9 }
  0x9f   :  { %3799 = vrsqrt.f32 %v4113_v9  ;;  %v81_v33 = vpop.xlane.xlu1 %80  ;;  %v78_v40 = vpop.xlane.xlu0 %77 }
  0xa0   :  { %v3790_v46 = vpop.eup %3789  ;;  %v4149_v39 = vadd.f32 1e-08, %v81_v33 }
  0xa1   :  { %v106_v47 = vmul.f32 %v3790_v46, %v98_v45  ;;  %v3792_v51 = vpop.eup %3791 }
  0xa2   :  { %v108_v58 = vmul.f32 %v3792_v51, %v100_v50  ;;  %3801 = vrsqrt.f32 %v4149_v39 }
  0xa3   :  { %v114_v52 = vmul.f32 %v3790_v46, %v106_v47  ;;  %v4156_v47 = vadd.f32 1e-08, %v78_v40 }
  0xa4   :  { %v3794_v53 = vpop.eup %3793  ;;  %v116_v0 = vmul.f32 %v3792_v51, %v108_v58  ;;  %v105_v58 = vmul.f32 0.5, %v4149_v39 }
  0xa5   :  { %v122_v56 = vsub.f32 1.5, %v114_v52  ;;  %v107_v57 = vmul.f32 %v3794_v53, %v99_v49  ;;  %v3796_v14 = vpop.eup %3795  ;;  %3803 = vrsqrt.f32 %v4156_v47 }
  0xa6   :  { %v124_v7 = vsub.f32 1.5, %v116_v0  ;;  %v109_v20 = vmul.f32 %v3796_v14, %v101_v13 }
  0xa7   :  { %v4100_v59 = vmul.f32 %v3790_v46, %v122_v56  ;;  %v115_v60 = vmul.f32 %v3794_v53, %v107_v57 }
  0xa8   :  { %v4117_v15 = vmul.f32 %v3792_v51, %v124_v7  ;;  %v3798_v26 = vpop.eup %3797  ;;  %v117_v28 = vmul.f32 %v3796_v14, %v109_v20  ;;  %v7034_v20 = vmov 2131351028  }
  0xa9   :  { %7137 = vst [vmem:[#allocation5_spill] sm:$0xff] %v4100_v59  ;;  %v4105_v63 = vmul.f32 %v4100_v59, %v4006_v5  ;;  %v123_v1 = vsub.f32 1.5, %v115_v60  ;;  %v418_v5 = vadd.f32 1.0, %v417_v6  ;;  %v4134_v27 = vmul.f32 %v4100_v59, %v82_v41  ;;  %v4142_v34 = vpop.eup %3799 }
  0xaa   :  { %7139 = vst [vmem:[#allocation7_spill] sm:$0xff] %v4117_v15  ;;  %v4126_v21 = vmul.f32 %v4117_v15, %v84_v42  ;;  %v111_v31 = vmul.f32 %v3798_v26, %v103_v23  ;;  %v125_v36 = vsub.f32 1.5, %v117_v28  ;;  %v110_v43 = vmul.f32 %v4142_v34, %v102_v32 }
  0xab   :  { %2953 = vperm.xlu0 %3783, %v4105_v63   ;;  %v4110_v8 = vmul.f32 %v3794_v53, %v123_v1  ;;  %v4123_v17 = vmul.f32 0.5235988, %v418_v5  ;;  %7143 = vst [vmem:[#allocation11_spill] sm:$0xff] %v4134_v27  ;;  %v4159_v49 = vmul.f32 0.5235988, %v4134_v27 }
  0xac   :  { %7141 = vst [vmem:[#allocation9_spill] sm:$0xff] %v4126_v21  ;;  %v119_v42 = vmul.f32 %v3798_v26, %v111_v31  ;;  %v4154_v46 = vmul.f32 %v3796_v14, %v125_v36  ;;  %v118_v53 = vmul.f32 %v4142_v34, %v110_v43  ;;  %v7039_v5 = vmov 683565275  }
  0xad   :  { %7138 = vst [vmem:[#allocation6_spill] sm:$0xff] %v4110_v8  ;;  %v4120_v16 = vmul.f32 %v4110_v8, %v83_v44  ;;  %v4138_v29 = vmul.f32 %v4123_v17, %v4126_v21  ;;  %v4146_v35 = vmul.f32 %v4123_v17, %v4134_v27  ;;  %7146 = vst [vmem:[#allocation14_spill] sm:$0xff] %v4159_v49  ;;  %v1287_v61 = vand.u32 2139095040, %v4159_v49 }
  0xae   :  { %7145 = vst [vmem:[#allocation13_spill] sm:$0xff] %v4154_v46  ;;  %v127_v52 = vsub.f32 1.5, %v119_v42  ;;  %v4167_v56 = vmul.f32 %v4154_v46, %v4098_v55  ;;  %v126_v6 = vsub.f32 1.5, %v118_v53  ;;  %v7036_v55 = vmov 2475754826  }
  0xaf   :  { %3786 = vset.pattern.permute.xlu0 %v7038_v12  ;;  %7140 = vst [vmem:[#allocation8_spill] sm:$0xff] %v4120_v16  ;;  %v4130_v22 = vmul.f32 %v4123_v17, %v4120_v16  ;;  %7144 = vst [vmem:[#allocation12_spill] sm:$0xff] %v4146_v35  ;;  %v639_v37 = vand.u32 2139095040, %v4138_v29  ;;  %v431_v45 = vand.u32 2139095040, %v4146_v35  ;;  %v7050_v31 = vmov 2102212464  }
  0xb0   :  { %7147 = vst [vmem:[#allocation15_spill] sm:$0xff] %v4167_v56  ;;  %v4172_v4 = vmul.f32 %v3798_v26, %v127_v52  ;;  %v7058_v32 = vmov 920167782   ;;  %v7042_v43 = vmov 1326507024  }
  0xb1   :  { %7142 = vst [vmem:[#allocation10_spill] sm:$0xff] %v4130_v22  ;;  %v535_v30 = vand.u32 2139095040, %v4130_v22  ;;  %v7041_v41 = vand.u32 2147483647, %v4130_v22  ;;  %v640_v48 = vshrl.u32 %v639_v37, 23  ;;  %v432_v54 = vshrl.u32 %v431_v45, 23 }
  0xb2   :  { %7148 = vst [vmem:[#allocation16_spill] sm:$0xff] %v4172_v4  ;;  %vm534_vm0 = vcmp.lt.s32.totalorder %v4130_v22, 0 }
  0xb3   :  { %v536_v38 = vshrl.u32 %v535_v30, 23  ;;  %v539_v51 = vand.u32 8388607, %v7041_v41  ;;  %v3308_v60 = vadd.s32 4294967169, %v640_v48  ;;  %v3300_v28 = vadd.s32 4294967169, %v432_v54 }
  0xb4   :  { %v4179_v30 = vmul.f32 %v4123_v17, %v4167_v56  ;;  %v4190_v48 = vmul.f32 %v4172_v4, %v4107_v3 }
  0xb5   :  { %v3304_v44 = vadd.s32 4294967169, %v536_v38  ;;  %v540_v0 = vor.u32 8388608, %v539_v51  ;;  %v646_v36 = vadd.s32 1, %v3308_v60 }
  0xb6   :  { %7149 = vst [vmem:[#allocation17_spill] sm:$0xff] %v4179_v30  ;;  %7150 = vst [vmem:[#allocation18_spill] sm:$0xff] %v4190_v48 }
  0xb7   :  { %v542_v50 = vadd.s32 1, %v3304_v44  ;;  %v580_v45 = vshll.u32 %v540_v0, 8  ;;  %vm647_vm7 = vcmp.gt.s32.totalorder %v646_v36, 0 }
  0xb9   :  { %vm543_vm2 = vcmp.gt.s32.totalorder %v542_v50, 0 }
  0xba   :  { %v544_v57 = vsel %vm543_vm2, %v542_v50, 0  ;;  %v4192_v50 = vpop.eup %3801 }
  0xbb   :  { %v546_v62 = vand.u32 31, %v544_v57  ;;  %v545_v1 = vshrl.u32 %v544_v57, 5 }
  0xbd   :  { %v547_v7 = vsub.s32 32, %v546_v62  ;;  %v549_v13 = vshll.u32 %v7039_v5, %v546_v62  ;;  %v552_v14 = vshll.u32 %v7036_v55, %v546_v62  ;;  %v555_v23 = vshll.u32 %v7034_v20, %v546_v62 }
  0xbe   :  { %v558_v26 = vshll.u32 %v7050_v31, %v546_v62  ;;  %v561_v33 = vshll.u32 %v7058_v32, %v546_v62  ;;  %vm564_vm3 = vcmp.lt.s32.totalorder %v545_v1, 1  ;;  %vm567_vm4 = vcmp.lt.s32.totalorder %v545_v1, 4 }
  0xbf   :  { %v550_v37 = vshrl.u32 %v7036_v55, %v547_v7  ;;  %v553_v38 = vshrl.u32 %v7034_v20, %v547_v7  ;;  %v556_v40 = vshrl.u32 %v7050_v31, %v547_v7  ;;  %v559_v42 = vshrl.u32 %v7058_v32, %v547_v7 }
  0xc0   :  { %v562_v44 = vshrl.u32 %v7042_v43, %v547_v7  ;;  %v548_v54 = vshrl.u32 %v7039_v5, %v547_v7  ;;  %v4198_v55 = vmul.f32 %v4142_v34, %v126_v6  ;;  %vm566_vm5 = vcmp.lt.s32.totalorder %v545_v1, 3 }
  0xc1   :  { %v551_v51 = vor.u32 %v550_v37, %v549_v13  ;;  %v554_v52 = vor.u32 %v553_v38, %v552_v14  ;;  %v557_v53 = vor.u32 %v556_v40, %v555_v23  ;;  %v560_v57 = vor.u32 %v559_v42, %v558_v26  ;;  %v4201_v14 = vpop.eup %3803 }
  0xc2   :  { %v563_v60 = vor.u32 %v562_v44, %v561_v33  ;;  %7151 = vst [vmem:[#allocation19_spill] sm:$0xff] %v4198_v55  ;;  %v113_v13 = vmul.f32 %v4192_v50, %v105_v58  ;;  %vm565_vm6 = vcmp.lt.s32.totalorder %v545_v1, 2  ;;  %v4205_v26 = vmul.f32 %v4123_v17, %v4190_v48 }
  0xc3   :  { %v569_v62 = vsel %vm567_vm4, %v557_v53, 2102212464  ;;  %v572_v20 = vsel %vm564_vm3, %v551_v51, %v554_v52  ;;  %v576_v0 = vsel %vm564_vm3, %v554_v52, %v557_v53  ;;  %v573_v3 = vsel %vm567_vm4, %v560_v57, 920167782 }
  0xc4   :  { %v577_v12 = vsel %vm567_vm4, %v563_v60, 1326507024  ;;  %v574_v7 = vsel %vm566_vm5, %v557_v53, %v573_v3  ;;  %7152 = vst [vmem:[#allocation20_spill] sm:$0xff] %v4205_v26  ;;  %v568_v33 = vsel %vm564_vm3, %v548_v54, %v551_v51  ;;  %v570_v37 = vsel %vm566_vm5, %v554_v52, %v569_v62 }
  0xc5   :  { %v578_v23 = vsel %vm566_vm5, %v560_v57, %v577_v12  ;;  %v575_v34 = vsel %vm565_vm6, %v572_v20, %v574_v7  ;;  %v743_v12 = vand.u32 2139095040, %v4179_v30  ;;  %v4220_v44 = vmul.f32 %v4198_v55, %v4113_v9 }
  0xc6   :  { %v579_v6 = vsel %vm565_vm6, %v576_v0, %v578_v23  ;;  %v4213_v58 = vmul.u32.u64.low %v580_v45, %v575_v34  ;;  %v4214_v42 = vmul.u32.u64.high %v580_v45, %v575_v34, %v4213_v58  ;;  %v104_v51 = vmul.f32 0.5, %v4156_v47 }
  0xc7   :  { %v4210_v38 = vmul.u32.u64.low %v580_v45, %v579_v6  ;;  %v4211_v40 = vmul.u32.u64.high %v580_v45, %v579_v6, %v4210_v38  ;;  %7153 = vst [vmem:[#allocation21_spill] sm:$0xff] %v4220_v44  ;;  %v4225_v20 = vmul.f32 %v4117_v15, %v3999_v2  ;;  %v1288_v52 = vshrl.u32 %v1287_v61, 23 }
  0xc8   :  { %v571_v53 = vsel %vm565_vm6, %v568_v33, %v570_v37  ;;  %v4230_v54 = vmul.f32 %v4110_v8, %v4024_v11  ;;  %v4233_v57 = vmul.f32 0.5235988, %v4126_v21  ;;  %v438_v60 = vadd.s32 1, %v3300_v28 }
  0xc9   :  { %v951_v9 = vand.u32 2139095040, %v4205_v26  ;;  %v4238_v62 = vmul.f32 %v4123_v17, %v4220_v44  ;;  %vm589_vm8 = vc.u32 %v4211_v40, %v4213_v58  ;;  %v590_v2 = vadd.s32 1, %v4214_v42 }
  0xca   :  { %7154 = vst [vmem:[#allocation22_spill] sm:$0xff] %v4233_v57  ;;  %v121_v61 = vmul.f32 %v4192_v50, %v113_v13  ;;  %2958 = vperm.xlu1 %3784, %v4230_v54   ;;  %3029 = vperm.xlu0 %3786, %v4230_v54   ;;  %v4248_v11 = vmul.f32 %v4198_v55, %v4046_v19  ;;  %v648_v1 = vsel %vm647_vm7, %v646_v36, 0  ;;  %v744_v28 = vshrl.u32 %v743_v12, 23 }
  0xcb   :  { %7155 = vst [vmem:[#allocation23_spill] sm:$0xff] %v4238_v62  ;;  %v587_v0 = vmul.u32 %v580_v45, %v571_v53  ;;  %v3332_v3 = vadd.s32 4294967169, %v1288_v52  ;;  %v4252_v7 = vmul.f32 0.5235988, %v4167_v56  ;;  %v591_v23 = vsel %vm589_vm8, %v590_v2, %v4214_v42 }
  0xcc   :  { %v847_v13 = vand.u32 2139095040, %v4238_v62  ;;  %v1493_v33 = vand.u32 2139095040, %v4233_v57  ;;  %vm439_vm9 = vcmp.gt.s32.totalorder %v438_v60, 0  ;;  %v112_v34 = vmul.f32 %v4201_v14, %v104_v51 }
  0xcd   :  { %7156 = vst [vmem:[#allocation24_spill] sm:$0xff] %v4252_v7  ;;  %v592_v37 = vadd.s32 %v591_v23, %v587_v0  ;;  %v4258_v19 = vand.u32 31, %v648_v1  ;;  %v952_v6 = vshrl.u32 %v951_v9, 23  ;;  %v129_v36 = vsub.f32 1.5, %v121_v61 }
  0xce   :  { %2963 = vperm.xlu1 %3784, %v4225_v20   ;;  %3041 = vperm.xlu0 %3786, %v4248_v11   ;;  %v4264_v45 = vmul.f32 %v4154_v46, %v4019_v10  ;;  %v3312_v38 = vadd.s32 4294967169, %v744_v28  ;;  %v1294_v12 = vadd.s32 1, %v3332_v3  ;;  %v1596_v52 = vand.u32 2139095040, %v4252_v7 }
  0xcf   :  { %v593_v42 = vadd.s32 536870912, %v592_v37  ;;  %v848_v53 = vshrl.u32 %v847_v13, 23  ;;  %v440_v2 = vsel %vm439_vm9, %v438_v60, 0  ;;  %v120_v9 = vmul.f32 %v4201_v14, %v112_v34 }
  0xd0   :  { %v4271_v61 = vsub.s32 32, %v4258_v19  ;;  %v4273_v0 = vshrl.u32 %v1493_v33, 23  ;;  %v3320_v23 = vadd.s32 4294967169, %v952_v6  ;;  %v4276_v10 = vmul.f32 %v4192_v50, %v129_v36 }
  0xd1   :  { %v4267_v51 = vshrl.u32 %v593_v42, 30  ;;  %v750_v60 = vadd.s32 1, %v3312_v38  ;;  %v4285_v34 = vmul.f32 0.5235988, %v4120_v16  ;;  %v4291_v6 = vand.u32 31, %v440_v2 }
  0xd2   :  { %7157 = vst [vmem:[#allocation25_spill] sm:$0xff] %v4273_v0  ;;  %7158 = vst [vmem:[#allocation26_spill] sm:$0xff] %v4276_v10  ;;  %2968 = vperm.xlu1 %3784, %v4264_v45   ;;  %vm1295_vm10 = vcmp.gt.s32.totalorder %v1294_v12, 0  ;;  %v1597_v50 = vshrl.u32 %v1596_v52, 23  ;;  %v3316_v36 = vadd.s32 4294967169, %v848_v53  ;;  %v4293_v5 = vshrl.u32 %v648_v1, 5 }
  0xd3   :  { %v595_v13 = vshll.u32 %v4267_v51, 30  ;;  %7159 = vst [vmem:[#allocation27_spill] sm:$0xff] %v4285_v34  ;;  %v662_v41 = vshll.u32 %v7050_v31, %v4258_v19  ;;  %v128_v43 = vsub.f32 1.5, %v120_v9  ;;  %v663_v21 = vshrl.u32 %v7058_v32, %v4271_v61 }
  0xd4   :  { %v958_v56 = vadd.s32 1, %v3320_v23  ;;  %v4303_v27 = vmul.f32 %v4276_v10, %v4149_v39  ;;  %v4308_v1 = vmul.f32 %v4172_v4, %v4041_v18  ;;  %v7161_v9 = vmov 1326507024  }
  0xd5   :  { %v4297_v38 = vsub.s32 %v592_v37, %v595_v13  ;;  %v665_v37 = vshll.u32 %v7058_v32, %v4258_v19  ;;  %v666_v23 = vshrl.u32 %v7161_v9, %v4271_v61  ;;  %vm751_vm11 = vcmp.gt.s32.totalorder %v750_v60, 0 }
  0xd6   :  { %7160 = vst [vmem:[#allocation28_spill] sm:$0xff] %v4303_v27  ;;  %2973 = vperm.xlu1 %3784, %v4248_v11   ;;  %v4323_v16 = vshrl.u32 %v440_v2, 5  ;;  %v4326_v18 = vsub.s32 32, %v4291_v6  ;;  %v4328_v57 = vadd.s32 4294967169, %v1597_v50  ;;  %v854_v44 = vadd.s32 1, %v3316_v36 }
  0xd7   :  { %v598_v39 = vsub.s32 0, %v4297_v38  ;;  %vm671_vm12 = vcmp.lt.s32.totalorder %v4293_v5, 4  ;;  %v4332_v32 = vsel %vm1295_vm10, %v1294_v12, 0  ;;  %v4336_v7 = vmul.f32 %v4201_v14, %v128_v43 }
  0xd8   :  { %7162 = vst [vmem:[#allocation29_spill] sm:$0xff] %v4328_v57  ;;  %7163 = vst [vmem:[#allocation30_spill] sm:$0xff] %v4332_v32  ;;  %v4338_v0 = vor.u32 %v663_v21, %v662_v41  ;;  %v752_v2 = vsel %vm751_vm11, %v750_v60, 0  ;;  %vm959_vm13 = vcmp.gt.s32.totalorder %v958_v56, 0  ;;  %v4342_v49 = vmul.f32 %v4123_v17, %v4303_v27 }
  0xd9   :  { %v3305_v48 = vmin.u32 %v598_v39, %v4297_v38  ;;  %7164 = vst [vmem:[#allocation31_spill] sm:$0xff] %v4336_v7  ;;  %v667_v50 = vor.u32 %v666_v23, %v665_v37  ;;  %v7167_v36 = vmov 2102212464   ;;  %v7168_v4 = vmov 920167782  }
  0xda   :  { %7165 = vst [vmem:[#allocation32_spill] sm:$0xff] %v4338_v0  ;;  %7166 = vst [vmem:[#allocation33_spill] sm:$0xff] %v4342_v49  ;;  %2978 = vperm.xlu1 %3784, %v4308_v1   ;;  %v454_v12 = vshll.u32 %v7167_v36, %v4291_v6  ;;  %v4349_v39 = vshll.u32 %v7168_v4, %v4291_v6  ;;  %v455_v21 = vshrl.u32 %v7168_v4, %v4326_v18  ;;  %v7086_v62 = vmov 2  }
  0xdb   :  { %v600_v43 = vclz %v3305_v48  ;;  %v4355_v41 = vshrl.u32 %v7161_v9, %v4326_v18  ;;  %vm463_vm14 = vcmp.lt.s32.totalorder %v4323_v16, 4  ;;  %vm855_vm15 = vcmp.gt.s32.totalorder %v854_v44, 0 }
  0xdc   :  { %v4358_v14 = vand.u32 31, %v752_v2  ;;  %v960_v37 = vsel %vm959_vm13, %v958_v56, 0  ;;  %v4363_v23 = vmul.f32 %v4336_v7, %v4156_v47  ;;  %v4368_v48 = vsel %vm671_vm12, %v4338_v0, 920167782 }
  0xdd   :  { %v3306_v60 = vadd.s32 4294967294, %v600_v43  ;;  %7171 = vst [vmem:[#allocation36_spill] sm:$0xff] %v4368_v48  ;;  %v4370_v27 = vshrl.u32 %v752_v2, 5  ;;  %v1159_v55 = vand.u32 2139095040, %v4342_v49  ;;  %v4375_v57 = vmul.f32 %v4336_v7, %v4064_v25 }
  0xde   :  { %7169 = vst [vmem:[#allocation34_spill] sm:$0xff] %v4358_v14  ;;  %7170 = vst [vmem:[#allocation35_spill] sm:$0xff] %v4363_v23  ;;  %v4379_v56 = vsel %vm671_vm12, %v667_v50, 1326507024  ;;  %v4381_v47 = vsel %vm855_vm15, %v854_v44, 0  ;;  %v4385_v43 = vmul.f32 %v4123_v17, %v4363_v23  ;;  %v4387_v32 = vor.u32 %v455_v21, %v454_v12 }
  0xdf   :  { %v4279_v28 = vpop.f32.mrb[0].mxu0  ;;  %v4281_v3 = vpop.f32.mrb[0].mxu1  ;;  %7172 = vst [vmem:[#allocation37_spill] sm:$0xff] %v4370_v27  ;;  %vm3307_vm2 = vcmp.lt.s32.totalorder %v3306_v60, 0  ;;  %v7174_v2 = vand.u32 2147483647, %v4130_v22  ;;  %3049 = vperm.xlu0 %3786, %v4375_v57   ;;  %2983 = vperm.xlu1 %3784, %v4375_v57   ;;  %v4401_v44 = vmul.f32 %v4276_v10, %v4059_v24  ;;  %v588_v50 = vadd.s32 %v4213_v58, %v4211_v40 }
  0xe0   :  { %v4287_v42 = vpop.f32.mrb[1].mxu0  ;;  %v4289_v33 = vpop.f32.mrb[1].mxu1  ;;  %7173 = vst [vmem:[#allocation38_spill] sm:$0xff] %v4385_v43  ;;  %v603_v25 = vsel %vm3307_vm2, 0, %v3306_v60  ;;  %v4395_v7 = vand.u32 31, %v960_v37  ;;  %v4404_v17 = vsub.s32 32, %v4358_v14  ;;  %v459_v26 = vor.u32 %v4355_v41, %v4349_v39 }
  0xe1   :  { %vm4391_vm3 = vcmp.le.f32.partialorder %v7174_v2, 0.7853982  ;;  %v604_v12 = vsub.s32 32, %v603_v25  ;;  %v608_v21 = vsub.s32 4294967266, %v603_v25  ;;  %v618_v60 = vsub.s32 4, %v4267_v51 }
  0xe2   :  { %7177 = vst [vmem:[#allocation39_spill] sm:$0xff] %v4395_v7  ;;  %7178 = vst [vmem:[#allocation40_spill] sm:$0xff] %v4404_v17  ;;  %v1390_v2 = vand.u32 2139095040, %v4285_v34  ;;  %v4411_v23 = vand.u32 31, %v4381_v47  ;;  %v1160_v46 = vshrl.u32 %v1159_v55, 23  ;;  %v605_v15 = vshll.u32 %v4297_v38, %v603_v25 }
  0xe3   :  { %v4310_v52 = vpop.f32.mrb[2].mxu0  ;;  %v4312_v53 = vpop.f32.mrb[2].mxu1  ;;  %v606_v24 = vshrl.u32 %v588_v50, %v604_v12  ;;  %v609_v10 = vadd.s32 127, %v608_v21  ;;  %v1055_v59 = vand.u32 2139095040, %v4385_v43  ;;  %v766_v40 = vshll.u32 %v7167_v36, %v4358_v14  ;;  %3787 = vset.pattern.permute.xlu0 %v7086_v62  ;;  %2988 = vperm.xlu1 %3784, %v4401_v44   ;;  %v4443_v62 = vld [vmem:[%s7028_s4] ss:$0 sm:$0xff] }
  0xe4   :  { %v4319_v13 = vpop.f32.mrb[3].mxu0  ;;  %v4321_v31 = vpop.f32.mrb[3].mxu1  ;;  %7179 = vst [vmem:[#allocation41_spill] sm:$0xff] %v4411_v23  ;;  %v769_v58 = vshll.u32 %v7168_v4, %v4358_v14  ;;  %v4422_v34 = vsub.s32 32, %v4395_v7  ;;  %v4429_v55 = vsel %vm463_vm14, %v4387_v32, 920167782  ;;  %v767_v38 = vshrl.u32 %v7168_v4, %v4404_v17  ;;  %3090 = vperm.xlu0 %3787, %v4105_v63  }
  0xe5   :  { %vm775_vm4 = vcmp.lt.s32.totalorder %v4370_v27, 4  ;;  %v607_v39 = vor.u32 %v606_v24, %v605_v15  ;;  %v610_v41 = vshll.u32 %v609_v10, 23  ;;  %v770_v25 = vshrl.u32 %v7161_v9, %v4404_v17 }
  0xe6   :  { %7180 = vst [vmem:[#allocation42_spill] sm:$0xff] %v4422_v34  ;;  %v619_v50 = vsel %vm534_vm0, %v618_v60, %v4267_v51  ;;  %v1391_v12 = vshrl.u32 %v1390_v2, 23  ;;  %v3328_v21 = vadd.s32 4294967169, %v1160_v46  ;;  %v4445_v8 = vshrl.u32 %v960_v37, 5 }
  0xe7   :  { %v611_v43 = vor.u32 4788187, %v610_v41  ;;  %v4448_v15 = vsub.s32 32, %v4411_v23  ;;  %v1056_v10 = vshrl.u32 %v1055_v59, 23  ;;  %v974_v24 = vshll.u32 %v7167_v36, %v4395_v7 }
  0xe8   :  { %7181 = vst [vmem:[#allocation43_spill] sm:$0xff] %v4445_v8  ;;  %v975_v51 = vshrl.u32 %v7168_v4, %v4422_v34  ;;  %v977_v46 = vshll.u32 %v7168_v4, %v4395_v7  ;;  %v978_v60 = vshrl.u32 %v7161_v9, %v4422_v34  ;;  %v7183_v2 = vmov 1   ;;  %3102 = vperm.xlu0 %3787, %v4264_v45  }
  0xe9   :  { %7182 = vst [vmem:[#allocation44_spill] sm:$0xff] %v4448_v15  ;;  %3785 = vset.pattern.permute.xlu1 %v7183_v2  ;;  %v612_v37 = vand.u32 2147483647, %v611_v43  ;;  %v614_v41 = vcvt.s32.f32 %v607_v39  ;;  %v621_v17 = vsel %vm4391_vm3, 0, %v619_v50  ;;  %v4465_v59 = vadd.f32 %v4279_v28, %v4443_v62 }
  0xea   :  { %3025 = vperm.xlu1 %3785, %v4105_v63   ;;  %v4469_v7 = vsel %vm463_vm14, %v459_v26, 1326507024  ;;  %v4471_v34 = vor.u32 %v767_v38, %v766_v40  ;;  %v771_v2 = vor.u32 %v770_v25, %v769_v58  ;;  %v1166_v43 = vadd.s32 1, %v3328_v21 }
  0xeb   :  { %v615_v39 = vmul.f32 %v614_v41, %v612_v37  ;;  %v870_v50 = vshll.u32 %v7167_v36, %v4411_v23  ;;  %v871_v14 = vshrl.u32 %v7168_v4, %v4448_v15  ;;  %v3324_v63 = vadd.s32 4294967169, %v1056_v10 }
  0xec   :  { %7184 = vst [vmem:[#allocation45_spill] sm:$0xff] %v4471_v34  ;;  %v625_v30 = vadd.s32 3, %v621_v17  ;;  %v3336_v48 = vadd.s32 4294967169, %v1391_v12  ;;  %vm983_vm5 = vcmp.lt.s32.totalorder %v4445_v8, 4  ;;  %v4479_v28 = vshrl.u32 %v4381_v47, 5  ;;  %3110 = vperm.xlu0 %3787, %v4308_v1  }
  0xed   :  { %v616_v26 = vxor.u32 2147483648, %v615_v39  ;;  %v4481_v40 = vor.u32 %v975_v51, %v974_v24  ;;  %v979_v58 = vor.u32 %v978_v60, %v977_v46  ;;  %v296_v38 = vand.u32 2147483647, %v4465_v59 }
  0xee   :  { %7185 = vst [vmem:[#allocation46_spill] sm:$0xff] %v4479_v28  ;;  %3033 = vperm.xlu1 %3785, %v4225_v20   ;;  %v873_v25 = vshll.u32 %v7168_v4, %v4411_v23  ;;  %v874_v17 = vshrl.u32 %v7161_v9, %v4448_v15  ;;  %vm1167_vm6 = vcmp.gt.s32.totalorder %v1166_v43, 0  ;;  %v4492_v47 = vadd.f32 %v4281_v3, %v4443_v62 }
  0xef   :  { %7186 = vst [vmem:[#allocation47_spill] sm:$0xff] %v4481_v40  ;;  %v4494_v12 = vor.u32 %v871_v14, %v870_v50  ;;  %v1062_v21 = vadd.s32 1, %v3324_v63  ;;  %v304_v10 = vsub.f32 0.0, %v296_v38  ;;  %v4498_v24 = vadd.f32 %v4443_v62, %v4287_v42 }
  0xf0   :  { %v4503_v51 = vsel %vm775_vm4, %v4471_v34, 920167782  ;;  %v4507_v46 = vsel %vm775_vm4, %v771_v2, 1326507024  ;;  %v4509_v60 = vadd.s32 1, %v3336_v48  ;;  %vm879_vm7 = vcmp.lt.s32.totalorder %v4479_v28, 4  ;;  %3118 = vperm.xlu0 %3787, %v4401_v44  }
  0xf1   :  { %7187 = vst [vmem:[#allocation48_spill] sm:$0xff] %v4494_v12  ;;  %7188 = vst [vmem:[#allocation49_spill] sm:$0xff] %v4503_v51  ;;  %v617_v3 = vsel %vm534_vm0, %v616_v26, %v615_v39  ;;  %v4514_v14 = vand.u32 3, %v625_v30  ;;  %v1168_v42 = vsel %vm1167_vm6, %v1166_v43, 0  ;;  %v313_v37 = vmul.f32 1.442695, %v304_v10 }
  0xf2   :  { %7189 = vst [vmem:[#allocation50_spill] sm:$0xff] %v4507_v46  ;;  %7190 = vst [vmem:[#allocation51_spill] sm:$0xff] %v4509_v60  ;;  %3037 = vperm.xlu1 %3785, %v4264_v45   ;;  %v4521_v41 = vsel %vm983_vm5, %v4481_v40, 920167782  ;;  %v4525_v48 = vsel %vm983_vm5, %v979_v58, 1326507024  ;;  %v875_v2 = vor.u32 %v874_v17, %v873_v25  ;;  %v620_v43 = vsel %vm4391_vm3, %v4130_v22, %v617_v3 }
  0xf3   :  { %7191 = vst [vmem:[#allocation52_spill] sm:$0xff] %v4521_v41  ;;  %7192 = vst [vmem:[#allocation53_spill] sm:$0xff] %v4525_v48  ;;  %v300_v39 = vand.u32 2147483647, %v4492_v47  ;;  %v4531_v30 = vsel %vm879_vm7, %v4494_v12, 920167782  ;;  %3805 = vpow2.f32 %v313_v37  ;;  %v4541_v26 = vadd.f32 %v4443_v62, %v4289_v33 }
  0xf4   :  { %7193 = vst [vmem:[#allocation54_spill] sm:$0xff] %v4531_v30  ;;  %vm1063_vm8 = vcmp.gt.s32.totalorder %v1062_v21, 0  ;;  %v295_v45 = vand.u32 2147483647, %v4498_v24  ;;  %v4537_v50 = vand.u32 31, %v1168_v42  ;;  %v4546_v38 = vadd.f32 %v4310_v52, %v4443_v62  ;;  %v3373_v33 = vld [vmem:[%s7029_s5 + $0x20] sm:$0xff] }
  0xf5   :  { %v308_v63 = vsub.f32 0.0, %v300_v39  ;;  %v4550_v25 = vadd.f32 %v4312_v53, %v4443_v62  ;;  %v4554_v49 = vadd.f32 %v4443_v62, %v4319_v13  ;;  %v4562_v17 = vsel %vm1063_vm8, %v1062_v21, 0  ;;  %v2132_v13 = vld [vmem:[%s7029_s5] sm:$0xff]  ;;  %v2133_v3 = vld [vmem:[%s7029_s5 + $0x8] sm:$0xff]  ;;  %v3376_v60 = vld [vmem:[%s7029_s5 + $0x38] sm:$0xff] }
  0xf6   :  { %7194 = vst [vmem:[#allocation55_spill] sm:$0xff] %v4537_v50  ;;  %3045 = vperm.xlu1 %3785, %v4308_v1   ;;  %v303_v58 = vsub.f32 0.0, %v295_v45  ;;  %v3374_v1 = vld [vmem:[%s7029_s5 + $0x28] sm:$0xff]  ;;  %7195 = vst [vmem:[#allocation56_spill] sm:$0xff] %v4562_v17  ;;  %v299_v10 = vand.u32 2147483647, %v4541_v26  ;;  %v4567_v53 = vadd.f32 %v4443_v62, %v4321_v31  ;;  %3807 = vcosq.f32 %v620_v43 }
  0xf7   :  { %v321_v52 = vmul.f32 1.442695, %v308_v63  ;;  %v4577_v21 = vsel %vm879_vm7, %v875_v2, 1326507024  ;;  %v298_v39 = vand.u32 2147483647, %v4546_v38  ;;  %v3672_v8 = vpack.c.bf16 %v3374_v1, %v3373_v33 }
  0xf8   :  { %7196 = vst [vmem:[#allocation57_spill] sm:$0xff] %v4577_v21  ;;  %v311_v37 = vmul.f32 1.442695, %v303_v58  ;;  %v4581_v45 = vsub.s32 32, %v4537_v50  ;;  %v307_v31 = vsub.f32 0.0, %v299_v10  ;;  %v3375_v63 = vld [vmem:[%s7029_s5 + $0x30] sm:$0xff] }
  0xf9   :  { %3809 = vpow2.f32 %v321_v52  ;;  %v302_v62 = vand.u32 2147483647, %v4550_v25  ;;  %v4591_v2 = vand.u32 31, %v4562_v17  ;;  %v306_v58 = vsub.f32 0.0, %v298_v39  ;;  %v2134_v10 = vld [vmem:[%s7029_s5 + $0x10] sm:$0xff]  ;;  %v2135_v12 = vld [vmem:[%s7029_s5 + $0x18] sm:$0xff]  ;;  %3673 = vmatprep.subr.bf16.mxu0 %v3672_v8 }
  0xfa   :  { %7197 = vst [vmem:[#allocation58_spill] sm:$0xff] %v4581_v45  ;;  %3053 = vperm.xlu1 %3785, %v4401_v44   ;;  %3811 = vpow2.f32 %v311_v37  ;;  %v297_v52 = vand.u32 2147483647, %v4554_v49  ;;  %v319_v41 = vmul.f32 1.442695, %v307_v31  ;;  %v3664_v44 = vpack.c.bf16 %v2133_v3, %v2132_v13  ;;  %v2508_v31 = vld [vmem:[%s7031_s7] sm:$0xff]  ;;  %3675 = vmatpush3.bf16.msra.mxu0 %v3672_v8 }
  0xfb   :  { %7198 = vst [vmem:[#allocation59_spill] sm:$0xff] %v4591_v2  ;;  %v310_v40 = vsub.f32 0.0, %v302_v62  ;;  %v301_v48 = vand.u32 2147483647, %v4567_v53  ;;  %v317_v21 = vmul.f32 1.442695, %v306_v58  ;;  %v3676_v37 = vpack.c.bf16 %v3376_v60, %v3375_v63 }
  0xfc   :  { %v305_v30 = vsub.f32 0.0, %v297_v52  ;;  %v4602_v39 = vshrl.u32 %v1168_v42, 5  ;;  %3813 = vpow2.f32 %v319_v41  ;;  %v2509_v33 = vld [vmem:[%s7031_s7 + $0x8] sm:$0xff]  ;;  %v4614_v13 = vshll.u32 %v7167_v36, %v4537_v50  ;;  %3665 = vmatprep.subr.bf16.mxu1 %v3664_v44 }
  0xfd   :  { %v325_v28 = vmul.f32 1.442695, %v310_v40  ;;  %v309_v15 = vsub.f32 0.0, %v301_v48  ;;  %v4610_v1 = vpop.eup %3805  ;;  %v7201_v60 = vmov 2   ;;  %3815 = vpow2.f32 %v317_v21  ;;  %v3387_v21 = vld [vmem:[%s7029_s5 + $0x40] sm:$0xff]  ;;  %3667 = vmatpush3.bf16.msra.mxu1 %v3664_v44  ;;  %3677 = vmatprep.subr.bf16.mxu0 %v3676_v37 }
  0xfe   :  { %7199 = vst [vmem:[#allocation60_spill] sm:$0xff] %v4602_v39  ;;  %7200 = vst [vmem:[#allocation61_spill] sm:$0xff] %v4614_v13  ;;  %3788 = vset.pattern.permute.xlu1 %v7201_v60  ;;  %v315_v40 = vmul.f32 1.442695, %v305_v30  ;;  %v3668_v42 = vpack.c.bf16 %v2135_v12, %v2134_v10  ;;  %3817 = vsinq.f32 %v620_v43  ;;  %v4619_v41 = vshll.u32 %v7168_v4, %v4537_v50  ;;  %v3388_v12 = vld [vmem:[%s7029_s5 + $0x48] sm:$0xff] }
  0xff   :  { %v4622_v48 = vsub.s32 32, %v4591_v2  ;;  %v336_v3 = vadd.f32 1.0, %v4610_v1  ;;  %3094 = vperm.xlu1 %3788, %v4230_v54   ;;  %v4634_v30 = vshrl.u32 %v7168_v4, %v4581_v45  ;;  %3819 = vpow2.f32 %v325_v28  ;;  %3679 = vmatpush3.bf16.msra.mxu0 %v3676_v37  ;;  %v3390_v37 = vld [vmem:[%s7029_s5 + $0x58] sm:$0xff] }
 0x100   :  { %7202 = vst [vmem:[#allocation62_spill] sm:$0xff] %v4619_v41  ;;  %v323_v43 = vmul.f32 1.442695, %v309_v15  ;;  %v4636_v62 = vpack.c.bf16 %v2509_v33, %v2508_v31  ;;  %v4640_v8 = vshrl.u32 %v7161_v9, %v4581_v45  ;;  %v4644_v54 = vshll.u32 %v7167_v36, %v4591_v2  ;;  %3669 = vmatprep.subr.bf16.mxu1 %v3668_v42  ;;  %v4647_v58 = vpop.eup %3807 }
 0x101   :  { %7203 = vst [vmem:[#allocation63_spill] sm:$0xff] %v4622_v48  ;;  %7204 = vst [vmem:[#allocation64_spill] sm:$0xff] %v4634_v30  ;;  %3821 = vlog2.f32 %v336_v3  ;;  %v4651_v15 = vshll.u32 %v7168_v4, %v4591_v2  ;;  %v339_v28 = vmul.f32 -0.5, %v4610_v1  ;;  %v4654_v52 = vpack.c.bf16 %v3388_v12, %v3387_v21  ;;  %3671 = vmatpush3.bf16.msra.mxu1 %v3668_v42 }
 0x102   :  { %7205 = vst [vmem:[#allocation65_spill] sm:$0xff] %v4640_v8  ;;  %7206 = vst [vmem:[#allocation66_spill] sm:$0xff] %v4644_v54  ;;  %3823 = vpow2.f32 %v315_v40  ;;  %v4658_v44 = vshrl.u32 %v7168_v4, %v4622_v48  ;;  %v342_v31 = vand.u32 2147483647, %v4610_v1  ;;  %3689 = vmatprep.subr.bf16.mxu0 %v4636_v62  ;;  %vm460_vm3 = vcmp.lt.s32.totalorder %v4323_v16, 1 }
 0x103   :  { %7207 = vst [vmem:[#allocation67_spill] sm:$0xff] %v4647_v58  ;;  %7208 = vst [vmem:[#allocation68_spill] sm:$0xff] %v4651_v15  ;;  %v3810_v10 = vpop.eup %3809  ;;  %3098 = vperm.xlu1 %3788, %v4225_v20   ;;  %3825 = vpow2.f32 %v323_v43  ;;  %3681 = vmatprep.subr.bf16.mxu1 %v4654_v52  ;;  %v3389_v20 = vld [vmem:[%s7029_s5 + $0x50] sm:$0xff]  ;;  %v340_v43 = vadd.f32 1.0, %v339_v28  ;;  %vm461_vm6 = vcmp.lt.s32.totalorder %v4323_v16, 2  ;;  %vm462_vm8 = vcmp.lt.s32.totalorder %v4323_v16, 3 }
 0x104   :  { %7209 = vst [vmem:[#allocation69_spill] sm:$0xff] %v4658_v44  ;;  %v3812_v60 = vpop.eup %3811  ;;  %v372_v3 = vadd.f32 1.0, %v3810_v10  ;;  %v375_v12 = vmul.f32 -0.5, %v3810_v10  ;;  %vm4677_vm9 = vcmp.lt.f32.partialorder %v342_v31, 0.0004427343  ;;  %v474_v0 = vsel %vm462_vm8, %v4387_v32, %v4469_v7 }
 0x105   :  { %v327_v4 = vadd.f32 1.0, %v3812_v60  ;;  %v330_v45 = vmul.f32 -0.5, %v3812_v60  ;;  %v333_v33 = vand.u32 2147483647, %v3812_v60  ;;  %v378_v41 = vand.u32 2147483647, %v3810_v10 }
 0x106   :  { %3827 = vlog2.f32 %v372_v3  ;;  %v3814_v40 = vpop.eup %3813  ;;  %v4683_v3 = vpack.c.bf16 %v3390_v37, %v3389_v20  ;;  %v376_v21 = vadd.f32 1.0, %v375_v12  ;;  %v7216_v12 = vmov 683565275  }
 0x107   :  { %3829 = vlog2.f32 %v327_v4  ;;  %3106 = vperm.xlu1 %3788, %v4248_v11   ;;  %v3816_v8 = vpop.eup %3815  ;;  %v363_v39 = vadd.f32 1.0, %v3814_v40  ;;  %v366_v28 = vmul.f32 -0.5, %v3814_v40  ;;  %v331_v30 = vadd.f32 1.0, %v330_v45 }
 0x108   :  { %v4685_v42 = vpop.eup %3817  ;;  %v354_v31 = vadd.f32 1.0, %v3816_v8  ;;  %v357_v13 = vmul.f32 -0.5, %v3816_v8  ;;  %v341_v4 = vmul.f32 %v4610_v1, %v340_v43  ;;  %v369_v50 = vand.u32 2147483647, %v3814_v40 }
 0x109   :  { %7212 = vst [vmem:[#allocation70_spill] sm:$0xff] %v4685_v42  ;;  %v4687_v2 = vpop.eup %3819  ;;  %3831 = vlog2.f32 %v363_v39  ;;  %v7213_v11 = vand.u32 2147483647, %v4146_v35  ;;  %vm4694_vm10 = vcmp.lt.f32.partialorder %v333_v33, 0.0004427343  ;;  %v4702_v37 = vshrl.u32 %v7216_v12, %v4326_v18 }
 0x10a   :  { %3833 = vlog2.f32 %v354_v31  ;;  %v390_v45 = vadd.f32 1.0, %v4687_v2  ;;  %v367_v43 = vadd.f32 1.0, %v366_v28  ;;  %v360_v34 = vand.u32 2147483647, %v3816_v8 }
 0x10b   :  { %v4692_v23 = vand.u32 8388607, %v7213_v11  ;;  %v3822_v51 = vpop.eup %3821  ;;  %3114 = vperm.xlu1 %3788, %v4375_v57   ;;  %v393_v11 = vmul.f32 -0.5, %v4687_v2  ;;  %v377_v33 = vmul.f32 %v3810_v10, %v376_v21  ;;  %vm4705_vm11 = vcmp.lt.f32.partialorder %v378_v41, 0.0004427343 }
 0x10c   :  { %v3824_v39 = vpop.eup %3823  ;;  %v338_v1 = vmul.f32 0.6931472, %v3822_v51  ;;  %v332_v31 = vmul.f32 %v3812_v60, %v331_v30  ;;  %v358_v27 = vadd.f32 1.0, %v357_v13  ;;  %vm4711_vm13 = vcmp.lt.f32.partialorder %v369_v50, 0.0004427343 }
 0x10d   :  { %v3826_v46 = vpop.eup %3825  ;;  %v345_v15 = vadd.f32 1.0, %v3824_v39  ;;  %3835 = vlog2.f32 %v390_v45  ;;  %v348_v51 = vmul.f32 -0.5, %v3824_v39  ;;  %v394_v28 = vadd.f32 1.0, %v393_v11 }
 0x10e   :  { %v344_v57 = vsel %vm4677_vm9, %v341_v4, %v338_v1  ;;  %v381_v54 = vadd.f32 1.0, %v3826_v46  ;;  %v368_v21 = vmul.f32 %v3814_v40, %v367_v43  ;;  %vm4716_vm15 = vcmp.lt.f32.partialorder %v360_v34, 0.0004427343 }
 0x10f   :  { %3837 = vlog2.f32 %v345_v15  ;;  %v384_v63 = vmul.f32 -0.5, %v3826_v46  ;;  %v7223_v60 = vmax.f32 %v4465_v59, 0.0  ;;  %v359_v45 = vmul.f32 %v3816_v8, %v358_v27 }
 0x110   :  { %v3828_v10 = vpop.eup %3827  ;;  %v351_v1 = vand.u32 2147483647, %v3824_v39  ;;  %3839 = vlog2.f32 %v381_v54  ;;  %v349_v17 = vadd.f32 1.0, %v348_v51  ;;  %v445_v40 = vshll.u32 %v7216_v12, %v4291_v6 }
 0x111   :  { %v3830_v50 = vpop.eup %3829  ;;  %v400_v4 = vadd.f32 %v344_v57, %v7223_v60  ;;  %v374_v15 = vmul.f32 0.6931472, %v3828_v10  ;;  %v4726_v34 = vmul.f32 %v4687_v2, %v394_v28  ;;  %v7224_v43 = vmov 2475754826  }
 0x112   :  { %v329_v11 = vmul.f32 0.6931472, %v3830_v50  ;;  %v446_v13 = vshrl.u32 %v7224_v43, %v4326_v18  ;;  %v448_v41 = vshll.u32 %v7224_v43, %v4291_v6  ;;  %v7225_v59 = vmov 2131351028  }
 0x113   :  { %v449_v27 = vshrl.u32 %v7225_v59, %v4326_v18  ;;  %v3832_v8 = vpop.eup %3831  ;;  %v385_v57 = vadd.f32 1.0, %v384_v63  ;;  %v387_v51 = vand.u32 2147483647, %v3826_v46  ;;  %v451_v10 = vshll.u32 %v7225_v59, %v4291_v6 }
 0x114   :  { %v335_v54 = vsel %vm4694_vm10, %v332_v31, %v329_v11  ;;  %v3834_v28 = vpop.eup %3833  ;;  %v7226_v50 = vmax.f32 %v4498_v24, 0.0  ;;  %v365_v9 = vmul.f32 0.6931472, %v3832_v8  ;;  %v447_v48 = vor.u32 %v446_v13, %v445_v40 }
 0x115   :  { %v450_v22 = vor.u32 %v449_v27, %v448_v41  ;;  %v380_v58 = vsel %vm4705_vm11, %v377_v33, %v374_v15  ;;  %v356_v42 = vmul.f32 0.6931472, %v3834_v28  ;;  %vm4742_vm0 = vcmp.lt.f32.partialorder %v351_v1, 0.0004427343 }
 0x116   :  { %v399_v60 = vadd.f32 %v335_v54, %v7226_v50  ;;  %v452_v20 = vshrl.u32 %v7167_v36, %v4326_v18  ;;  %v4748_v31 = vadd.f32 -0.6931472, %v400_v4  ;;  %v371_v24 = vsel %vm4711_vm13, %v368_v21, %v365_v9 }
 0x117   :  { %v350_v13 = vmul.f32 %v3824_v39, %v349_v17  ;;  %v3836_v41 = vpop.eup %3835  ;;  %v362_v35 = vsel %vm4716_vm15, %v359_v45, %v356_v42  ;;  %vm4756_vm2 = vcmp.lt.f32.partialorder %v387_v51, 0.0004427343  ;;  %v7231_v4 = vmax.f32 %v4492_v47, 0.0 }
 0x118   :  { %v4750_v6 = vadd.f32 -0.6931472, %v399_v60  ;;  %v453_v63 = vor.u32 %v452_v20, %v451_v10  ;;  %v386_v15 = vmul.f32 %v3826_v46, %v385_v57  ;;  %v468_v9 = vsel %vm460_vm3, %v447_v48, %v450_v22 }
 0x119   :  { %v3838_v18 = vpop.eup %3837  ;;  %v404_v1 = vadd.f32 %v380_v58, %v7231_v4  ;;  %v7232_v17 = vmax.f32 %v4541_v26, 0.0  ;;  %v7233_v58 = vmax.f32 %v4546_v38, 0.0  ;;  %v392_v21 = vmul.f32 0.6931472, %v3836_v41 }
 0x11a   :  { %3556 = vmatprep.mubr.msk.f32.mxu1 %vm157_vm1, %v4750_v6  ;;  %3576 = vmatprep.mubr.msk.f32.mxu0 %vm157_vm1, %v4750_v6  ;;  %v347_v42 = vmul.f32 0.6931472, %v3838_v18  ;;  %v465_v47 = vsel %vm463_vm14, %v453_v63, 2102212464  ;;  %v3840_v46 = vpop.eup %3839  ;;  %v464_v26 = vsel %vm460_vm3, %v4702_v37, %v447_v48  ;;  %v470_v30 = vsel %vm462_vm8, %v453_v63, %v4429_v55  ;;  %v3422_v37 = vld [vmem:[%s7031_s7 + $0x20] sm:$0xff] }
 0x11b   :  { %v403_v44 = vadd.f32 %v371_v24, %v7232_v17  ;;  %3557 = vmatmul.mubr.msk.f32.vlgmr.msra.gmra.mrb[4].mxu1 %vm157_vm1, %v4748_v31  ;;  %3577 = vmatmul.mubr.msk.f32.vlgmr.msra.gmra.mrb[4].mxu0 %vm157_vm1, %v4748_v31  ;;  %v402_v39 = vadd.f32 %v362_v35, %v7233_v58  ;;  %v383_v11 = vmul.f32 0.6931472, %v3840_v46  ;;  %v471_v38 = vsel %vm461_vm6, %v468_v9, %v470_v30 }
 0x11c   :  { %3691 = vmatpush3.bf16.msra.mxu0 %v4636_v62  ;;  %3683 = vmatpush3.bf16.msra.mxu1 %v4654_v52  ;;  %v353_v45 = vsel %vm4742_vm0, %v350_v13, %v347_v42  ;;  %v7234_v62 = vor.u32 8388608, %v4692_v23  ;;  %v7235_v40 = vmax.f32 %v4554_v49, 0.0  ;;  %v466_v48 = vsel %vm462_vm8, %v450_v22, %v465_v47  ;;  %v3423_v23 = vld [vmem:[%s7031_s7 + $0x28] sm:$0xff] }
 0x11d   :  { %3685 = vmatprep.subr.bf16.mxu1 %v4683_v3  ;;  %v472_v55 = vsel %vm460_vm3, %v450_v22, %v453_v63  ;;  %v389_v49 = vsel %vm4756_vm2, %v386_v15, %v383_v11  ;;  %v7236_v32 = vand.u32 2147483647, %v4687_v2  ;;  %v4832_v28 = vadd.f32 -0.6931472, %v402_v39 }
 0x11e   :  { %v476_v52 = vshll.u32 %v7234_v62, 8  ;;  %v401_v27 = vadd.f32 %v353_v45, %v7235_v40  ;;  %v475_v8 = vsel %vm461_vm6, %v472_v55, %v474_v0  ;;  %v467_v2 = vsel %vm461_vm6, %v464_v26, %v466_v48  ;;  %v7242_v26 = vld [vmem:[#allocation70_spill] sm:$0xff]  ;;  %v7243_v45 = vld [vmem:[#allocation67_spill] sm:$0xff] }
 0x11f   :  { %vm4822_vm14 = vcmp.lt.f32.partialorder %v7236_v32, 0.0004427343  ;;  %v4839_v60 = vpack.c.bf16 %v3423_v23, %v3422_v37  ;;  %v4841_v20 = vadd.f32 -0.6931472, %v404_v1  ;;  %v4843_v24 = vadd.f32 -0.6931472, %v403_v44 }
 0x120   :  { %v4816_v22 = vmul.u32.u64.low %v476_v52, %v471_v38  ;;  %v4817_v54 = vmul.u32.u64.high %v476_v52, %v471_v38, %v4816_v22  ;;  %v4826_v57 = vadd.f32 -0.6931472, %v401_v27  ;;  %3687 = vmatpush3.bf16.msra.mxu1 %v4683_v3  ;;  %v398_v50 = vsel %vm4822_vm14, %v4726_v34, %v392_v21  ;;  %v7241_v21 = vld [vmem:[#allocation32_spill] sm:$0xff]  ;;  %v7245_v55 = vld [vmem:[#allocation10_spill] sm:$0xff]  ;;  %v7246_v0 = vld [vmem:[#allocation63_spill] sm:$0xff] }
 0x121   :  { %v4829_v51 = vmul.u32.u64.low %v476_v52, %v475_v8  ;;  %v4830_v10 = vmul.u32.u64.high %v476_v52, %v475_v8, %v4829_v51  ;;  %v7239_v3 = vmax.f32 %v4567_v53, 0.0  ;;  %v636_v34 = vand.u32 2147483647, %v4138_v29  ;;  %3697 = vmatprep.subr.bf16.mxu0 %v4839_v60  ;;  %v7244_v27 = vld [vmem:[#allocation36_spill] sm:$0xff] }
 0x122   :  { %3559 = vmatprep.mubr.msk.f32.mxu1 %vm157_vm1, %v4826_v57  ;;  %3579 = vmatprep.mubr.msk.f32.mxu0 %vm157_vm1, %v4826_v57  ;;  %v486_v16 = vadd.s32 1, %v4817_v54  ;;  %v653_v53 = vshll.u32 %v7216_v12, %v4258_v19  ;;  %v654_v41 = vshrl.u32 %v7224_v43, %v4271_v61  ;;  %v656_v35 = vshll.u32 %v7224_v43, %v4258_v19 }
 0x123   :  { %v405_v13 = vadd.f32 %v389_v49, %v7239_v3  ;;  %3560 = vmatmul.mubr.msk.f32.gmra.mrb[6].mxu1 %vm157_vm1, %v4832_v28  ;;  %3580 = vmatmul.mubr.msk.f32.gmra.mrb[6].mxu0 %vm157_vm1, %v4832_v28  ;;  %v7240_v33 = vmax.f32 %v4550_v25, 0.0  ;;  %v483_v18 = vmul.u32 %v476_v52, %v467_v2  ;;  %vm485_vm9 = vc.u32 %v4830_v10, %v4816_v22 }
 0x124   :  { %3562 = vmatprep.mubr.msk.f32.mxu1 %vm157_vm1, %v4843_v24  ;;  %3582 = vmatprep.mubr.msk.f32.mxu0 %vm157_vm1, %v4843_v24  ;;  %v643_v4 = vand.u32 8388607, %v636_v34  ;;  %vm628_vm10 = vcmp.eq.s32.totalorder %v4514_v14, 0  ;;  %vm631_vm11 = vcmp.eq.s32.totalorder %v4514_v14, 2  ;;  %v487_v25 = vsel %vm485_vm9, %v486_v16, %v4817_v54 }
 0x125   :  { %v406_v63 = vadd.f32 %v398_v50, %v7240_v33  ;;  %v655_v1 = vor.u32 %v654_v41, %v653_v53  ;;  %v657_v15 = vshrl.u32 %v7225_v59, %v4271_v61  ;;  %v659_v9 = vshll.u32 %v7225_v59, %v4258_v19  ;;  %v7248_v50 = vld [vmem:[#allocation17_spill] sm:$0xff] }
 0x126   :  { %v4881_v17 = vadd.f32 -0.6931472, %v405_v13  ;;  %v488_v44 = vadd.s32 %v487_v25, %v483_v18  ;;  %v660_v42 = vshrl.u32 %v7167_v36, %v4271_v61  ;;  %vm668_vm13 = vcmp.lt.s32.totalorder %v4293_v5, 1  ;;  %v7250_v18 = vld [vmem:[#allocation66_spill] sm:$0xff] }
 0x127   :  { %3563 = vmatmul.mubr.msk.f32.gmra.mrb[8].mxu1 %vm157_vm1, %v4841_v20  ;;  %3583 = vmatmul.mubr.msk.f32.gmra.mrb[8].mxu0 %vm157_vm1, %v4841_v20  ;;  %v644_v47 = vor.u32 8388608, %v643_v4  ;;  %v652_v46 = vshrl.u32 %v7216_v12, %v4271_v61  ;;  %v658_v58 = vor.u32 %v657_v15, %v656_v35  ;;  %vm670_vm15 = vcmp.lt.s32.totalorder %v4293_v5, 3  ;;  %v7249_v35 = vld [vmem:[#allocation56_spill] sm:$0xff]  ;;  %v7251_v4 = vld [vmem:[#allocation69_spill] sm:$0xff]  ;;  %v7252_v15 = vld [vmem:[#allocation34_spill] sm:$0xff] }
 0x128   :  { %vm627_vm0 = vcmp.lt.s32.totalorder %v4514_v14, 2  ;;  %3565 = vmatprep.mubr.msk.f32.mxu1 %vm157_vm1, %v4881_v17  ;;  %3585 = vmatprep.mubr.msk.f32.mxu0 %vm157_vm1, %v4881_v17  ;;  %v489_v19 = vadd.s32 536870912, %v488_v44  ;;  %v661_v39 = vor.u32 %v660_v42, %v659_v9  ;;  %vm669_vm2 = vcmp.lt.s32.totalorder %v4293_v5, 2  ;;  %v7253_v42 = vld [vmem:[#allocation40_spill] sm:$0xff] }
 0x129   :  { %v682_v61 = vsel %vm670_vm15, %v7241_v21, %v4379_v56  ;;  %v629_v30 = vxor.u32 2147483648, %v7242_v26  ;;  %v632_v11 = vxor.u32 2147483648, %v7243_v45  ;;  %v4905_v38 = vadd.f32 -0.6931472, %v406_v63 }
 0x12a   :  { %v676_v62 = vsel %vm668_vm13, %v655_v1, %v658_v58  ;;  %v4909_v52 = vshrl.u32 %v489_v19, 30  ;;  %v673_v40 = vsel %vm671_vm12, %v661_v39, 2102212464  ;;  %v678_v48 = vsel %vm670_vm15, %v661_v39, %v7244_v27  ;;  %v7254_v19 = vld [vmem:[#allocation68_spill] sm:$0xff] }
 0x12b   :  { %v680_v56 = vsel %vm668_vm13, %v658_v58, %v661_v39  ;;  %vm624_vm3 = vweird.f32 %v7245_v55  ;;  %v7247_v37 = vmov 1326507024   ;;  %3566 = vmatmul.mubr.msk.f32.gmra.mrb[10].mxu1 %vm157_vm1, %v4905_v38  ;;  %3586 = vmatmul.mubr.msk.f32.gmra.mrb[10].mxu0 %vm157_vm1, %v4905_v38  ;;  %v679_v49 = vsel %vm669_vm2, %v676_v62, %v678_v48  ;;  %v7255_v62 = vld [vmem:[#allocation37_spill] sm:$0xff]  ;;  %v7256_v27 = vld [vmem:[#allocation12_spill] sm:$0xff] }
 0x12c   :  { %v4921_v23 = vshrl.u32 %v7247_v37, %v7246_v0  ;;  %v683_v8 = vsel %vm669_vm2, %v680_v56, %v682_v61  ;;  %v684_v54 = vshll.u32 %v644_v47, 8  ;;  %3596 = vmatprep.mubr.msk.f32.mxu1 %vm157_vm1, %v4750_v6  ;;  %v491_v32 = vshll.u32 %v4909_v52, 30 }
 0x12d   :  { %v672_v7 = vsel %vm668_vm13, %v652_v46, %v655_v1  ;;  %v674_v51 = vsel %vm670_vm15, %v658_v58, %v673_v40  ;;  %v740_v2 = vand.u32 2147483647, %v7248_v50  ;;  %v630_v6 = vsel %vm628_vm10, %v7243_v45, %v629_v30 }
 0x12e   :  { %v4939_v3 = vmul.u32.u64.low %v684_v54, %v683_v8  ;;  %v4940_v13 = vmul.u32.u64.high %v684_v54, %v683_v8, %v4939_v3  ;;  %v4942_v16 = vmul.u32.u64.low %v684_v54, %v679_v49  ;;  %v4943_v53 = vmul.u32.u64.high %v684_v54, %v679_v49, %v4942_v16 }
 0x12f   :  { %v633_v41 = vsel %vm631_vm11, %v632_v11, %v7242_v26  ;;  %v4953_v33 = vshrl.u32 %v7249_v35, 5  ;;  %v4955_v63 = vsub.s32 %v488_v44, %v491_v32  ;;  %v4959_v25 = vor.u32 %v7251_v4, %v7250_v18  ;;  %3597 = vmatmul.mubr.msk.f32.vlgmr.msra.gmra.mrb[12].mxu1 %vm157_vm1, %v4748_v31  ;;  %v7258_v32 = vld [vmem:[#allocation45_spill] sm:$0xff] }
 0x130   :  { %v675_v1 = vsel %vm669_vm2, %v672_v7, %v674_v51  ;;  %v757_v9 = vshll.u32 %v7216_v12, %v7252_v15  ;;  %v758_v47 = vshrl.u32 %v7224_v43, %v7253_v42  ;;  %3599 = vmatprep.mubr.msk.f32.mxu1 %vm157_vm1, %v4826_v57  ;;  %v747_v44 = vand.u32 8388607, %v740_v2  ;;  %v7259_v3 = vld [vmem:[#allocation49_spill] sm:$0xff] }
 0x131   :  { %v494_v46 = vsub.s32 0, %v4955_v63  ;;  %v760_v31 = vshll.u32 %v7224_v43, %v7252_v15  ;;  %v761_v5 = vshrl.u32 %v7225_v59, %v7253_v42  ;;  %v634_v58 = vsel %vm627_vm0, %v630_v6, %v633_v41 }
 0x132   :  { %v1083_v39 = vor.u32 %v4921_v23, %v7254_v19  ;;  %vm693_vm12 = vc.u32 %v4940_v13, %v4942_v16  ;;  %v694_v57 = vadd.s32 1, %v4943_v53  ;;  %vm1087_vm6 = vcmp.lt.s32.totalorder %v4953_v33, 4 }
 0x133   :  { %v3301_v21 = vmin.u32 %v494_v46, %v4955_v63  ;;  %v759_v61 = vor.u32 %v758_v47, %v757_v9  ;;  %v762_v26 = vor.u32 %v761_v5, %v760_v31  ;;  %v763_v30 = vshll.u32 %v7225_v59, %v7252_v15  ;;  %3600 = vmatmul.mubr.msk.f32.gmra.mrb[14].mxu1 %vm157_vm1, %v4832_v28 }
 0x134   :  { %v691_v45 = vmul.u32 %v684_v54, %v675_v1  ;;  %v695_v14 = vsel %vm693_vm12, %v694_v57, %v4943_v53  ;;  %v764_v11 = vshrl.u32 %v7167_v36, %v7253_v42  ;;  %vm772_vm8 = vcmp.lt.s32.totalorder %v7255_v62, 1  ;;  %3602 = vmatprep.mubr.msk.f32.mxu1 %vm157_vm1, %v4843_v24  ;;  %v7257_v54 = vld [vmem:[#allocation50_spill] sm:$0xff] }
 0x135   :  { %v635_v40 = vsel %vm624_vm3, nan, %v634_v58  ;;  %vm430_vm14 = vcmp.lt.s32.totalorder %v7256_v27, 0  ;;  %v496_v48 = vclz %v3301_v21  ;;  %v748_v56 = vor.u32 8388608, %v747_v44 }
 0x136   :  { %v696_v23 = vadd.s32 %v695_v14, %v691_v45  ;;  %v765_v49 = vor.u32 %v764_v11, %v763_v30  ;;  %vm773_vm9 = vcmp.lt.s32.totalorder %v7255_v62, 2  ;;  %vm774_vm10 = vcmp.lt.s32.totalorder %v7255_v62, 3  ;;  %v7260_v14 = vld [vmem:[#allocation6_spill] sm:$0xff] }
 0x137   :  { %v3302_v28 = vadd.s32 4294967294, %v496_v48  ;;  %v756_v8 = vshrl.u32 %v7216_v12, %v7253_v42  ;;  %v780_v55 = vsel %vm772_vm8, %v759_v61, %v762_v26  ;;  %v786_v7 = vsel %vm774_vm10, %v7258_v32, %v7257_v54  ;;  %3603 = vmatmul.mubr.msk.f32.gmra.mrb[16].mxu1 %vm157_vm1, %v4841_v20 }
 0x138   :  { %v697_v51 = vadd.s32 536870912, %v696_v23  ;;  %v777_v24 = vsel %vm775_vm4, %v765_v49, 2102212464  ;;  %v782_v53 = vsel %vm774_vm10, %v765_v49, %v7259_v3  ;;  %v784_v6 = vsel %vm772_vm8, %v762_v26, %v765_v49  ;;  %3605 = vmatprep.mubr.msk.f32.mxu1 %vm157_vm1, %v4881_v17 }
 0x139   :  { %v484_v41 = vadd.s32 %v4816_v22, %v4830_v10  ;;  %vm3303_vm11 = vcmp.lt.s32.totalorder %v3302_v28, 0  ;;  %v514_v35 = vsub.s32 4, %v4909_v52  ;;  %v787_v18 = vsel %vm773_vm9, %v784_v6, %v786_v7  ;;  %v7268_v6 = vld [vmem:[#allocation44_spill] sm:$0xff] }
 0x13a   :  { %v499_v4 = vsel %vm3303_vm11, 0, %v3302_v28  ;;  %v698_v1 = vshrl.u32 %v697_v51, 30  ;;  %v783_v15 = vsel %vm773_vm9, %v780_v55, %v782_v53  ;;  %v788_v9 = vshll.u32 %v748_v56, 8  ;;  %v7267_v53 = vld [vmem:[#allocation41_spill] sm:$0xff] }
 0x13b   :  { %v500_v42 = vsub.s32 32, %v499_v4  ;;  %v504_v20 = vsub.s32 4294967266, %v499_v4  ;;  %v776_v22 = vsel %vm772_vm8, %v756_v8, %v759_v61  ;;  %v778_v10 = vsel %vm774_vm10, %v762_v26, %v777_v24  ;;  %3606 = vmatmul.mubr.msk.f32.gmra.mrb[18].mxu1 %vm157_vm1, %v4905_v38 }
 0x13c   :  { %v501_v47 = vshll.u32 %v4955_v63, %v499_v4  ;;  %v699_v46 = vshll.u32 %v698_v1, 30  ;;  %v5033_v44 = vmul.u32.u64.low %v788_v9, %v787_v18  ;;  %v5034_v31 = vmul.u32.u64.high %v788_v9, %v787_v18, %v5033_v44 }
 0x13d   :  { %v502_v17 = vshrl.u32 %v484_v41, %v500_v42  ;;  %v505_v5 = vadd.s32 127, %v504_v20  ;;  %v5038_v58 = vmul.u32.u64.low %v788_v9, %v783_v15  ;;  %v5039_v19 = vmul.u32.u64.high %v788_v9, %v783_v15, %v5038_v58 }
 0x13e   :  { %v5045_v57 = vsel %vm1087_vm6, %v4959_v25, 920167782  ;;  %v5049_v63 = vsel %vm1087_vm6, %v1083_v39, 1326507024  ;;  %v515_v21 = vsel %vm430_vm14, %v514_v35, %v4909_v52  ;;  %v5054_v38 = vsub.s32 %v696_v23, %v699_v46  ;;  %v7261_v39 = vld [vmem:[#allocation23_spill] sm:$0xff] }
 0x13f   :  { %v503_v61 = vor.u32 %v502_v17, %v501_v47  ;;  %v506_v26 = vshll.u32 %v505_v5, 23  ;;  %v722_v30 = vsub.s32 4, %v698_v1  ;;  %v779_v45 = vsel %vm773_vm9, %v776_v22, %v778_v10 }
 0x140   :  { %v5059_v11 = vmul.f32 %v635_v40, %v7260_v14  ;;  %v702_v48 = vsub.s32 0, %v5054_v38  ;;  %vm797_vm4 = vc.u32 %v5034_v31, %v5038_v58  ;;  %v844_v56 = vand.u32 2147483647, %v7261_v39 }
 0x141   :  { %v7262_v52 = vand.u32 2147483647, %v7256_v27  ;;  %v507_v49 = vor.u32 4788187, %v506_v26  ;;  %vm638_vm15 = vcmp.lt.s32.totalorder %v4138_v29, 0  ;;  %v798_v62 = vadd.s32 1, %v5039_v19 }
 0x142   :  { %vm5077_vm0 = vcmp.le.f32.partialorder %v636_v34, 0.7853982  ;;  %v3309_v8 = vmin.u32 %v702_v48, %v5054_v38  ;;  %v795_v55 = vmul.u32 %v788_v9, %v779_v45  ;;  %v510_v32 = vcvt.s32.f32 %v503_v61  ;;  %v7269_v48 = vld [vmem:[#allocation46_spill] sm:$0xff] }
 0x143   :  { %vm5067_vm13 = vcmp.le.f32.partialorder %v7262_v52, 0.7853982  ;;  %v508_v54 = vand.u32 2147483647, %v507_v49  ;;  %v723_v7 = vsel %vm638_vm15, %v722_v30, %v698_v1  ;;  %v799_v51 = vsel %vm797_vm4, %v798_v62, %v5039_v19 }
 0x144   :  { %v517_v40 = vsel %vm5067_vm13, 0, %v515_v21  ;;  %v704_v24 = vclz %v3309_v8  ;;  %v851_v3 = vand.u32 8388607, %v844_v56  ;;  %v861_v34 = vshll.u32 %v7216_v12, %v7267_v53 }
 0x145   :  { %v862_v41 = vshrl.u32 %v7224_v43, %v7268_v6  ;;  %v511_v35 = vmul.f32 %v510_v32, %v508_v54  ;;  %v521_v18 = vadd.s32 3, %v517_v40  ;;  %v800_v4 = vadd.s32 %v799_v51, %v795_v55 }
 0x146   :  { %v864_v15 = vshll.u32 %v7224_v43, %v7267_v53  ;;  %v3310_v9 = vadd.s32 4294967294, %v704_v24  ;;  %v865_v1 = vshrl.u32 %v7225_v59, %v7268_v6  ;;  %v867_v42 = vshll.u32 %v7225_v59, %v7267_v53 }
 0x147   :  { %v868_v20 = vshrl.u32 %v7167_v36, %v7268_v6  ;;  %v512_v22 = vxor.u32 2147483648, %v511_v35  ;;  %v692_v10 = vadd.s32 %v4942_v16, %v4940_v13  ;;  %v725_v47 = vsel %vm5077_vm0, 0, %v723_v7  ;;  %v7270_v7 = vld [vmem:[#allocation54_spill] sm:$0xff] }
 0x148   :  { %v801_v46 = vadd.s32 536870912, %v800_v4  ;;  %vm3311_vm2 = vcmp.lt.s32.totalorder %v3310_v9, 0  ;;  %v852_v44 = vor.u32 8388608, %v851_v3  ;;  %v860_v17 = vshrl.u32 %v7216_v12, %v7268_v6 }
 0x149   :  { %v863_v5 = vor.u32 %v862_v41, %v861_v34  ;;  %v513_v19 = vsel %vm430_vm14, %v512_v22, %v511_v35  ;;  %v707_v21 = vsel %vm3311_vm2, 0, %v3310_v9  ;;  %v869_v26 = vor.u32 %v868_v20, %v867_v42  ;;  %v7271_v41 = vld [vmem:[#allocation57_spill] sm:$0xff]  ;;  %v7272_v35 = vld [vmem:[#allocation48_spill] sm:$0xff] }
 0x14a   :  { %v802_v61 = vshrl.u32 %v801_v46, 30  ;;  %v516_v13 = vsel %vm5067_vm13, %v7256_v27, %v513_v19  ;;  %v708_v16 = vsub.s32 32, %v707_v21  ;;  %v712_v30 = vsub.s32 4294967266, %v707_v21 }
 0x14b   :  { %v866_v45 = vor.u32 %v865_v1, %v864_v15  ;;  %3841 = vcosq.f32 %v516_v13  ;;  %vm876_vm3 = vcmp.lt.s32.totalorder %v7269_v48, 1  ;;  %vm878_vm12 = vcmp.lt.s32.totalorder %v7269_v48, 3 }
 0x14c   :  { %v803_v14 = vshll.u32 %v802_v61, 30  ;;  %3843 = vsinq.f32 %v516_v13  ;;  %v709_v52 = vshll.u32 %v5054_v38, %v707_v21  ;;  %v710_v49 = vshrl.u32 %v692_v10, %v708_v16 }
 0x14d   :  { %v713_v62 = vadd.s32 127, %v712_v30  ;;  %v522_v40 = vand.u32 3, %v521_v18  ;;  %vm877_vm8 = vcmp.lt.s32.totalorder %v7269_v48, 2  ;;  %v881_v23 = vsel %vm879_vm7, %v869_v26, 2102212464 }
 0x14e   :  { %v5113_v8 = vsub.s32 %v800_v4, %v803_v14  ;;  %v711_v55 = vor.u32 %v710_v49, %v709_v52  ;;  %v884_v32 = vsel %vm876_vm3, %v863_v5, %v866_v45  ;;  %v886_v51 = vsel %vm878_vm12, %v869_v26, %v7270_v7 }
 0x14f   :  { %v714_v54 = vshll.u32 %v713_v62, 23  ;;  %v729_v38 = vadd.s32 3, %v725_v47  ;;  %v880_v3 = vsel %vm876_vm3, %v860_v17, %v863_v5  ;;  %v888_v53 = vsel %vm876_vm3, %v866_v45, %v869_v26  ;;  %v7273_v62 = vld [vmem:[#allocation20_spill] sm:$0xff] }
 0x150   :  { %v806_v24 = vsub.s32 0, %v5113_v8  ;;  %v882_v6 = vsel %vm878_vm12, %v866_v45, %v881_v23  ;;  %v890_v18 = vsel %vm878_vm12, %v7272_v35, %v7271_v41  ;;  %v892_v4 = vshll.u32 %v852_v44, 8  ;;  %v7275_v35 = vld [vmem:[#allocation5_spill] sm:$0xff] }
 0x151   :  { %v715_v34 = vor.u32 4788187, %v714_v54  ;;  %v826_v9 = vsub.s32 4, %v802_v61  ;;  %v887_v1 = vsel %vm877_vm8, %v884_v32, %v886_v51  ;;  %v891_v42 = vsel %vm877_vm8, %v888_v53, %v890_v18  ;;  %v7274_v51 = vld [vmem:[#allocation39_spill] sm:$0xff] }
 0x152   :  { %v3313_v15 = vmin.u32 %v806_v24, %v5113_v8  ;;  %vm520_vm7 = vweird.f32 %v7256_v27  ;;  %v718_v22 = vcvt.s32.f32 %v711_v55  ;;  %vm523_vm14 = vcmp.lt.s32.totalorder %v522_v40, 2 }
 0x153   :  { %v716_v20 = vand.u32 2147483647, %v715_v34  ;;  %v5140_v10 = vmul.u32.u64.low %v892_v4, %v891_v42  ;;  %v5141_v47 = vmul.u32.u64.high %v892_v4, %v891_v42, %v5140_v10  ;;  %vm2517_vm9 = vcmask 130048  }
 0x154   :  { %vm742_vm10 = vcmp.lt.s32.totalorder %v7248_v50, 0  ;;  %v808_v46 = vclz %v3313_v15  ;;  %v883_v44 = vsel %vm877_vm8, %v880_v3, %v882_v6  ;;  %vm524_vm11 = vcmp.eq.s32.totalorder %v522_v40, 0 }
 0x155   :  { %v719_v17 = vmul.f32 %v718_v22, %v716_v20  ;;  %v5146_v5 = vmul.u32.u64.low %v892_v4, %v887_v1  ;;  %v5147_v19 = vmul.u32.u64.high %v892_v4, %v887_v1, %v5146_v5  ;;  %v3842_v21 = vpop.eup %3841  ;;  %vm527_vm4 = vcmp.eq.s32.totalorder %v522_v40, 2 }
 0x156   :  { %v5150_v26 = vand.u32 3, %v729_v38  ;;  %v796_v13 = vadd.s32 %v5038_v58, %v5034_v31  ;;  %v3314_v16 = vadd.s32 4294967294, %v808_v46  ;;  %v3844_v30 = vpop.eup %3843  ;;  %v528_v45 = vxor.u32 2147483648, %v3842_v21 }
 0x157   :  { %v720_v14 = vxor.u32 2147483648, %v719_v17  ;;  %v827_v48 = vsel %vm742_vm10, %v826_v9, %v802_v61  ;;  %v899_v52 = vmul.u32 %v892_v4, %v883_v44  ;;  %v525_v49 = vxor.u32 2147483648, %v3844_v30  ;;  %v7276_v9 = vld [vmem:[#allocation42_spill] sm:$0xff] }
 0x158   :  { %vm3315_vm13 = vcmp.lt.s32.totalorder %v3314_v16, 0  ;;  %vm901_vm2 = vc.u32 %v5141_v47, %v5146_v5  ;;  %v948_v23 = vand.u32 2147483647, %v7273_v62  ;;  %v529_v55 = vsel %vm527_vm4, %v528_v45, %v3844_v30 }
 0x159   :  { %v721_v54 = vsel %vm638_vm15, %v720_v14, %v719_v17  ;;  %v811_v31 = vsel %vm3315_vm13, 0, %v3314_v16  ;;  %v902_v58 = vadd.s32 1, %v5147_v19  ;;  %v526_v32 = vsel %vm524_vm11, %v3842_v21, %v525_v49 }
 0x15a   :  { %v724_v61 = vsel %vm5077_vm0, %v4138_v29, %v721_v54  ;;  %v812_v7 = vsub.s32 32, %v811_v31  ;;  %v965_v38 = vshll.u32 %v7216_v12, %v7274_v51  ;;  %v530_v24 = vsel %vm523_vm14, %v526_v32, %v529_v55 }
 0x15b   :  { %3845 = vcosq.f32 %v724_v61  ;;  %v816_v3 = vsub.s32 4294967266, %v811_v31  ;;  %v903_v53 = vsel %vm901_vm2, %v902_v58, %v5147_v19  ;;  %v531_v34 = vsel %vm520_vm7, nan, %v530_v24  ;;  %v7279_v19 = vld [vmem:[#allocation43_spill] sm:$0xff] }
 0x15c   :  { %3847 = vsinq.f32 %v724_v61  ;;  %v814_v6 = vshrl.u32 %v796_v13, %v812_v7  ;;  %v904_v41 = vadd.s32 %v903_v53, %v899_v52  ;;  %v5173_v18 = vmul.f32 %v531_v34, %v7275_v35  ;;  %v7280_v61 = vld [vmem:[#allocation53_spill] sm:$0xff]  ;;  %v7281_v7 = vld [vmem:[#allocation47_spill] sm:$0xff]  ;;  %v7282_v35 = vld [vmem:[#allocation52_spill] sm:$0xff] }
 0x15d   :  { %v813_v28 = vshll.u32 %v5113_v8, %v811_v31  ;;  %v817_v4 = vadd.s32 127, %v816_v3  ;;  %v955_v40 = vand.u32 8388607, %v948_v23  ;;  %v966_v1 = vshrl.u32 %v7224_v43, %v7276_v9 }
 0x15e   :  { %v905_v15 = vadd.s32 536870912, %v904_v41  ;;  %v968_v27 = vshll.u32 %v7224_v43, %v7274_v51  ;;  %v969_v42 = vshrl.u32 %v7225_v59, %v7276_v9  ;;  %3612 = vmatprep.mubr.msk.f32.mxu0 %vm2517_vm9, %v5173_v18  ;;  %v971_v8 = vshll.u32 %v7225_v59, %v7274_v51  ;;  %3628 = vmatprep.mubr.msk.f32.mxu1 %vm2517_vm9, %v5173_v18 }
 0x15f   :  { %v815_v20 = vor.u32 %v814_v6, %v813_v28  ;;  %v818_v22 = vshll.u32 %v817_v4, 23  ;;  %v972_v10 = vshrl.u32 %v7167_v36, %v7276_v9  ;;  %3613 = vmatmul.mubr.msk.f32.vlgmr.msra.gmra.mrb[12].mxu0 %vm2517_vm9, %v5059_v11  ;;  %vm5196_vm15 = vcmp.le.f32.partialorder %v740_v2, 0.7853982 }
 0x160   :  { %v5200_v44 = vshrl.u32 %v905_v15, 30  ;;  %v970_v17 = vor.u32 %v969_v42, %v968_v27  ;;  %vm980_vm0 = vcmp.lt.s32.totalorder %v7279_v19, 1  ;;  %3699 = vmatpush3.bf16.msra.mxu0 %v4839_v60  ;;  %vm731_vm3 = vcmp.lt.s32.totalorder %v5150_v26, 2 }
 0x161   :  { %vm732_vm12 = vcmp.eq.s32.totalorder %v5150_v26, 0  ;;  %v819_v21 = vor.u32 4788187, %v818_v22  ;;  %v829_v13 = vsel %vm5196_vm15, 0, %v827_v48  ;;  %v973_v16 = vor.u32 %v972_v10, %v971_v8 }
 0x162   :  { %vm728_vm8 = vweird.f32 %v4138_v29  ;;  %v907_v2 = vshll.u32 %v5200_v44, 30  ;;  %v956_v30 = vor.u32 8388608, %v955_v40  ;;  %v967_v45 = vor.u32 %v966_v1, %v965_v38 }
 0x163   :  { %vm982_vm7 = vcmp.lt.s32.totalorder %v7279_v19, 3  ;;  %v820_v14 = vand.u32 2147483647, %v819_v21  ;;  %v822_v52 = vcvt.s32.f32 %v815_v20  ;;  %vm981_vm14 = vcmp.lt.s32.totalorder %v7279_v19, 2  ;;  %v7287_v19 = vld [vmem:[#allocation59_spill] sm:$0xff] }
 0x164   :  { %v992_v60 = vsel %vm980_vm0, %v970_v17, %v973_v16  ;;  %vm735_vm11 = vcmp.eq.s32.totalorder %v5150_v26, 2  ;;  %v833_v49 = vadd.s32 3, %v829_v13  ;;  %v5215_v48 = vsub.s32 %v904_v41, %v907_v2  ;;  %v7283_v2 = vld [vmem:[#allocation38_spill] sm:$0xff] }
 0x165   :  { %v964_v55 = vshrl.u32 %v7216_v12, %v7276_v9  ;;  %v3846_v54 = vpop.eup %3845  ;;  %v823_v31 = vmul.f32 %v822_v52, %v820_v14  ;;  %v930_v58 = vsub.s32 4, %v5200_v44  ;;  %v985_v32 = vsel %vm983_vm5, %v973_v16, 2102212464  ;;  %v7297_v52 = vld [vmem:[#allocation33_spill] sm:$0xff] }
 0x166   :  { %v994_v51 = vsel %vm982_vm7, %v7281_v7, %v7280_v61  ;;  %v3848_v38 = vpop.eup %3847  ;;  %v736_v24 = vxor.u32 2147483648, %v3846_v54  ;;  %v910_v3 = vsub.s32 0, %v5215_v48  ;;  %v988_v53 = vsel %vm980_vm0, %v967_v45, %v970_v17 }
 0x167   :  { %v995_v34 = vsel %vm981_vm14, %v992_v60, %v994_v51  ;;  %v733_v6 = vxor.u32 2147483648, %v3848_v38  ;;  %v824_v41 = vxor.u32 2147483648, %v823_v31  ;;  %v990_v28 = vsel %vm982_vm7, %v973_v16, %v7282_v35 }
 0x168   :  { %v996_v4 = vshll.u32 %v956_v30, 8  ;;  %v737_v40 = vsel %vm735_vm11, %v736_v24, %v3848_v38  ;;  %v3317_v15 = vmin.u32 %v910_v3, %v5215_v48  ;;  %v984_v9 = vsel %vm980_vm0, %v964_v55, %v967_v45  ;;  %v7284_v45 = vld [vmem:[#allocation7_spill] sm:$0xff] }
 0x169   :  { %v986_v1 = vsel %vm982_vm7, %v970_v17, %v985_v32  ;;  %v734_v27 = vsel %vm732_vm12, %v3846_v54, %v733_v6  ;;  %v825_v42 = vsel %vm742_vm10, %v824_v41, %v823_v31  ;;  %v991_v17 = vsel %vm981_vm14, %v988_v53, %v990_v28  ;;  %v7288_v24 = vld [vmem:[#allocation51_spill] sm:$0xff] }
 0x16a   :  { %v5245_v20 = vmul.u32.u64.low %v996_v4, %v995_v34  ;;  %v5246_v22 = vmul.u32.u64.high %v996_v4, %v995_v34, %v5245_v20  ;;  %v738_v8 = vsel %vm731_vm3, %v734_v27, %v737_v40  ;;  %v828_v10 = vsel %vm5196_vm15, %v7248_v50, %v825_v42 }
 0x16b   :  { %v912_v21 = vclz %v3317_v15  ;;  %v739_v13 = vsel %vm728_vm8, nan, %v738_v8  ;;  %3849 = vcosq.f32 %v828_v10  ;;  %v5257_v16 = vand.u32 3, %v833_v49 }
 0x16c   :  { %v1052_v30 = vand.u32 2147483647, %v7283_v2  ;;  %v5261_v14 = vmul.f32 %v739_v13, %v7284_v45  ;;  %3851 = vsinq.f32 %v828_v10  ;;  %v987_v46 = vsel %vm981_vm14, %v984_v9, %v986_v1 }
 0x16d   :  { %v3318_v26 = vadd.s32 4294967294, %v912_v21  ;;  %vm5267_vm5 = vcmp.le.f32.partialorder %v844_v56, 0.7853982  ;;  %vm846_vm10 = vcmp.lt.s32.totalorder %v7261_v39, 0  ;;  %v900_v49 = vadd.s32 %v5146_v5, %v5141_v47 }
 0x16e   :  { %v5272_v29 = vmul.u32.u64.low %v996_v4, %v991_v17  ;;  %v5273_v60 = vmul.u32.u64.high %v996_v4, %v991_v17, %v5272_v29  ;;  %3615 = vmatprep.mubr.msk.f32.mxu0 %vm2517_vm9, %v5261_v14  ;;  %v5283_v56 = vsel %vm846_vm10, %v930_v58, %v5200_v44  ;;  %v1069_v55 = vshll.u32 %v7216_v12, %v7287_v19 }
 0x16f   :  { %vm3319_vm4 = vcmp.lt.s32.totalorder %v3318_v26, 0  ;;  %vm839_vm13 = vcmp.eq.s32.totalorder %v5257_v16, 2  ;;  %v1003_v31 = vmul.u32 %v996_v4, %v987_v46  ;;  %v1059_v32 = vand.u32 8388607, %v1052_v30 }
 0x170   :  { %v915_v54 = vsel %vm3319_vm4, 0, %v3318_v26  ;;  %v1070_v61 = vshrl.u32 %v7224_v43, %v7246_v0  ;;  %vm836_vm2 = vcmp.eq.s32.totalorder %v5257_v16, 0  ;;  %vm1005_vm15 = vc.u32 %v5246_v22, %v5272_v29 }
 0x171   :  { %v916_v47 = vsub.s32 32, %v915_v54  ;;  %v917_v5 = vshll.u32 %v5215_v48, %v915_v54  ;;  %v920_v44 = vsub.s32 4294967266, %v915_v54  ;;  %vm835_vm0 = vcmp.lt.s32.totalorder %v5257_v16, 2 }
 0x172   :  { %v1006_v58 = vadd.s32 1, %v5273_v60  ;;  %v1071_v7 = vor.u32 %v1070_v61, %v1069_v55  ;;  %v1072_v51 = vshll.u32 %v7224_v43, %v7287_v19  ;;  %v1073_v38 = vshrl.u32 %v7225_v59, %v7246_v0 }
 0x173   :  { %vm1398_vm3 = vcmp.gt.s32.totalorder %v7288_v24, 0  ;;  %vm832_vm12 = vweird.f32 %v7248_v50  ;;  %v918_v48 = vshrl.u32 %v900_v49, %v916_v47  ;;  %v921_v3 = vadd.s32 127, %v920_v44 }
 0x174   :  { %v1075_v53 = vshll.u32 %v7225_v59, %v7287_v19  ;;  %v1076_v34 = vshrl.u32 %v7167_v36, %v7246_v0  ;;  %v1007_v6 = vsel %vm1005_vm15, %v1006_v58, %v5273_v60  ;;  %v1060_v41 = vor.u32 8388608, %v1059_v32 }
 0x175   :  { %v1074_v35 = vor.u32 %v1073_v38, %v1072_v51  ;;  %vm1084_vm8 = vcmp.lt.s32.totalorder %v4953_v33, 1  ;;  %v919_v28 = vor.u32 %v918_v48, %v917_v5  ;;  %v922_v4 = vshll.u32 %v921_v3, 23  ;;  %v3850_v9 = vpop.eup %3849 }
 0x176   :  { %v1008_v40 = vadd.s32 %v1007_v6, %v1003_v31  ;;  %v1077_v15 = vor.u32 %v1076_v34, %v1075_v53  ;;  %v933_v1 = vsel %vm5267_vm5, 0, %v5283_v56  ;;  %v1068_v27 = vshrl.u32 %v7216_v12, %v7246_v0  ;;  %v3852_v42 = vpop.eup %3851  ;;  %v7290_v53 = vld [vmem:[#allocation61_spill] sm:$0xff]  ;;  %v7291_v34 = vld [vmem:[#allocation64_spill] sm:$0xff] }
 0x177   :  { %vm1085_vm7 = vcmp.lt.s32.totalorder %v4953_v33, 2  ;;  %vm1086_vm14 = vcmp.lt.s32.totalorder %v4953_v33, 3  ;;  %v840_v20 = vxor.u32 2147483648, %v3850_v9  ;;  %v923_v8 = vor.u32 4788187, %v922_v4  ;;  %v7294_v4 = vld [vmem:[#allocation65_spill] sm:$0xff] }
 0x178   :  { %v1009_v10 = vadd.s32 536870912, %v1008_v40  ;;  %v1092_v21 = vsel %vm1084_vm8, %v1071_v7, %v1074_v35  ;;  %v837_v17 = vxor.u32 2147483648, %v3852_v42  ;;  %v926_v13 = vcvt.s32.f32 %v919_v28 }
 0x179   :  { %v1094_v45 = vsel %vm1086_vm14, %v1077_v15, %v5045_v57  ;;  %v1100_v26 = vshll.u32 %v1060_v41, 8  ;;  %v841_v0 = vsel %vm839_vm13, %v840_v20, %v3852_v42  ;;  %v924_v46 = vand.u32 2147483647, %v923_v8  ;;  %v7292_v41 = vld [vmem:[#allocation60_spill] sm:$0xff]  ;;  %v7296_v20 = vld [vmem:[#allocation29_spill] sm:$0xff] }
 0x17a   :  { %v5324_v60 = vshrl.u32 %v1009_v10, 30  ;;  %v1096_v49 = vsel %vm1084_vm8, %v1074_v35, %v1077_v15  ;;  %v838_v56 = vsel %vm836_vm2, %v3850_v9, %v837_v17  ;;  %v1089_v19 = vsel %vm1087_vm6, %v1077_v15, 2102212464 }
 0x17b   :  { %v1095_v55 = vsel %vm1085_vm7, %v1092_v21, %v1094_v45  ;;  %v1098_v57 = vsel %vm1086_vm14, %v4959_v25, %v5049_v63  ;;  %v842_v54 = vsel %vm835_vm0, %v838_v56, %v841_v0  ;;  %v927_v31 = vmul.f32 %v926_v13, %v924_v46  ;;  %v7289_v25 = vld [vmem:[#allocation13_spill] sm:$0xff]  ;;  %v7298_v56 = vld [vmem:[#allocation55_spill] sm:$0xff] }
 0x17c   :  { %v1011_v32 = vshll.u32 %v5324_v60, 30  ;;  %v1088_v61 = vsel %vm1084_vm8, %v1068_v27, %v1071_v7  ;;  %v843_v47 = vsel %vm832_vm12, nan, %v842_v54  ;;  %v1099_v5 = vsel %vm1085_vm7, %v1096_v49, %v1098_v57  ;;  %v7295_v27 = vld [vmem:[#allocation30_spill] sm:$0xff] }
 0x17d   :  { %v5347_v44 = vmul.u32.u64.low %v1100_v26, %v1095_v55  ;;  %v5348_v58 = vmul.u32.u64.high %v1100_v26, %v1095_v55, %v5347_v44  ;;  %v5352_v63 = vmul.f32 %v843_v47, %v7289_v25  ;;  %v928_v16 = vxor.u32 2147483648, %v927_v31  ;;  %v7299_v55 = vld [vmem:[#allocation58_spill] sm:$0xff] }
 0x17e   :  { %v5354_v51 = vsub.s32 %v1008_v40, %v1011_v32  ;;  %v1090_v38 = vsel %vm1086_vm14, %v1074_v35, %v1089_v19  ;;  %v5361_v50 = vsel %vm1398_vm3, %v7288_v24, 0  ;;  %v937_v7 = vadd.s32 3, %v933_v1  ;;  %v7293_v24 = vld [vmem:[#allocation62_spill] sm:$0xff] }
 0x17f   :  { %v5363_v48 = vmul.u32.u64.low %v1100_v26, %v1099_v5  ;;  %v5364_v3 = vmul.u32.u64.high %v1100_v26, %v1099_v5, %v5363_v48  ;;  %v5368_v6 = vor.u32 %v7291_v34, %v7290_v53  ;;  %vm1191_vm6 = vcmp.lt.s32.totalorder %v7292_v41, 4  ;;  %3616 = vmatmul.mubr.msk.f32.gmra.mrb[14].mxu0 %vm2517_vm9, %v5352_v63 }
 0x180   :  { %v929_v35 = vsel %vm846_vm10, %v928_v16, %v927_v31  ;;  %v1014_v28 = vsub.s32 0, %v5354_v51  ;;  %v1187_v40 = vor.u32 %v7294_v4, %v7293_v24  ;;  %v1091_v9 = vsel %vm1085_vm7, %v1088_v61, %v1090_v38 }
 0x181   :  { %v932_v15 = vsel %vm5267_vm5, %v7261_v39, %v929_v35  ;;  %v1110_v1 = vadd.s32 1, %v5348_v58  ;;  %v5385_v42 = vand.u32 31, %v7295_v27  ;;  %v5388_v8 = vadd.s32 1, %v7296_v20 }
 0x182   :  { %3853 = vcosq.f32 %v932_v15  ;;  %v3321_v10 = vmin.u32 %v1014_v28, %v5354_v51  ;;  %v5391_v21 = vand.u32 3, %v937_v7  ;;  %vm1109_vm11 = vc.u32 %v5364_v3, %v5347_v44 }
 0x183   :  { %3855 = vsinq.f32 %v932_v15  ;;  %v1156_v33 = vand.u32 2147483647, %v7297_v52  ;;  %v5397_v17 = vand.u32 31, %v5361_v50  ;;  %v1197_v13 = vsel %vm1191_vm6, %v5368_v6, 920167782 }
 0x184   :  { %v1016_v45 = vclz %v3321_v10  ;;  %v1107_v0 = vmul.u32 %v1100_v26, %v1091_v9  ;;  %v1201_v46 = vsel %vm1191_vm6, %v1187_v40, 1326507024  ;;  %v1111_v49 = vsel %vm1109_vm11, %v1110_v1, %v5348_v58 }
 0x185   :  { %v1173_v19 = vshll.u32 %v7216_v12, %v7298_v56  ;;  %v1174_v57 = vshrl.u32 %v7224_v43, %v7299_v55  ;;  %vm950_vm5 = vcmp.lt.s32.totalorder %v7273_v62, 0  ;;  %v1176_v32 = vshll.u32 %v7224_v43, %v7298_v56 }
 0x186   :  { %v3322_v54 = vadd.s32 4294967294, %v1016_v45  ;;  %v1112_v31 = vadd.s32 %v1111_v49, %v1107_v0  ;;  %v1177_v26 = vshrl.u32 %v7225_v59, %v7299_v55  ;;  %vm940_vm10 = vcmp.eq.s32.totalorder %v5391_v21, 0 }
 0x187   :  { %v1163_v61 = vand.u32 8388607, %v1156_v33  ;;  %v1179_v47 = vshll.u32 %v7225_v59, %v7298_v56  ;;  %v1180_v5 = vshrl.u32 %v7167_v36, %v7299_v55  ;;  %vm939_vm4 = vcmp.lt.s32.totalorder %v5391_v21, 2 }
 0x188   :  { %v1004_v58 = vadd.s32 %v5272_v29, %v5246_v22  ;;  %vm3323_vm13 = vcmp.lt.s32.totalorder %v3322_v54, 0  ;;  %v1113_v25 = vadd.s32 536870912, %v1112_v31  ;;  %v1175_v16 = vor.u32 %v1174_v57, %v1173_v19 }
 0x189   :  { %vm936_vm2 = vweird.f32 %v7261_v39  ;;  %v1019_v38 = vsel %vm3323_vm13, 0, %v3322_v54  ;;  %v1178_v7 = vor.u32 %v1177_v26, %v1176_v32  ;;  %v1181_v48 = vor.u32 %v1180_v5, %v1179_v47 }
 0x18a   :  { %vm1188_vm15 = vcmp.lt.s32.totalorder %v7292_v41, 1  ;;  %vm5428_vm0 = vcmp.le.f32.partialorder %v948_v23, 0.7853982  ;;  %v1020_v34 = vsub.s32 32, %v1019_v38  ;;  %v1024_v35 = vsub.s32 4294967266, %v1019_v38 }
 0x18b   :  { %v5432_v28 = vshrl.u32 %v1113_v25, 30  ;;  %vm1190_vm3 = vcmp.lt.s32.totalorder %v7292_v41, 3  ;;  %vm943_vm12 = vcmp.eq.s32.totalorder %v5391_v21, 2  ;;  %v1034_v22 = vsub.s32 4, %v5324_v60  ;;  %v3411_v21 = vld [vmem:[%s7031_s7 + $0x18] sm:$0xff] }
 0x18c   :  { %v1164_v29 = vor.u32 8388608, %v1163_v61  ;;  %vm1189_vm8 = vcmp.lt.s32.totalorder %v7292_v41, 2  ;;  %v3854_v24 = vpop.eup %3853  ;;  %v1021_v4 = vshll.u32 %v5354_v51, %v1019_v38  ;;  %v1022_v23 = vshrl.u32 %v1004_v58, %v1020_v34  ;;  %v3410_v38 = vld [vmem:[%s7031_s7 + $0x10] sm:$0xff] }
 0x18d   :  { %v1025_v40 = vadd.s32 127, %v1024_v35  ;;  %v1115_v15 = vshll.u32 %v5432_v28, 30  ;;  %v3856_v9 = vpop.eup %3855  ;;  %v944_v1 = vxor.u32 2147483648, %v3854_v24  ;;  %v1196_v20 = vsel %vm1188_vm15, %v1175_v16, %v1178_v7 }
 0x18e   :  { %v1198_v10 = vsel %vm1190_vm3, %v1181_v48, %v1197_v13  ;;  %v1200_v45 = vsel %vm1188_vm15, %v1178_v7, %v1181_v48  ;;  %v941_v0 = vxor.u32 2147483648, %v3856_v9  ;;  %v1023_v49 = vor.u32 %v1022_v23, %v1021_v4 }
 0x18f   :  { %v1026_v56 = vshll.u32 %v1025_v40, 23  ;;  %v5446_v19 = vsub.s32 %v1112_v31, %v1115_v15  ;;  %v945_v51 = vsel %vm943_vm12, %v944_v1, %v3856_v9  ;;  %v1035_v57 = vsel %vm950_vm5, %v1034_v22, %v5324_v60 }
 0x190   :  { %v1172_v54 = vshrl.u32 %v7216_v12, %v7299_v55  ;;  %v1202_v13 = vsel %vm1190_vm3, %v5368_v6, %v1201_v46  ;;  %v942_v32 = vsel %vm940_vm10, %v3854_v24, %v941_v0  ;;  %v1193_v61 = vsel %vm1191_vm6, %v1181_v48, 2102212464  ;;  %v7302_v48 = vld [vmem:[#allocation19_spill] sm:$0xff] }
 0x191   :  { %v1027_v26 = vor.u32 4788187, %v1026_v56  ;;  %v1118_v31 = vsub.s32 0, %v5446_v19  ;;  %v946_v47 = vsel %vm939_vm4, %v942_v32, %v945_v51  ;;  %v1199_v60 = vsel %vm1189_vm8, %v1196_v20, %v1198_v10 }
 0x192   :  { %v1203_v55 = vsel %vm1189_vm8, %v1200_v45, %v1202_v13  ;;  %v1204_v5 = vshll.u32 %v1164_v29, 8  ;;  %v947_v6 = vsel %vm936_vm2, nan, %v946_v47  ;;  %v1030_v58 = vcvt.s32.f32 %v1023_v49 }
 0x193   :  { %v1028_v46 = vand.u32 2147483647, %v1027_v26  ;;  %v3325_v25 = vmin.u32 %v1118_v31, %v5446_v19  ;;  %v5479_v34 = vmul.f32 %v947_v6, %v7302_v48  ;;  %v1037_v35 = vsel %vm5428_vm0, 0, %v1035_v57 }
 0x194   :  { %v5483_v39 = vmul.u32.u64.low %v1204_v5, %v1203_v55  ;;  %v5484_v22 = vmul.u32.u64.high %v1204_v5, %v1203_v55, %v5483_v39  ;;  %v1192_v4 = vsel %vm1188_vm15, %v1172_v54, %v1175_v16  ;;  %v1194_v23 = vsel %vm1190_vm3, %v1178_v7, %v1193_v61  ;;  %v7305_v55 = vld [vmem:[#allocation27_spill] sm:$0xff] }
 0x195   :  { %v1031_v29 = vmul.f32 %v1030_v58, %v1028_v46  ;;  %v1120_v24 = vclz %v3325_v25  ;;  %3618 = vmatprep.mubr.msk.f32.mxu0 %vm2517_vm9, %v5479_v34  ;;  %v1138_v40 = vsub.s32 4, %v5432_v28  ;;  %v3692_v1 = vpack.c.bf16 %v3411_v21, %v3410_v38 }
 0x196   :  { %v5493_v15 = vmul.u32.u64.low %v1204_v5, %v1199_v60  ;;  %v5494_v9 = vmul.u32.u64.high %v1204_v5, %v1199_v60, %v5493_v15  ;;  %v5498_v20 = vshrl.u32 %v7295_v27, 5  ;;  %v5501_v10 = vsub.s32 32, %v5385_v42 }
 0x197   :  { %v1032_v16 = vxor.u32 2147483648, %v1031_v29  ;;  %v3326_v45 = vadd.s32 4294967294, %v1120_v24  ;;  %v1402_v7 = vsub.s32 32, %v5397_v17  ;;  %v1041_v0 = vadd.s32 3, %v1037_v35  ;;  %3693 = vmatprep.subr.bf16.mxu1 %v3692_v1 }
 0x198   :  { %vm1054_vm7 = vcmp.lt.s32.totalorder %v7283_v2, 0  ;;  %v1195_v49 = vsel %vm1189_vm8, %v1192_v4, %v1194_v23  ;;  %v1108_v27 = vadd.s32 %v5347_v44, %v5364_v3  ;;  %vm1213_vm6 = vc.u32 %v5484_v22, %v5493_v15  ;;  %3695 = vmatpush3.bf16.msra.mxu1 %v3692_v1 }
 0x199   :  { %v1033_v56 = vsel %vm950_vm5, %v1032_v16, %v1031_v29  ;;  %vm3327_vm14 = vcmp.lt.s32.totalorder %v3326_v45, 0  ;;  %v1139_v41 = vsel %vm1054_vm7, %v1138_v40, %v5432_v28  ;;  %v1214_v54 = vadd.s32 1, %v5494_v9 }
 0x19a   :  { %v1036_v51 = vsel %vm5428_vm0, %v7273_v62, %v1033_v56  ;;  %v1123_v57 = vsel %vm3327_vm14, 0, %v3326_v45  ;;  %v1211_v44 = vmul.u32 %v1204_v5, %v1195_v49  ;;  %v5520_v3 = vand.u32 3, %v1041_v0 }
 0x19b   :  { %3857 = vcosq.f32 %v1036_v51  ;;  %v1124_v13 = vsub.s32 32, %v1123_v57  ;;  %v1128_v32 = vsub.s32 4294967266, %v1123_v57  ;;  %vm5524_vm11 = vcmp.le.f32.partialorder %v1052_v30, 0.7853982  ;;  %3629 = vmatmul.mubr.msk.f32.vlgmr.msra.gmra.mrb[20].mxu1 %vm2517_vm9, %v5059_v11 }
 0x19c   :  { %3859 = vsinq.f32 %v1036_v51  ;;  %v1215_v53 = vsel %vm1213_vm6, %v1214_v54, %v5494_v9  ;;  %v1125_v28 = vshll.u32 %v5446_v19, %v1123_v57  ;;  %3631 = vmatprep.mubr.msk.f32.mxu1 %vm2517_vm9, %v5261_v14  ;;  %v5535_v60 = vshrl.u32 %v5361_v50, 5 }
 0x19d   :  { %v1126_v31 = vshrl.u32 %v1108_v27, %v1124_v13  ;;  %v1129_v61 = vadd.s32 127, %v1128_v32  ;;  %v1216_v47 = vadd.s32 %v1215_v53, %v1211_v44  ;;  %v1141_v30 = vsel %vm5524_vm11, 0, %v1139_v41 }
 0x19e   :  { %v1387_v5 = vand.u32 2147483647, %v7305_v55  ;;  %v1404_v6 = vshll.u32 %v7216_v12, %v5397_v17  ;;  %v1405_v25 = vshrl.u32 %v7224_v43, %v1402_v7  ;;  %v1410_v50 = vshll.u32 %v7225_v59, %v5397_v17 }
 0x19f   :  { %v1127_v46 = vor.u32 %v1126_v31, %v1125_v28  ;;  %v1130_v58 = vshll.u32 %v1129_v61, 23  ;;  %v1217_v19 = vadd.s32 536870912, %v1216_v47  ;;  %3632 = vmatmul.mubr.msk.f32.gmra.mrb[22].mxu1 %vm2517_vm9, %v5352_v63  ;;  %v1411_v38 = vshrl.u32 %v7167_v36, %v1402_v7 }
 0x1a0   :  { %v1413_v21 = vshll.u32 %v7167_v36, %v5397_v17  ;;  %v7306_v48 = vmov 920167782   ;;  %vm1043_vm5 = vcmp.lt.s32.totalorder %v5520_v3, 2  ;;  %3634 = vmatprep.mubr.msk.f32.mxu1 %vm2517_vm9, %v5479_v34  ;;  %v1407_v24 = vshll.u32 %v7224_v43, %v5397_v17 }
 0x1a1   :  { %v1414_v35 = vshrl.u32 %v7306_v48, %v1402_v7  ;;  %v1131_v39 = vor.u32 4788187, %v1130_v58  ;;  %v5552_v29 = vshrl.u32 %v1217_v19, 30  ;;  %v1408_v4 = vshrl.u32 %v7225_v59, %v1402_v7 }
 0x1a2   :  { %vm1040_vm10 = vweird.f32 %v7273_v62  ;;  %vm1044_vm4 = vcmp.eq.s32.totalorder %v5520_v3, 0  ;;  %v1394_v23 = vand.u32 8388607, %v1387_v5  ;;  %v1416_v40 = vshll.u32 %v7306_v48, %v5397_v17 }
 0x1a3   :  { %v1417_v9 = vshrl.u32 %v7247_v37, %v1402_v7  ;;  %vm1047_vm13 = vcmp.eq.s32.totalorder %v5520_v3, 2  ;;  %v1132_v1 = vand.u32 2147483647, %v1131_v39  ;;  %v1134_v16 = vcvt.s32.f32 %v1127_v46 }
 0x1a4   :  { %v1219_v45 = vshll.u32 %v5552_v29, 30  ;;  %v1145_v0 = vadd.s32 3, %v1141_v30  ;;  %v1403_v49 = vshrl.u32 %v7216_v12, %v1402_v7  ;;  %v1412_v56 = vor.u32 %v1411_v38, %v1410_v50 }
 0x1a5   :  { %v1415_v27 = vor.u32 %v1414_v35, %v1413_v21  ;;  %v3858_v51 = vpop.eup %3857  ;;  %v1135_v57 = vmul.f32 %v1134_v16, %v1132_v1  ;;  %v1406_v54 = vor.u32 %v1405_v25, %v1404_v6  ;;  %v1409_v13 = vor.u32 %v1408_v4, %v1407_v24  ;;  %v7307_v4 = vld [vmem:[#allocation16_spill] sm:$0xff] }
 0x1a6   :  { %v5569_v41 = vsub.s32 %v1216_v47, %v1219_v45  ;;  %v3860_v17 = vpop.eup %3859  ;;  %v1048_v32 = vxor.u32 2147483648, %v3858_v51  ;;  %v1395_v44 = vor.u32 8388608, %v1394_v23  ;;  %v1418_v53 = vor.u32 %v1417_v9, %v1416_v40 }
 0x1a7   :  { %vm1419_vm2 = vcmp.lt.s32.totalorder %v5535_v60, 1  ;;  %v1045_v28 = vxor.u32 2147483648, %v3860_v17  ;;  %v1136_v31 = vxor.u32 2147483648, %v1135_v57  ;;  %vm1422_vm15 = vcmp.lt.s32.totalorder %v5535_v60, 4 }
 0x1a8   :  { %v1222_v61 = vsub.s32 0, %v5569_v41  ;;  %v1049_v7 = vsel %vm1047_vm13, %v1048_v32, %v3860_v17  ;;  %vm1421_vm0 = vcmp.lt.s32.totalorder %v5535_v60, 3  ;;  %v1424_v47 = vsel %vm1422_vm15, %v1412_v56, 2102212464  ;;  %v7308_v32 = vld [vmem:[#allocation14_spill] sm:$0xff] }
 0x1a9   :  { %v1428_v30 = vsel %vm1422_vm15, %v1415_v27, 920167782  ;;  %v1046_v6 = vsel %vm1044_vm4, %v3858_v51, %v1045_v28  ;;  %v1137_v46 = vsel %vm1054_vm7, %v1136_v31, %v1135_v57  ;;  %v1427_v19 = vsel %vm1419_vm2, %v1406_v54, %v1409_v13 }
 0x1aa   :  { %v3329_v58 = vmin.u32 %v1222_v61, %v5569_v41  ;;  %v1050_v25 = vsel %vm1043_vm5, %v1046_v6, %v1049_v7  ;;  %v1140_v50 = vsel %vm5524_vm11, %v7283_v2, %v1137_v46  ;;  %v1429_v38 = vsel %vm1421_vm0, %v1412_v56, %v1428_v30 }
 0x1ab   :  { %v1432_v21 = vsel %vm1422_vm15, %v1418_v53, 1326507024  ;;  %v1051_v35 = vsel %vm1040_vm10, nan, %v1050_v25  ;;  %3861 = vcosq.f32 %v1140_v50  ;;  %v1431_v24 = vsel %vm1419_vm2, %v1409_v13, %v1412_v56 }
 0x1ac   :  { %v1224_v39 = vclz %v3329_v58  ;;  %v5596_v23 = vmul.f32 %v1051_v35, %v7307_v4  ;;  %3863 = vsinq.f32 %v1140_v50  ;;  %v5598_v3 = vand.u32 3, %v1145_v0 }
 0x1ad   :  { %vm1420_vm3 = vcmp.lt.s32.totalorder %v5535_v60, 2  ;;  %v1433_v62 = vsel %vm1421_vm0, %v1415_v27, %v1432_v21  ;;  %v1435_v9 = vshll.u32 %v1395_v44, 8  ;;  %vm1158_vm12 = vcmp.lt.s32.totalorder %v7297_v52, 0 }
 0x1ae   :  { %v3330_v26 = vadd.s32 4294967294, %v1224_v39  ;;  %v1430_v40 = vsel %vm1420_vm3, %v1427_v19, %v1429_v38  ;;  %3619 = vmatmul.mubr.msk.f32.gmra.mrb[16].mxu0 %vm2517_vm9, %v5596_v23  ;;  %3635 = vmatmul.mubr.msk.f32.gmra.mrb[24].mxu1 %vm2517_vm9, %v5596_v23  ;;  %v1423_v1 = vsel %vm1419_vm2, %v1403_v49, %v1406_v54  ;;  %v1425_v16 = vsel %vm1421_vm0, %v1409_v13, %v1424_v47 }
 0x1af   :  { %v1434_v45 = vsel %vm1420_vm3, %v1431_v24, %v1433_v62  ;;  %v1242_v0 = vsub.s32 4, %v5552_v29  ;;  %v5620_v57 = vmul.u32.u64.low %v1435_v9, %v1430_v40  ;;  %v5621_v17 = vmul.u32.u64.high %v1435_v9, %v1430_v40, %v5620_v57 }
 0x1b0   :  { %vm3331_vm8 = vcmp.lt.s32.totalorder %v3330_v26, 0  ;;  %v5617_v56 = vmul.u32.u64.low %v1435_v9, %v1434_v45  ;;  %v5618_v27 = vmul.u32.u64.high %v1435_v9, %v1434_v45, %v5617_v56  ;;  %v7135_v44 = vand.u32 2147483647, %v7308_v32 }
 0x1b1   :  { %v1227_v51 = vsel %vm3331_vm8, 0, %v3330_v26  ;;  %vm1604_vm7 = vcmp.gt.s32.totalorder %v5388_v8, 0  ;;  %vm1147_vm14 = vcmp.lt.s32.totalorder %v5598_v3, 2  ;;  %v1212_v49 = vadd.s32 %v5493_v15, %v5484_v22 }
 0x1b2   :  { %v1228_v54 = vsub.s32 32, %v1227_v51  ;;  %v1232_v13 = vsub.s32 4294967266, %v1227_v51  ;;  %v1426_v53 = vsel %vm1420_vm3, %v1423_v1, %v1425_v16  ;;  %vm1144_vm6 = vweird.f32 %v7283_v2 }
 0x1b3   :  { %vm1148_vm11 = vcmp.eq.s32.totalorder %v5598_v3, 0  ;;  %vm1151_vm5 = vcmp.eq.s32.totalorder %v5598_v3, 2  ;;  %v1301_v28 = vshll.u32 %v7216_v12, %v5385_v42  ;;  %v1302_v31 = vshrl.u32 %v7224_v43, %v5501_v10 }
 0x1b4   :  { %v1229_v61 = vshll.u32 %v5569_v41, %v1227_v51  ;;  %v1230_v22 = vshrl.u32 %v1212_v49, %v1228_v54  ;;  %v1233_v15 = vadd.s32 127, %v1232_v13  ;;  %vm1444_vm10 = vc.u32 %v5618_v27, %v5620_v57 }
 0x1b5   :  { %v1243_v60 = vsel %vm1158_vm12, %v1242_v0, %v5552_v29  ;;  %v1442_v7 = vmul.u32 %v1435_v9, %v1426_v53  ;;  %v1445_v47 = vadd.s32 1, %v5621_v17  ;;  %v1291_v30 = vand.u32 8388607, %v7135_v44  ;;  %v3862_v6 = vpop.eup %3861 }
 0x1b6   :  { %v1231_v46 = vor.u32 %v1230_v22, %v1229_v61  ;;  %v1234_v58 = vshll.u32 %v1233_v15, 23  ;;  %v1304_v41 = vshll.u32 %v7224_v43, %v5385_v42  ;;  %v1305_v19 = vshrl.u32 %v7225_v59, %v5501_v10  ;;  %v3864_v25 = vpop.eup %3863 }
 0x1b7   :  { %v1152_v50 = vxor.u32 2147483648, %v3862_v6  ;;  %v1446_v38 = vsel %vm1444_vm10, %v1445_v47, %v5621_v17  ;;  %v1303_v29 = vor.u32 %v1302_v31, %v1301_v28  ;;  %v1310_v21 = vshll.u32 %v7167_v36, %v5385_v42 }
 0x1b8   :  { %v1149_v35 = vxor.u32 2147483648, %v3864_v25  ;;  %v1235_v39 = vor.u32 4788187, %v1234_v58  ;;  %v1447_v24 = vadd.s32 %v1446_v38, %v1442_v7  ;;  %v1307_v4 = vshll.u32 %v7225_v59, %v5385_v42 }
 0x1b9   :  { %v1153_v26 = vsel %vm1151_vm5, %v1152_v50, %v3864_v25  ;;  %v1238_v40 = vcvt.s32.f32 %v1231_v46  ;;  %v1308_v62 = vshrl.u32 %v7167_v36, %v5501_v10  ;;  %v1311_v9 = vshrl.u32 %v7306_v48, %v5501_v10 }
 0x1ba   :  { %v1150_v1 = vsel %vm1148_vm11, %v3862_v6, %v1149_v35  ;;  %v1236_v16 = vand.u32 2147483647, %v1235_v39  ;;  %v1448_v45 = vadd.s32 536870912, %v1447_v24  ;;  %v1306_v0 = vor.u32 %v1305_v19, %v1304_v41 }
 0x1bb   :  { %v1154_v56 = vsel %vm1147_vm14, %v1150_v1, %v1153_v26  ;;  %v1312_v51 = vor.u32 %v1311_v9, %v1310_v21  ;;  %v1313_v17 = vshll.u32 %v7306_v48, %v5385_v42  ;;  %v1314_v49 = vshrl.u32 %v7247_v37, %v5501_v10  ;;  %v7311_v42 = vld [vmem:[#allocation31_spill] sm:$0xff]  ;;  %v7312_v9 = vld [vmem:[#allocation25_spill] sm:$0xff] }
 0x1bc   :  { %v1155_v54 = vsel %vm1144_vm6, nan, %v1154_v56  ;;  %vm5674_vm4 = vcmp.le.f32.partialorder %v1156_v33, 0.7853982  ;;  %v1239_v53 = vmul.f32 %v1238_v40, %v1236_v16  ;;  %v5678_v28 = vshrl.u32 %v1448_v45, 30 }
 0x1bd   :  { %v1605_v3 = vsel %vm1604_vm7, %v5388_v8, 0  ;;  %v5684_v31 = vmul.f32 %v1155_v54, %v7311_v42  ;;  %v1245_v2 = vsel %vm5674_vm4, 0, %v1243_v60  ;;  %v1309_v61 = vor.u32 %v1308_v62, %v1307_v4 }
 0x1be   :  { %v1240_v22 = vxor.u32 2147483648, %v1239_v53  ;;  %v1450_v33 = vshll.u32 %v5678_v28, 30  ;;  %vm1316_vm13 = vcmp.lt.s32.totalorder %v5498_v20, 1  ;;  %vm1319_vm2 = vcmp.lt.s32.totalorder %v5498_v20, 4 }
 0x1bf   :  { %3621 = vmatprep.mubr.msk.f32.mxu0 %vm2517_vm9, %v5684_v31  ;;  %3637 = vmatprep.mubr.msk.f32.mxu1 %vm2517_vm9, %v5684_v31  ;;  %v1292_v8 = vor.u32 8388608, %v1291_v30  ;;  %v1315_v15 = vor.u32 %v1314_v49, %v1313_v17  ;;  %v1324_v7 = vsel %vm1316_vm13, %v1303_v29, %v1306_v0  ;;  %v1325_v60 = vsel %vm1319_vm2, %v1312_v51, 920167782 }
 0x1c0   :  { %v1241_v47 = vsel %vm1158_vm12, %v1240_v22, %v1239_v53  ;;  %v5701_v6 = vsub.s32 %v1447_v24, %v1450_v33  ;;  %v1300_v46 = vshrl.u32 %v7216_v12, %v5501_v10  ;;  %vm1318_vm15 = vcmp.lt.s32.totalorder %v5498_v20, 3  ;;  %v7313_v22 = vld [vmem:[#allocation24_spill] sm:$0xff] }
 0x1c1   :  { %v1244_v30 = vsel %vm5674_vm4, %v7297_v52, %v1241_v47  ;;  %v1249_v58 = vadd.s32 3, %v1245_v2  ;;  %vm1317_vm0 = vcmp.lt.s32.totalorder %v5498_v20, 2  ;;  %v1326_v41 = vsel %vm1318_vm15, %v1309_v61, %v1325_v60 }
 0x1c2   :  { %3865 = vcosq.f32 %v1244_v30  ;;  %v1453_v19 = vsub.s32 0, %v5701_v6  ;;  %v1321_v25 = vsel %vm1319_vm2, %v1309_v61, 2102212464  ;;  %v1327_v10 = vsel %vm1317_vm0, %v1324_v7, %v1326_v41 }
 0x1c3   :  { %3867 = vsinq.f32 %v1244_v30  ;;  %v1328_v50 = vsel %vm1316_vm13, %v1306_v0, %v1309_v61  ;;  %v1329_v38 = vsel %vm1319_vm2, %v1315_v15, 1326507024  ;;  %v1332_v21 = vshll.u32 %v1292_v8, 8 }
 0x1c4   :  { %v1607_v35 = vand.u32 31, %v1605_v3  ;;  %v3337_v39 = vmin.u32 %v1453_v19, %v5701_v6  ;;  %v1320_v24 = vsel %vm1316_vm13, %v1300_v46, %v1303_v29  ;;  %v1322_v4 = vsel %vm1318_vm15, %v1306_v0, %v1321_v25 }
 0x1c5   :  { %v1330_v26 = vsel %vm1318_vm15, %v1312_v51, %v1329_v38  ;;  %v5728_v40 = vmul.u32.u64.low %v1332_v21, %v1327_v10  ;;  %v5729_v62 = vmul.u32.u64.high %v1332_v21, %v1327_v10, %v5728_v40  ;;  %v3340_v1 = vadd.s32 4294967169, %v7312_v9 }
 0x1c6   :  { %v1455_v16 = vclz %v3337_v39  ;;  %v1331_v45 = vsel %vm1317_vm0, %v1328_v50, %v1330_v26  ;;  %v1250_v56 = vand.u32 3, %v1249_v58  ;;  %v5738_v29 = vsub.s32 32, %v1607_v35 }
 0x1c7   :  { %v5735_v17 = vmul.u32.u64.low %v1332_v21, %v1331_v45  ;;  %v5736_v49 = vmul.u32.u64.high %v1332_v21, %v1331_v45, %v5735_v17  ;;  %v1323_v0 = vsel %vm1317_vm0, %v1320_v24, %v1322_v4  ;;  %v1342_v51 = vadd.s32 1, %v5729_v62 }
 0x1c8   :  { %v1500_v54 = vadd.s32 1, %v3340_v1  ;;  %v5743_v13 = vshrl.u32 %v1605_v3, 5  ;;  %v3338_v53 = vadd.s32 4294967294, %v1455_v16  ;;  %vm1252_vm3 = vcmp.eq.s32.totalorder %v1250_v56, 0  ;;  %v7314_v16 = vld [vmem:[#allocation26_spill] sm:$0xff] }
 0x1c9   :  { %vm1255_vm12 = vcmp.eq.s32.totalorder %v1250_v56, 2  ;;  %v1339_v42 = vmul.u32 %v1332_v21, %v1323_v0  ;;  %vm1341_vm8 = vc.u32 %v5736_v49, %v5728_v40  ;;  %v7134_v33 = vand.u32 2147483647, %v7313_v22  ;;  %v7315_v0 = vld [vmem:[#allocation18_spill] sm:$0xff] }
 0x1ca   :  { %v1343_v61 = vsel %vm1341_vm8, %v1342_v51, %v5729_v62  ;;  %v1610_v20 = vshll.u32 %v7216_v12, %v1607_v35  ;;  %v1611_v8 = vshrl.u32 %v7224_v43, %v5738_v29  ;;  %v1613_v60 = vshll.u32 %v7224_v43, %v1607_v35 }
 0x1cb   :  { %v1344_v7 = vadd.s32 %v1343_v61, %v1339_v42  ;;  %v1614_v47 = vshrl.u32 %v7225_v59, %v5738_v29  ;;  %vm3339_vm7 = vcmp.lt.s32.totalorder %v3338_v53, 0  ;;  %v1616_v30 = vshll.u32 %v7225_v59, %v1607_v35 }
 0x1cc   :  { %v3866_v2 = vpop.eup %3865  ;;  %v1619_v58 = vshll.u32 %v7167_v36, %v1607_v35  ;;  %v1617_v25 = vshrl.u32 %v7167_v36, %v5738_v29  ;;  %v1620_v10 = vshrl.u32 %v7306_v48, %v5738_v29  ;;  %vm1251_vm14 = vcmp.lt.s32.totalorder %v1250_v56, 2 }
 0x1cd   :  { %v3868_v15 = vpop.eup %3867  ;;  %v1256_v3 = vxor.u32 2147483648, %v3866_v2  ;;  %v1345_v19 = vadd.s32 536870912, %v1344_v7  ;;  %v1622_v38 = vshll.u32 %v7306_v48, %v1607_v35  ;;  %v1623_v21 = vshrl.u32 %v7247_v37, %v5738_v29 }
 0x1ce   :  { %v1253_v46 = vxor.u32 2147483648, %v3868_v15  ;;  %vm1248_vm6 = vweird.f32 %v7297_v52  ;;  %v1600_v4 = vand.u32 8388607, %v7134_v33  ;;  %v5772_v62 = vsel %vm3339_vm7, 0, %v3338_v53  ;;  %v7316_v53 = vld [vmem:[#allocation21_spill] sm:$0xff] }
 0x1cf   :  { %v1257_v41 = vsel %vm1255_vm12, %v1256_v3, %v3868_v15  ;;  %v5767_v24 = vshrl.u32 %v1345_v19, 30  ;;  %v1612_v9 = vor.u32 %v1611_v8, %v1610_v20  ;;  %v1621_v1 = vor.u32 %v1620_v10, %v1619_v58  ;;  %v7317_v19 = vld [vmem:[#allocation28_spill] sm:$0xff] }
 0x1d0   :  { %v1254_v50 = vsel %vm1252_vm3, %v3866_v2, %v1253_v46  ;;  %v1615_v56 = vor.u32 %v1614_v47, %v1613_v60  ;;  %v1618_v17 = vor.u32 %v1617_v25, %v1616_v30  ;;  %v1624_v52 = vor.u32 %v1623_v21, %v1622_v38 }
 0x1d1   :  { %v1258_v39 = vsel %vm1251_vm14, %v1254_v50, %v1257_v41  ;;  %v1347_v35 = vshll.u32 %v5767_v24, 30  ;;  %vm1625_vm11 = vcmp.lt.s32.totalorder %v5743_v13, 1  ;;  %vm1627_vm5 = vcmp.lt.s32.totalorder %v5743_v13, 3 }
 0x1d2   :  { %v1259_v26 = vsel %vm1248_vm6, nan, %v1258_v39  ;;  %vm1628_vm10 = vcmp.lt.s32.totalorder %v5743_v13, 4  ;;  %vm1501_vm4 = vcmp.gt.s32.totalorder %v1500_v54, 0  ;;  %v5782_v51 = vmul.f32 0.5235988, %v7315_v0 }
 0x1d3   :  { %v5775_v45 = vmul.f32 %v1259_v26, %v7314_v16  ;;  %v5785_v42 = vmul.f32 0.5235988, %v7316_v53  ;;  %v5791_v2 = vsub.s32 %v1344_v7, %v1347_v35  ;;  %v1463_v61 = vsub.s32 4294967266, %v5772_v62 }
 0x1d4   :  { %v1601_v20 = vor.u32 8388608, %v1600_v4  ;;  %v1634_v8 = vsel %vm1628_vm10, %v1621_v1, 920167782  ;;  %vm1626_vm13 = vcmp.lt.s32.totalorder %v5743_v13, 2  ;;  %v1633_v3 = vsel %vm1625_vm11, %v1612_v9, %v1615_v56 }
 0x1d5   :  { %3622 = vmatmul.mubr.msk.f32.gmra.mrb[18].mxu0 %vm2517_vm9, %v5775_v45  ;;  %3638 = vmatmul.mubr.msk.f32.gmra.mrb[26].mxu1 %vm2517_vm9, %v5775_v45  ;;  %v1350_v15 = vsub.s32 0, %v5791_v2  ;;  %v1635_v7 = vsel %vm1627_vm5, %v1618_v17, %v1634_v8  ;;  %v1502_v60 = vsel %vm1501_vm4, %v1500_v54, 0  ;;  %v1637_v47 = vsel %vm1625_vm11, %v1615_v56, %v1618_v17 }
 0x1d6   :  { %3644 = vmatprep.mubr.msk.f32.mxu0 %vm2517_vm9, %v5173_v18  ;;  %v1609_v18 = vshrl.u32 %v7216_v12, %v5738_v29  ;;  %v1638_v46 = vsel %vm1628_vm10, %v1624_v52, 1326507024  ;;  %v1802_v30 = vand.u32 2139095040, %v5782_v51  ;;  %v1699_v58 = vand.u32 2139095040, %v5785_v42 }
 0x1d7   :  { %v3333_v41 = vmin.u32 %v1350_v15, %v5791_v2  ;;  %v1630_v54 = vsel %vm1628_vm10, %v1618_v17, 2102212464  ;;  %v5818_v29 = vmul.f32 0.5235988, %v7317_v19  ;;  %v1636_v25 = vsel %vm1626_vm13, %v1633_v3, %v1635_v7 }
 0x1d8   :  { %v1639_v10 = vsel %vm1627_vm5, %v1621_v1, %v1638_v46  ;;  %v1641_v50 = vshll.u32 %v1601_v20, 8  ;;  %v1464_v38 = vadd.s32 127, %v1463_v61  ;;  %v1629_v4 = vsel %vm1625_vm11, %v1609_v18, %v1612_v9 }
 0x1d9   :  { %3645 = vmatmul.mubr.msk.f32.vlgmr.msra.gmra.mrb[20].mxu0 %vm2517_vm9, %v5059_v11  ;;  %v1459_v11 = vsub.s32 32, %v5772_v62  ;;  %v1352_v21 = vclz %v3333_v41  ;;  %v1640_v39 = vsel %vm1626_vm13, %v1637_v47, %v1639_v10  ;;  %v1504_v35 = vand.u32 31, %v1502_v60 }
 0x1da   :  { %3647 = vmatprep.mubr.msk.f32.mxu0 %vm2517_vm9, %v5261_v14  ;;  %v1631_v14 = vsel %vm1627_vm5, %v1615_v56, %v1630_v54  ;;  %v5833_v26 = vmul.u32.u64.low %v1641_v50, %v1640_v39  ;;  %v5834_v16 = vmul.u32.u64.high %v1641_v50, %v1640_v39, %v5833_v26  ;;  %v1803_v61 = vshrl.u32 %v1802_v30, 23  ;;  %v7318_v54 = vld [vmem:[#allocation22_spill] sm:$0xff] }
 0x1db   :  { %v3334_v1 = vadd.s32 4294967294, %v1352_v21  ;;  %v5838_v17 = vmul.u32.u64.low %v1641_v50, %v1636_v25  ;;  %v5839_v52 = vmul.u32.u64.high %v1641_v50, %v1636_v25, %v5838_v17  ;;  %v1443_v9 = vadd.s32 %v5620_v57, %v5618_v27 }
 0x1dc   :  { %v1700_v56 = vshrl.u32 %v1699_v58, 23  ;;  %v2008_v20 = vand.u32 2139095040, %v5818_v29  ;;  %v1632_v8 = vsel %vm1626_vm13, %v1629_v4, %v1631_v14  ;;  %v1465_v15 = vshll.u32 %v1464_v38, 23 }
 0x1dd   :  { %3648 = vmatmul.mubr.msk.f32.gmra.mrb[22].mxu0 %vm2517_vm9, %v5352_v63  ;;  %vm3335_vm2 = vcmp.lt.s32.totalorder %v3334_v1, 0  ;;  %v1461_v63 = vshrl.u32 %v1443_v9, %v1459_v11  ;;  %vm1650_vm15 = vc.u32 %v5834_v16, %v5838_v17  ;;  %v1505_v3 = vsub.s32 32, %v1504_v35 }
 0x1de   :  { %3650 = vmatprep.mubr.msk.f32.mxu0 %vm2517_vm9, %v5479_v34  ;;  %v1651_v34 = vadd.s32 1, %v5839_v52  ;;  %v5854_v7 = vshrl.u32 %v1502_v60, 5  ;;  %v1460_v27 = vshll.u32 %v5701_v6, %v5772_v62  ;;  %v5860_v57 = vsel %vm3335_vm2, 0, %v3334_v1 }
 0x1df   :  { %v1648_v13 = vmul.u32 %v1641_v50, %v1632_v8  ;;  %v3352_v18 = vadd.s32 4294967169, %v1803_v61  ;;  %v3348_v47 = vadd.s32 4294967169, %v1700_v56  ;;  %v2009_v46 = vshrl.u32 %v2008_v20, 23 }
 0x1e0   :  { %v1652_v30 = vsel %vm1650_vm15, %v1651_v34, %v5839_v52  ;;  %v1462_v58 = vor.u32 %v1461_v63, %v1460_v27  ;;  %v7133_v60 = vand.u32 2147483647, %v7318_v54  ;;  %v1507_v6 = vshll.u32 %v7216_v12, %v1504_v35 }
 0x1e1   :  { %3651 = vmatmul.mubr.msk.f32.gmra.mrb[24].mxu0 %vm2517_vm9, %v5596_v23  ;;  %v1466_v23 = vor.u32 4788187, %v1465_v15  ;;  %v1653_v41 = vadd.s32 %v1652_v30, %v1648_v13  ;;  %v1516_v62 = vshll.u32 %v7167_v36, %v1504_v35  ;;  %v1517_v25 = vshrl.u32 %v7306_v48, %v1505_v3 }
 0x1e2   :  { %3653 = vmatprep.mubr.msk.f32.mxu0 %vm2517_vm9, %v5684_v31  ;;  %v1360_v31 = vsub.s32 4294967266, %v5860_v57  ;;  %v1508_v50 = vshrl.u32 %v7224_v43, %v1505_v3  ;;  %v1510_v11 = vshll.u32 %v7224_v43, %v1504_v35  ;;  %v1511_v38 = vshrl.u32 %v7225_v59, %v1505_v3 }
 0x1e3   :  { %v1654_v10 = vadd.s32 536870912, %v1653_v41  ;;  %v1513_v21 = vshll.u32 %v7225_v59, %v1504_v35  ;;  %v1514_v39 = vshrl.u32 %v7167_v36, %v1505_v3  ;;  %v1520_v4 = vshrl.u32 %v7247_v37, %v1505_v3 }
 0x1e4   :  { %v1809_v14 = vadd.s32 1, %v3352_v18  ;;  %v1706_v26 = vadd.s32 1, %v3348_v47  ;;  %v3360_v1 = vadd.s32 4294967169, %v2009_v46  ;;  %v1467_v61 = vand.u32 2147483647, %v1466_v23 }
 0x1e5   :  { %3654 = vmatmul.mubr.msk.f32.gmra.mrb[26].mxu0 %vm2517_vm9, %v5775_v45  ;;  %v1519_v45 = vshll.u32 %v7306_v48, %v1504_v35  ;;  %v5877_v52 = vshrl.u32 %v1654_v10, 30  ;;  %v1469_v9 = vcvt.s32.f32 %v1462_v58  ;;  %v1361_v56 = vadd.s32 127, %v1360_v31 }
 0x1e6   :  { %v1518_v20 = vor.u32 %v1517_v25, %v1516_v62  ;;  %v1356_v8 = vsub.s32 32, %v5860_v57  ;;  %v1497_v15 = vand.u32 8388607, %v7133_v60  ;;  %vm1525_vm9 = vcmp.lt.s32.totalorder %v5854_v7, 4 }
 0x1e7   :  { %v1656_v63 = vshll.u32 %v5877_v52, 30  ;;  %v1509_v35 = vor.u32 %v1508_v50, %v1507_v6  ;;  %v1512_v34 = vor.u32 %v1511_v38, %v1510_v11  ;;  %v1515_v27 = vor.u32 %v1514_v39, %v1513_v21 }
 0x1e8   :  { %v1521_v13 = vor.u32 %v1520_v4, %v1519_v45  ;;  %v1340_v18 = vadd.s32 %v5728_v40, %v5736_v49  ;;  %vm1522_vm0 = vcmp.lt.s32.totalorder %v5854_v7, 1  ;;  %vm1524_vm3 = vcmp.lt.s32.totalorder %v5854_v7, 3 }
 0x1e9   :  { %v5886_v47 = vsub.s32 %v1653_v41, %v1656_v63  ;;  %v1470_v46 = vmul.f32 %v1469_v9, %v1467_v61  ;;  %v1362_v30 = vshll.u32 %v1361_v56, 23  ;;  %v1506_v58 = vshrl.u32 %v7216_v12, %v1505_v3 }
 0x1ea   :  { %v1531_v23 = vsel %vm1525_vm9, %v1518_v20, 920167782  ;;  %v1358_v31 = vshrl.u32 %v1340_v18, %v1356_v8  ;;  %v1498_v62 = vor.u32 8388608, %v1497_v15  ;;  %vm1523_vm12 = vcmp.lt.s32.totalorder %v5854_v7, 2 }
 0x1eb   :  { %v1659_v6 = vsub.s32 0, %v5886_v47  ;;  %v1530_v40 = vsel %vm1522_vm0, %v1509_v35, %v1512_v34  ;;  %v1532_v49 = vsel %vm1524_vm3, %v1515_v27, %v1531_v23  ;;  %v1534_v41 = vsel %vm1522_vm0, %v1512_v34, %v1515_v27 }
 0x1ec   :  { %v1535_v3 = vsel %vm1525_vm9, %v1521_v13, 1326507024  ;;  %vm1810_vm8 = vcmp.gt.s32.totalorder %v1809_v14, 0  ;;  %vm1707_vm7 = vcmp.gt.s32.totalorder %v1706_v26, 0  ;;  %v1357_v10 = vshll.u32 %v5791_v2, %v5860_v57 }
 0x1ed   :  { %v3345_v25 = vmin.u32 %v1659_v6, %v5886_v47  ;;  %v1363_v50 = vor.u32 4788187, %v1362_v30  ;;  %v1527_v11 = vsel %vm1525_vm9, %v1515_v27, 2102212464  ;;  %v1536_v38 = vsel %vm1524_vm3, %v1518_v20, %v1535_v3 }
 0x1ee   :  { %v1533_v39 = vsel %vm1523_vm12, %v1530_v40, %v1532_v49  ;;  %v1537_v45 = vsel %vm1523_vm12, %v1534_v41, %v1536_v38  ;;  %v1538_v4 = vshll.u32 %v1498_v62, 8  ;;  %v2015_v61 = vadd.s32 1, %v3360_v1  ;;  %v5916_v57 = vpop.f32.mrb[4].mxu1  ;;  %v5918_v8 = vpop.f32.mrb[4].mxu0 }
 0x1ef   :  { %v1661_v21 = vclz %v3345_v25  ;;  %v1471_v9 = vxor.u32 2147483648, %v1470_v46  ;;  %v1359_v56 = vor.u32 %v1358_v31, %v1357_v10  ;;  %v1526_v2 = vsel %vm1522_vm0, %v1506_v58, %v1509_v35  ;;  %v5926_v18 = vpop.f32.mrb[5].mxu1  ;;  %v5928_v1 = vpop.f32.mrb[5].mxu0  ;;  %v7319_v58 = vld [vmem:[#allocation35_spill] sm:$0xff] }
 0x1f0   :  { %v1528_v20 = vsel %vm1524_vm3, %v1512_v34, %v1527_v11  ;;  %v5922_v15 = vmul.u32.u64.low %v1538_v4, %v1537_v45  ;;  %v5923_v27 = vmul.u32.u64.high %v1538_v4, %v1537_v45, %v5922_v15  ;;  %v1811_v13 = vsel %vm1810_vm8, %v1809_v14, 0 }
 0x1f1   :  { %v3346_v63 = vadd.s32 4294967294, %v1661_v21  ;;  %v1364_v30 = vand.u32 2147483647, %v1363_v50  ;;  %v5930_v23 = vmul.u32.u64.low %v1538_v4, %v1533_v39  ;;  %v5931_v35 = vmul.u32.u64.high %v1538_v4, %v1533_v39, %v5930_v23 }
 0x1f2   :  { %v5935_v31 = vmul.f32 0.5235988, %v7319_v58  ;;  %vm1389_vm14 = vcmp.lt.s32.totalorder %v7305_v55, 0  ;;  %v1708_v34 = vsel %vm1707_vm7, %v1706_v26, 0  ;;  %v1366_v6 = vcvt.s32.f32 %v1359_v56 }
 0x1f3   :  { %vm3347_vm6 = vcmp.lt.s32.totalorder %v3346_v63, 0  ;;  %v1472_v14 = vsel %vm1389_vm14, %v1471_v9, %v1470_v46  ;;  %v1529_v62 = vsel %vm1523_vm12, %v1526_v2, %v1528_v20  ;;  %v1813_v40 = vand.u32 31, %v1811_v13 }
 0x1f4   :  { %vm2016_vm11 = vcmp.gt.s32.totalorder %v2015_v61, 0  ;;  %vm5945_vm5 = vcmp.le.f32.partialorder %v1387_v5, 0.7853982  ;;  %v5949_v41 = vsel %vm3347_vm6, 0, %v3346_v63  ;;  %v1473_v3 = vsub.s32 4, %v5678_v28 }
 0x1f5   :  { %v1367_v26 = vmul.f32 %v1366_v6, %v1364_v30  ;;  %vm1547_vm10 = vc.u32 %v5923_v27, %v5930_v23  ;;  %v1548_v46 = vadd.s32 1, %v5931_v35  ;;  %v5955_v7 = vand.u32 31, %v1708_v34 }
 0x1f6   :  { %v1905_v25 = vand.u32 2139095040, %v5935_v31  ;;  %v1475_v5 = vsel %vm5945_vm5, %v7305_v55, %v1472_v14  ;;  %v1545_v10 = vmul.u32 %v1538_v4, %v1529_v62  ;;  %v1669_v50 = vsub.s32 4294967266, %v5949_v41  ;;  %v5965_v21 = vpop.f32.mrb[6].mxu1  ;;  %v5967_v39 = vpop.f32.mrb[6].mxu0 }
 0x1f7   :  { %v1549_v11 = vsel %vm1547_vm10, %v1548_v46, %v5931_v35  ;;  %v5963_v38 = vsel %vm2016_vm11, %v2015_v61, 0  ;;  %7322 = vst [vmem:[#allocation32_spill] sm:$0xff] %v5967_v39  ;;  %v1370_v45 = vsub.s32 4, %v5767_v24  ;;  %v5970_v56 = vshrl.u32 %v1811_v13, 5  ;;  %v5972_v2 = vpop.f32.mrb[7].mxu1  ;;  %v5974_v63 = vpop.f32.mrb[7].mxu0 }
 0x1f8   :  { %v1550_v9 = vadd.s32 %v1549_v11, %v1545_v10  ;;  %7323 = vst [vmem:[#allocation70_spill] sm:$0xff] %v5974_v63  ;;  %v1474_v4 = vsel %vm1389_vm14, %v1473_v3, %v5678_v28  ;;  %3869 = vcosq.f32 %v1475_v5  ;;  %v1368_v61 = vxor.u32 2147483648, %v1367_v26 }
 0x1f9   :  { %v5979_v20 = vsub.s32 32, %v1813_v40  ;;  %v5981_v15 = vshrl.u32 %v1708_v34, 5  ;;  %v5984_v30 = vsub.s32 32, %v5955_v7  ;;  %v1906_v35 = vshrl.u32 %v1905_v25, 23 }
 0x1fa   :  { %v5987_v13 = vand.u32 31, %v5963_v38  ;;  %vm1286_vm4 = vcmp.lt.s32.totalorder %v7308_v32, 0  ;;  %v1670_v14 = vadd.s32 127, %v1669_v50  ;;  %v1551_v6 = vadd.s32 536870912, %v1550_v9  ;;  %v5990_v62 = vpop.f32.mrb[8].mxu1  ;;  %v5992_v28 = vpop.f32.mrb[8].mxu0 }
 0x1fb   :  { %7324 = vst [vmem:[#allocation67_spill] sm:$0xff] %v5990_v62  ;;  %7325 = vst [vmem:[#allocation36_spill] sm:$0xff] %v5992_v28  ;;  %v1476_v3 = vsel %vm5945_vm5, 0, %v1474_v4  ;;  %3871 = vsinq.f32 %v1475_v5  ;;  %v5997_v34 = vsel %vm1286_vm4, %v1370_v45, %v5767_v24  ;;  %v1649_v46 = vadd.s32 %v5838_v17, %v5834_v16  ;;  %v6001_v25 = vpop.f32.mrb[9].mxu1  ;;  %v6003_v10 = vpop.f32.mrb[9].mxu0 }
 0x1fc   :  { %7326 = vst [vmem:[#allocation10_spill] sm:$0xff] %v6001_v25  ;;  %7327 = vst [vmem:[#allocation63_spill] sm:$0xff] %v6003_v10  ;;  %v1369_v50 = vsel %vm1286_vm4, %v1368_v61, %v1367_v26  ;;  %v1665_v11 = vsub.s32 32, %v5949_v41  ;;  %v6006_v60 = vshrl.u32 %v1551_v6, 30  ;;  %v1816_v49 = vshll.u32 %v7216_v12, %v1813_v40 }
 0x1fd   :  { %v1817_v24 = vshrl.u32 %v7224_v43, %v5979_v20  ;;  %v1819_v5 = vshll.u32 %v7224_v43, %v1813_v40  ;;  %v1820_v16 = vshrl.u32 %v7225_v59, %v5979_v20  ;;  %v1671_v17 = vshll.u32 %v1670_v14, 23 }
 0x1fe   :  { %v1553_v45 = vshll.u32 %v6006_v60, 30  ;;  %v1822_v26 = vshll.u32 %v7225_v59, %v1813_v40  ;;  %v1823_v4 = vshrl.u32 %v7167_v36, %v5979_v20  ;;  %v6019_v61 = vpop.f32.mrb[10].mxu1  ;;  %v6021_v6 = vpop.f32.mrb[10].mxu0  ;;  %v1825_v33 = vshll.u32 %v7167_v36, %v1813_v40 }
 0x1ff   :  { %7328 = vst [vmem:[#allocation17_spill] sm:$0xff] %v6019_v61  ;;  %7329 = vst [vmem:[#allocation56_spill] sm:$0xff] %v6021_v6  ;;  %v1826_v44 = vshrl.u32 %v7306_v48, %v5979_v20  ;;  %v1828_v58 = vshll.u32 %v7306_v48, %v1813_v40  ;;  %v1829_v14 = vshrl.u32 %v7247_v37, %v5979_v20  ;;  %v6029_v19 = vpop.f32.mrb[11].mxu1  ;;  %v6031_v10 = vpop.f32.mrb[11].mxu0  ;;  %v6033_v53 = vand.u32 3, %v1476_v3 }
 0x200   :  { %7330 = vst [vmem:[#allocation66_spill] sm:$0xff] %v6029_v19  ;;  %7331 = vst [vmem:[#allocation69_spill] sm:$0xff] %v6031_v10  ;;  %v7332_v61 = vand.u32 2147483647, %v7308_v32  ;;  %v1667_v25 = vshrl.u32 %v1649_v46, %v1665_v11  ;;  %v6041_v28 = vsub.s32 %v1550_v9, %v1553_v45  ;;  %v6043_v0 = vadd.s32 4294967169, %v1906_v35 }
 0x201   :  { %v7335_v10 = vand.u32 2147483647, %v5782_v51  ;;  %v1666_v62 = vshll.u32 %v5886_v47, %v5949_v41  ;;  %v1672_v46 = vor.u32 4788187, %v1671_v17  ;;  %v1818_v35 = vor.u32 %v1817_v24, %v1816_v49 }
 0x202   :  { %vm6037_vm13 = vcmp.le.f32.partialorder %v7332_v61, 0.7853982  ;;  %v3870_v61 = vpop.eup %3869  ;;  %v1556_v9 = vsub.s32 0, %v6041_v28  ;;  %v6056_v11 = vpop.f32.mrb[12].mxu1  ;;  %v1821_v45 = vor.u32 %v1820_v16, %v1819_v5  ;;  %v1824_v63 = vor.u32 %v1823_v4, %v1822_v26 }
 0x203   :  { %v1372_v40 = vsel %vm6037_vm13, %v7308_v32, %v1369_v50  ;;  %v1373_v3 = vsel %vm6037_vm13, 0, %v5997_v34  ;;  %v1806_v19 = vand.u32 8388607, %v7335_v10  ;;  %v1827_v50 = vor.u32 %v1826_v44, %v1825_v33  ;;  %v6059_v34 = vpop.f32.mrb[13].mxu1 }
 0x204   :  { %v1830_v39 = vor.u32 %v1829_v14, %v1828_v58  ;;  %vm1485_vm2 = vcmp.eq.s32.totalorder %v6033_v53, 2  ;;  %v1668_v6 = vor.u32 %v1667_v25, %v1666_v62  ;;  %v3341_v10 = vmin.u32 %v1556_v9, %v6041_v28 }
 0x205   :  { %vm1831_vm15 = vcmp.lt.s32.totalorder %v5970_v56, 1  ;;  %vm1834_vm9 = vcmp.lt.s32.totalorder %v5970_v56, 4  ;;  %v3872_v47 = vpop.eup %3871  ;;  %vm1482_vm0 = vcmp.eq.s32.totalorder %v6033_v53, 0  ;;  %v1486_v41 = vxor.u32 2147483648, %v3870_v61 }
 0x206   :  { %3873 = vcosq.f32 %v1372_v40  ;;  %v1807_v49 = vor.u32 8388608, %v1806_v19  ;;  %vm1833_vm3 = vcmp.lt.s32.totalorder %v5970_v56, 3  ;;  %v1673_v44 = vand.u32 2147483647, %v1672_v46  ;;  %v6067_v58 = vpop.f32.mrb[14].mxu1 }
 0x207   :  { %3875 = vsinq.f32 %v1372_v40  ;;  %v1558_v33 = vclz %v3341_v10  ;;  %vm1832_vm12 = vcmp.lt.s32.totalorder %v5970_v56, 2  ;;  %7336 = vst [vmem:[#allocation34_spill] sm:$0xff] %v6067_v58  ;;  %v1839_v62 = vsel %vm1831_vm15, %v1818_v35, %v1821_v45  ;;  %v6077_v16 = vpop.f32.mrb[15].mxu1 }
 0x208   :  { %v1840_v25 = vsel %vm1834_vm9, %v1827_v50, 920167782  ;;  %v1843_v24 = vsel %vm1831_vm15, %v1821_v45, %v1824_v63  ;;  %v1844_v19 = vsel %vm1834_vm9, %v1830_v39, 1326507024  ;;  %v1675_v5 = vcvt.s32.f32 %v1668_v6  ;;  %7337 = vst [vmem:[#allocation40_spill] sm:$0xff] %v6077_v16 }
 0x209   :  { %v3342_v17 = vadd.s32 4294967294, %v1558_v33  ;;  %v1815_v26 = vshrl.u32 %v7216_v12, %v5979_v20  ;;  %v1841_v4 = vsel %vm1833_vm3, %v1824_v63, %v1840_v25  ;;  %v1483_v14 = vxor.u32 2147483648, %v3872_v47 }
 0x20a   :  { %v1836_v40 = vsel %vm1834_vm9, %v1824_v63, 2102212464  ;;  %v1845_v46 = vsel %vm1833_vm3, %v1827_v50, %v1844_v19  ;;  %v1847_v9 = vshll.u32 %v1807_v49, 8  ;;  %v1676_v10 = vmul.f32 %v1675_v5, %v1673_v44  ;;  %v6093_v25 = vpop.f32.mrb[16].mxu1 }
 0x20b   :  { %vm3343_vm8 = vcmp.lt.s32.totalorder %v3342_v17, 0  ;;  %v1842_v39 = vsel %vm1832_vm12, %v1839_v62, %v1841_v4  ;;  %v1846_v6 = vsel %vm1832_vm12, %v1843_v24, %v1845_v46  ;;  %v1546_v20 = vadd.s32 %v5930_v23, %v5923_v27  ;;  %7338 = vst [vmem:[#allocation68_spill] sm:$0xff] %v6093_v25  ;;  %v6102_v62 = vpop.f32.mrb[17].mxu1 }
 0x20c   :  { %v1561_v33 = vsel %vm3343_vm8, 0, %v3342_v17  ;;  %v6095_v16 = vmul.u32.u64.low %v1847_v9, %v1846_v6  ;;  %v6096_v63 = vmul.u32.u64.high %v1847_v9, %v1846_v6, %v6095_v16  ;;  %v1835_v49 = vsel %vm1831_vm15, %v1815_v26, %v1818_v35  ;;  %7339 = vst [vmem:[#allocation37_spill] sm:$0xff] %v6102_v62 }
 0x20d   :  { %v1562_v58 = vsub.s32 32, %v1561_v33  ;;  %v1566_v50 = vsub.s32 4294967266, %v1561_v33  ;;  %v1837_v44 = vsel %vm1833_vm3, %v1821_v45, %v1836_v40  ;;  %v1487_v24 = vsel %vm1485_vm2, %v1486_v41, %v3872_v47 }
 0x20e   :  { %v6106_v27 = vand.u32 3, %v1373_v3  ;;  %v6108_v23 = vmul.u32.u64.low %v1847_v9, %v1842_v39  ;;  %v6109_v19 = vmul.u32.u64.high %v1847_v9, %v1842_v39, %v6108_v23  ;;  %v1484_v5 = vsel %vm1482_vm0, %v3870_v61, %v1483_v14  ;;  %v6121_v47 = vpop.f32.mrb[18].mxu1 }
 0x20f   :  { %v1677_v16 = vxor.u32 2147483648, %v1676_v10  ;;  %v1564_v17 = vshrl.u32 %v1546_v20, %v1562_v58  ;;  %v1567_v35 = vadd.s32 127, %v1566_v50  ;;  %v6115_v45 = vadd.s32 1, %v6043_v0  ;;  %7340 = vst [vmem:[#allocation12_spill] sm:$0xff] %v6121_v47 }
 0x210   :  { %v3874_v26 = vpop.eup %3873  ;;  %vm1481_vm7 = vcmp.lt.s32.totalorder %v6033_v53, 2  ;;  %vm1595_vm14 = vcmp.lt.s32.totalorder %v7313_v22, 0  ;;  %v1838_v3 = vsel %vm1832_vm12, %v1835_v49, %v1837_v44  ;;  %v7341_v4 = vand.u32 2147483647, %v7313_v22 }
 0x211   :  { %v3876_v41 = vpop.eup %3875  ;;  %v1563_v58 = vshll.u32 %v6041_v28, %v1561_v33  ;;  %v1568_v0 = vshll.u32 %v1567_v35, 23  ;;  %vm1856_vm11 = vc.u32 %v6096_v63, %v6108_v23  ;;  %v6132_v53 = vsel %vm1481_vm7, %v1484_v5, %v1487_v24 }
 0x212   :  { %vm6125_vm6 = vcmp.le.f32.partialorder %v7341_v4, 0.7853982  ;;  %vm1379_vm5 = vcmp.eq.s32.totalorder %v6106_v27, 0  ;;  %vm1382_vm10 = vcmp.eq.s32.totalorder %v6106_v27, 2  ;;  %v1679_v56 = vsub.s32 4, %v5877_v52 }
 0x213   :  { %v1857_v14 = vadd.s32 1, %v6109_v19  ;;  %v1678_v40 = vsel %vm1595_vm14, %v1677_v16, %v1676_v10  ;;  %v1565_v46 = vor.u32 %v1564_v17, %v1563_v58  ;;  %v1569_v39 = vor.u32 4788187, %v1568_v0 }
 0x214   :  { %v1854_v28 = vmul.u32 %v1847_v9, %v1838_v3  ;;  %v7136_v20 = vand.u32 2147483647, %v5785_v42  ;;  %v1713_v33 = vshll.u32 %v7216_v12, %v5955_v7  ;;  %v1714_v50 = vshrl.u32 %v7224_v43, %v5984_v30 }
 0x215   :  { %v1858_v6 = vsel %vm1856_vm11, %v1857_v14, %v6109_v19  ;;  %vm1378_vm4 = vcmp.lt.s32.totalorder %v6106_v27, 2  ;;  %v1570_v49 = vand.u32 2147483647, %v1569_v39  ;;  %v1716_v10 = vshll.u32 %v7224_v43, %v5955_v7 }
 0x216   :  { %v1859_v44 = vadd.s32 %v1858_v6, %v1854_v28  ;;  %v1717_v9 = vshrl.u32 %v7225_v59, %v5984_v30  ;;  %v1380_v24 = vxor.u32 2147483648, %v3876_v41  ;;  %v1383_v19 = vxor.u32 2147483648, %v3874_v26 }
 0x217   :  { %v1681_v5 = vsel %vm6125_vm6, %v7313_v22, %v1678_v40  ;;  %v1722_v16 = vshll.u32 %v7167_v36, %v5955_v7  ;;  %v1572_v17 = vcvt.s32.f32 %v1565_v46  ;;  %v1719_v3 = vshll.u32 %v7225_v59, %v5955_v7 }
 0x218   :  { %v1860_v35 = vadd.s32 536870912, %v1859_v44  ;;  %v1720_v4 = vshrl.u32 %v7167_v36, %v5984_v30  ;;  %vm1479_vm13 = vweird.f32 %v7305_v55  ;;  %vm1492_vm2 = vcmp.lt.s32.totalorder %v7318_v54, 0 }
 0x219   :  { %v1703_v58 = vand.u32 8388607, %v7136_v20  ;;  %v1723_v0 = vshrl.u32 %v7306_v48, %v5984_v30  ;;  %v1725_v14 = vshll.u32 %v7306_v48, %v5955_v7  ;;  %v1726_v40 = vshrl.u32 %v7247_v37, %v5984_v30 }
 0x21a   :  { %vm1376_vm15 = vweird.f32 %v7308_v32  ;;  %v1573_v46 = vmul.f32 %v1572_v17, %v1570_v49  ;;  %v6171_v39 = vshrl.u32 %v1860_v35, 30  ;;  %v1715_v28 = vor.u32 %v1714_v50, %v1713_v33 }
 0x21b   :  { %v1718_v6 = vor.u32 %v1717_v9, %v1716_v10  ;;  %v1384_v47 = vsel %vm1382_vm10, %v1383_v19, %v3876_v41  ;;  %v1680_v20 = vsel %vm1595_vm14, %v1679_v56, %v5877_v52  ;;  %v1724_v62 = vor.u32 %v1723_v0, %v1722_v16 }
 0x21c   :  { %vm1728_vm9 = vcmp.lt.s32.totalorder %v5981_v15, 1  ;;  %v1381_v7 = vsel %vm1379_vm5, %v3874_v26, %v1380_v24  ;;  %v1862_v25 = vshll.u32 %v6171_v39, 30  ;;  %v1721_v49 = vor.u32 %v1720_v4, %v1719_v3  ;;  %v6276_v3 = vld [vmem:[%s7030_s6] ss:$0 sm:$0xff] }
 0x21d   :  { %vm1731_vm0 = vcmp.lt.s32.totalorder %v5981_v15, 4  ;;  %3877 = vcosq.f32 %v1681_v5  ;;  %v1704_v33 = vor.u32 8388608, %v1703_v58  ;;  %v1727_v50 = vor.u32 %v1726_v40, %v1725_v14 }
 0x21e   :  { %vm1730_vm3 = vcmp.lt.s32.totalorder %v5981_v15, 3  ;;  %v1574_v41 = vxor.u32 2147483648, %v1573_v46  ;;  %v6184_v10 = vsub.s32 %v1859_v44, %v1862_v25  ;;  %vm1729_vm12 = vcmp.lt.s32.totalorder %v5981_v15, 2 }
 0x21f   :  { %v1736_v52 = vsel %vm1728_vm9, %v1715_v28, %v1718_v6  ;;  %v1385_v26 = vsel %vm1378_vm4, %v1381_v7, %v1384_v47  ;;  %3879 = vsinq.f32 %v1681_v5  ;;  %v1576_v56 = vsub.s32 4, %v6006_v60 }
 0x220   :  { %v1737_v9 = vsel %vm1731_vm0, %v1724_v62, 920167782  ;;  %v1865_v24 = vsub.s32 0, %v6184_v10  ;;  %v1712_v25 = vshrl.u32 %v7216_v12, %v5984_v30  ;;  %v1733_v44 = vsel %vm1731_vm0, %v1721_v49, 2102212464 }
 0x221   :  { %v1738_v19 = vsel %vm1730_vm3, %v1721_v49, %v1737_v9  ;;  %v1740_v47 = vsel %vm1728_vm9, %v1718_v6, %v1721_v49  ;;  %v1741_v5 = vsel %vm1731_vm0, %v1727_v50, 1326507024  ;;  %v1744_v16 = vshll.u32 %v1704_v33, 8 }
 0x222   :  { %v1739_v27 = vsel %vm1729_vm12, %v1736_v52, %v1738_v19  ;;  %v1489_v30 = vsel %vm1479_vm13, nan, %v6132_v53  ;;  %v1682_v17 = vsel %vm6125_vm6, 0, %v1680_v20  ;;  %v7344_v35 = vand.u32 2147483647, %v7318_v54  ;;  %v6266_v19 = vpop.f32.mrb[19].mxu1 }
 0x223   :  { %v1575_v4 = vsel %vm1492_vm2, %v1574_v41, %v1573_v46  ;;  %v1386_v58 = vsel %vm1376_vm15, nan, %v1385_v26  ;;  %v1742_v0 = vsel %vm1730_vm3, %v1724_v62, %v1741_v5  ;;  %v1577_v61 = vsel %vm1492_vm2, %v1576_v56, %v6006_v60 }
 0x224   :  { %vm6214_vm8 = vcmp.le.f32.partialorder %v7344_v35, 0.7853982  ;;  %v6224_v55 = vmul.u32.u64.low %v1744_v16, %v1739_v27  ;;  %v6225_v53 = vmul.u32.u64.high %v1744_v16, %v1739_v27, %v6224_v55  ;;  %v1732_v20 = vsel %vm1728_vm9, %v1712_v25, %v1715_v28 }
 0x225   :  { %v1734_v14 = vsel %vm1730_vm3, %v1718_v6, %v1733_v44  ;;  %v1743_v32 = vsel %vm1729_vm12, %v1740_v47, %v1742_v0  ;;  %v1578_v62 = vsel %vm6214_vm8, %v7318_v54, %v1575_v4  ;;  %v3353_v40 = vmin.u32 %v1865_v24, %v6184_v10  ;;  %v7347_v24 = vld [vmem:[#allocation8_spill] sm:$0xff] }
 0x226   :  { %v6241_v46 = vmul.u32.u64.low %v1744_v16, %v1743_v32  ;;  %v6242_v7 = vmul.u32.u64.high %v1744_v16, %v1743_v32, %v6241_v46  ;;  %vm1913_vm7 = vcmp.gt.s32.totalorder %v6115_v45, 0  ;;  %v2109_v60 = vadd.f32 1.0, %v1489_v30 }
 0x227   :  { %v6245_v49 = vand.u32 3, %v1682_v17  ;;  %v3878_v28 = vpop.eup %3877  ;;  %v2108_v33 = vadd.f32 1.0, %v1386_v58  ;;  %v1735_v6 = vsel %vm1729_vm12, %v1732_v20, %v1734_v14  ;;  %v1754_v50 = vadd.s32 1, %v6225_v53 }
 0x228   :  { %v6251_v41 = vshrl.u32 %v5963_v38, 5  ;;  %v6254_v52 = vsub.s32 32, %v5987_v13  ;;  %v1579_v26 = vsel %vm6214_vm8, 0, %v1577_v61  ;;  %3881 = vcosq.f32 %v1578_v62  ;;  %v7348_v38 = vld [vmem:[#allocation11_spill] sm:$0xff] }
 0x229   :  { %v3880_v56 = vpop.eup %3879  ;;  %v6259_v9 = vsel %vm1913_vm7, %v6115_v45, 0  ;;  %vm1269_vm14 = vcmp.lt.f32.partialorder %v7347_v24, 6.0  ;;  %v1867_v15 = vclz %v3353_v40  ;;  %vm1753_vm6 = vc.u32 %v6242_v7, %v6224_v55 }
 0x22a   :  { %v2117_v25 = vmul.f32 0.5, %v2109_v60  ;;  %vm1268_vm11 = vcmp.lt.f32.partialorder %v7348_v38, 6.0  ;;  %vm1688_vm5 = vcmp.eq.s32.totalorder %v6245_v49, 0  ;;  %v1751_v44 = vmul.u32 %v1744_v16, %v1735_v6 }
 0x22b   :  { %v2116_v27 = vmul.f32 0.5, %v2108_v33  ;;  %vm1687_vm10 = vcmp.lt.s32.totalorder %v6245_v49, 2  ;;  %v1692_v47 = vxor.u32 2147483648, %v3878_v28  ;;  %v6269_v45 = vand.u32 3, %v1579_v26 }
 0x22c   :  { %v1755_v5 = vsel %vm1753_vm6, %v1754_v50, %v6225_v53  ;;  %v1689_v30 = vxor.u32 2147483648, %v3880_v56  ;;  %3883 = vsinq.f32 %v1578_v62  ;;  %v2005_v35 = vand.u32 2147483647, %v5818_v29 }
 0x22d   :  { %v1756_v17 = vadd.s32 %v1755_v5, %v1751_v44  ;;  %v3354_v16 = vadd.s32 4294967294, %v1867_v15  ;;  %v2022_v4 = vshll.u32 %v7216_v12, %v5987_v13  ;;  %v2031_v58 = vshll.u32 %v7167_v36, %v5987_v13 }
 0x22e   :  { %v2032_v0 = vshrl.u32 %v7306_v48, %v6254_v52  ;;  %v2023_v61 = vshrl.u32 %v7224_v43, %v6254_v52  ;;  %v2025_v20 = vshll.u32 %v7224_v43, %v5987_v13  ;;  %v2026_v14 = vshrl.u32 %v7225_v59, %v6254_v52 }
 0x22f   :  { %v1757_v53 = vadd.s32 536870912, %v1756_v17  ;;  %v6292_v32 = vsel %vm1269_vm14, %v2117_v25, 0.0  ;;  %vm1685_vm4 = vweird.f32 %v7313_v22  ;;  %vm1691_vm13 = vcmp.eq.s32.totalorder %v6245_v49, 2 }
 0x230   :  { %v2028_v62 = vshll.u32 %v7225_v59, %v5987_v13  ;;  %v2029_v40 = vshrl.u32 %v7167_v36, %v6254_v52  ;;  %v2239_v46 = vadd.f32 %v5916_v57, %v6276_v3  ;;  %v2234_v60 = vadd.f32 %v6276_v3, %v5926_v18  ;;  %v6317_v57 = vld [vmem:[%s7032_s8] ss:$0 sm:$0xff] }
 0x231   :  { %v6306_v33 = vsel %vm1268_vm11, %v2116_v27, 0.0  ;;  %v6308_v6 = vshrl.u32 %v1757_v53, 30  ;;  %v1690_v50 = vsel %vm1688_vm5, %v3878_v28, %v1689_v30  ;;  %v1693_v26 = vsel %vm1691_vm13, %v1692_v47, %v3880_v56 }
 0x232   :  { %v2012_v24 = vand.u32 8388607, %v2005_v35  ;;  %v2033_v15 = vor.u32 %v2032_v0, %v2031_v58  ;;  %v3882_v25 = vpop.eup %3881  ;;  %vm1588_vm2 = vcmp.eq.s32.totalorder %v6269_v45, 2  ;;  %vm3355_vm15 = vcmp.lt.s32.totalorder %v3354_v16, 0  ;;  %v3614_v47 = vpop.f32.mrb[12].mxu0 }
 0x233   :  { %v1759_v18 = vshll.u32 %v6308_v6, 30  ;;  %v2024_v38 = vor.u32 %v2023_v61, %v2022_v4  ;;  %v2027_v44 = vor.u32 %v2026_v14, %v2025_v20  ;;  %v2030_v27 = vor.u32 %v2029_v40, %v2028_v62  ;;  %v2608_v58 = vpop.f32.mrb[13].mxu0 }
 0x234   :  { %v2034_v28 = vshll.u32 %v7306_v48, %v5987_v13  ;;  %v2035_v56 = vshrl.u32 %v7247_v37, %v6254_v52  ;;  %vm2040_vm9 = vcmp.lt.s32.totalorder %v6251_v41, 4  ;;  %v1694_v5 = vsel %vm1687_vm10, %v1690_v50, %v1693_v26 }
 0x235   :  { %v6328_v30 = vsub.s32 %v1756_v17, %v1759_v18  ;;  %vm2037_vm0 = vcmp.lt.s32.totalorder %v6251_v41, 1  ;;  %vm2039_vm3 = vcmp.lt.s32.totalorder %v6251_v41, 3  ;;  %v2614_v4 = vadd.f32 %v3614_v47, %v6317_v57 }
 0x236   :  { %vm1585_vm12 = vcmp.eq.s32.totalorder %v6269_v45, 0  ;;  %v1589_v13 = vxor.u32 2147483648, %v3882_v25  ;;  %v6335_v0 = vsel %vm3355_vm15, 0, %v3354_v16  ;;  %v2046_v53 = vsel %vm2040_vm9, %v2033_v15, 920167782  ;;  %v3884_v49 = vpop.eup %3883 }
 0x237   :  { %v2609_v17 = vadd.f32 %v6317_v57, %v2608_v58  ;;  %v1762_v61 = vsub.s32 0, %v6328_v30  ;;  %v2013_v20 = vor.u32 8388608, %v2012_v24  ;;  %vm2038_vm8 = vcmp.lt.s32.totalorder %v6251_v41, 2 }
 0x238   :  { %v2648_v14 = vmul.f32 %v2614_v4, %v6292_v32  ;;  %v2036_v62 = vor.u32 %v2035_v56, %v2034_v28  ;;  %v2045_v40 = vsel %vm2037_vm0, %v2024_v38, %v2027_v44  ;;  %v2047_v16 = vsel %vm2039_vm3, %v2030_v27, %v2046_v53 }
 0x239   :  { %v2647_v50 = vmul.f32 %v2609_v17, %v6306_v33  ;;  %v1695_v26 = vsel %vm1685_vm4, nan, %v1694_v5  ;;  %v3349_v18 = vmin.u32 %v1762_v61, %v6328_v30  ;;  %v2021_v24 = vshrl.u32 %v7216_v12, %v6254_v52 }
 0x23a   :  { %v6353_v47 = vmul.f32 %v2648_v14, %v2239_v46  ;;  %v1586_v4 = vxor.u32 2147483648, %v3884_v49  ;;  %v1875_v28 = vsub.s32 4294967266, %v6335_v0  ;;  %v2042_v56 = vsel %vm2040_vm9, %v2030_v27, 2102212464 }
 0x23b   :  { %v6358_v58 = vmul.f32 %v2647_v50, %v2234_v60  ;;  %v1764_v53 = vclz %v3349_v18  ;;  %v2048_v22 = vsel %vm2038_vm8, %v2045_v40, %v2047_v16  ;;  %v2049_v5 = vsel %vm2037_vm0, %v2027_v44, %v2030_v27 }
 0x23c   :  { %v1590_v52 = vsel %vm1588_vm2, %v1589_v13, %v3884_v49  ;;  %v1871_v46 = vsub.s32 32, %v6335_v0  ;;  %v2050_v17 = vsel %vm2040_vm9, %v2036_v62, 1326507024  ;;  %v2053_v61 = vshll.u32 %v2013_v20, 8 }
 0x23d   :  { %v3350_v14 = vadd.s32 4294967294, %v1764_v53  ;;  %v2041_v60 = vsel %vm2037_vm0, %v2021_v24, %v2024_v38  ;;  %v2043_v50 = vsel %vm2039_vm3, %v2027_v44, %v2042_v56  ;;  %v2051_v40 = vsel %vm2039_vm3, %v2033_v15, %v2050_v17 }
 0x23e   :  { %v1876_v27 = vadd.s32 127, %v1875_v28  ;;  %v2052_v13 = vsel %vm2038_vm8, %v2049_v5, %v2051_v40  ;;  %v6377_v49 = vmul.u32.u64.low %v2053_v61, %v2048_v22  ;;  %v6378_v16 = vmul.u32.u64.high %v2053_v61, %v2048_v22, %v6377_v49 }
 0x23f   :  { %v1587_v20 = vsel %vm1585_vm12, %v3882_v25, %v1586_v4  ;;  %vm3351_vm7 = vcmp.lt.s32.totalorder %v3350_v14, 0  ;;  %v6383_v62 = vmul.u32.u64.low %v2053_v61, %v2052_v13  ;;  %v6384_v38 = vmul.u32.u64.high %v2053_v61, %v2052_v13, %v6383_v62 }
 0x240   :  { %v1916_v44 = vand.u32 31, %v6259_v9  ;;  %v1855_v15 = vadd.s32 %v6108_v23, %v6096_v63  ;;  %v1767_v18 = vsel %vm3351_vm7, 0, %v3350_v14  ;;  %v2044_v24 = vsel %vm2038_vm8, %v2041_v60, %v2043_v50 }
 0x241   :  { %v6392_v28 = vshrl.u32 %v6259_v9, 5  ;;  %v2111_v56 = vadd.f32 1.0, %v1695_v26  ;;  %vm1584_vm14 = vcmp.lt.s32.totalorder %v6269_v45, 2  ;;  %v1772_v25 = vsub.s32 4294967266, %v1767_v18 }
 0x242   :  { %v1591_v4 = vsel %vm1584_vm14, %v1587_v20, %v1590_v52  ;;  %v1873_v53 = vshrl.u32 %v1855_v15, %v1871_v46  ;;  %v1877_v22 = vshll.u32 %v1876_v27, 23  ;;  %v2063_v5 = vadd.s32 1, %v6378_v16  ;;  %v7350_v20 = vld [vmem:[#allocation9_spill] sm:$0xff] }
 0x243   :  { %v1768_v17 = vsub.s32 32, %v1767_v18  ;;  %v1773_v40 = vadd.s32 127, %v1772_v25  ;;  %v2060_v13 = vmul.u32 %v2053_v61, %v2044_v24  ;;  %vm2062_vm6 = vc.u32 %v6384_v38, %v6377_v49 }
 0x244   :  { %v1917_v63 = vsub.s32 32, %v1916_v44  ;;  %vm1582_vm11 = vweird.f32 %v7318_v54  ;;  %v1872_v23 = vshll.u32 %v6184_v10, %v6335_v0  ;;  %v2064_v41 = vsel %vm2062_vm6, %v2063_v5, %v6378_v16 }
 0x245   :  { %v6404_v9 = vadd.f32 %v5965_v21, %v6276_v3  ;;  %v1752_v45 = vadd.s32 %v6224_v55, %v6242_v7  ;;  %v1774_v26 = vshll.u32 %v1773_v40, 23  ;;  %v2065_v52 = vadd.s32 %v2064_v41, %v2060_v13  ;;  %v7349_v7 = vld [vmem:[#allocation15_spill] sm:$0xff] }
 0x246   :  { %v2119_v46 = vmul.f32 0.5, %v2111_v56  ;;  %v1592_v61 = vsel %vm1582_vm11, nan, %v1591_v4  ;;  %v1874_v14 = vor.u32 %v1873_v53, %v1872_v23  ;;  %v1878_v60 = vor.u32 4788187, %v1877_v22 }
 0x247   :  { %v1770_v50 = vshrl.u32 %v1752_v45, %v1768_v17  ;;  %v2066_v54 = vadd.s32 536870912, %v2065_v52  ;;  %v1902_v27 = vand.u32 2147483647, %v5935_v31  ;;  %v1919_v10 = vshll.u32 %v7216_v12, %v1916_v44 }
 0x248   :  { %v1769_v0 = vshll.u32 %v6328_v30, %v1767_v18  ;;  %v1920_v21 = vshrl.u32 %v7224_v43, %v1917_v63  ;;  %v1928_v16 = vshll.u32 %v7167_v36, %v1916_v44  ;;  %v1929_v55 = vshrl.u32 %v7306_v48, %v1917_v63 }
 0x249   :  { %vm1271_vm5 = vcmp.lt.f32.partialorder %v7349_v7, 6.0  ;;  %vm1270_vm10 = vcmp.lt.f32.partialorder %v7350_v20, 6.0  ;;  %v1775_v62 = vor.u32 4788187, %v1774_v26  ;;  %v6416_v15 = vshrl.u32 %v2066_v54, 30 }
 0x24a   :  { %v1922_v24 = vshll.u32 %v7224_v43, %v1916_v44  ;;  %v1923_v56 = vshrl.u32 %v7225_v59, %v1917_v63  ;;  %v2110_v25 = vadd.f32 1.0, %v1592_v61  ;;  %v1879_v4 = vand.u32 2147483647, %v1878_v60 }
 0x24b   :  { %v1925_v30 = vshll.u32 %v7225_v59, %v1916_v44  ;;  %v1926_v18 = vshrl.u32 %v7167_v36, %v1917_v63  ;;  %v1771_v53 = vor.u32 %v1770_v50, %v1769_v0  ;;  %v2068_v22 = vshll.u32 %v6416_v15, 30 }
 0x24c   :  { %v1931_v5 = vshll.u32 %v7306_v48, %v1916_v44  ;;  %v1932_v17 = vshrl.u32 %v7247_v37, %v1917_v63  ;;  %v1881_v40 = vcvt.s32.f32 %v1874_v14  ;;  %v1909_v13 = vand.u32 8388607, %v1902_v27 }
 0x24d   :  { %v1921_v43 = vor.u32 %v1920_v21, %v1919_v10  ;;  %v1930_v23 = vor.u32 %v1929_v55, %v1928_v16  ;;  %v1776_v41 = vand.u32 2147483647, %v1775_v62  ;;  %v6427_v45 = vsub.s32 %v2065_v52, %v2068_v22 }
 0x24e   :  { %v1924_v26 = vor.u32 %v1923_v56, %v1922_v24  ;;  %vm1937_vm4 = vcmp.lt.s32.totalorder %v6392_v28, 4  ;;  %v2118_v36 = vmul.f32 0.5, %v2110_v25  ;;  %vm1801_vm13 = vcmp.lt.s32.totalorder %v5782_v51, 0 }
 0x24f   :  { %v1882_v59 = vmul.f32 %v1881_v40, %v1879_v4  ;;  %v1927_v61 = vor.u32 %v1926_v18, %v1925_v30  ;;  %vm1934_vm2 = vcmp.lt.s32.totalorder %v6392_v28, 1  ;;  %v1778_v37 = vcvt.s32.f32 %v1771_v53 }
 0x250   :  { %v2071_v48 = vsub.s32 0, %v6427_v45  ;;  %v1933_v44 = vor.u32 %v1932_v17, %v1931_v5  ;;  %vm1936_vm15 = vcmp.lt.s32.totalorder %v6392_v28, 3  ;;  %v2244_v52 = vadd.f32 %v6276_v3, %v5972_v2 }
 0x251   :  { %v1910_v14 = vor.u32 8388608, %v1909_v13  ;;  %v1918_v60 = vshrl.u32 %v7216_v12, %v1917_v63  ;;  %v1943_v50 = vsel %vm1937_vm4, %v1930_v23, 920167782  ;;  %v1779_v54 = vmul.f32 %v1778_v37, %v1776_v41 }
 0x252   :  { %v3361_v10 = vmin.u32 %v2071_v48, %v6427_v45  ;;  %vm1935_vm9 = vcmp.lt.s32.totalorder %v6392_v28, 2  ;;  %v1942_v0 = vsel %vm1934_vm2, %v1921_v43, %v1924_v26  ;;  %v6445_v21 = vsel %vm1271_vm5, %v2119_v46, 0.0  ;;  %v3617_v16 = vpop.f32.mrb[14].mxu0 }
 0x253   :  { %v6449_v2 = vsel %vm1270_vm10, %v2118_v36, 0.0  ;;  %v1944_v12 = vsel %vm1936_vm15, %v1927_v61, %v1943_v50  ;;  %v1946_v63 = vsel %vm1934_vm2, %v1924_v26, %v1927_v61  ;;  %v1883_v55 = vxor.u32 2147483648, %v1882_v59  ;;  %v2618_v20 = vpop.f32.mrb[15].mxu0 }
 0x254   :  { %v2073_v62 = vclz %v3361_v10  ;;  %v1939_v24 = vsel %vm1937_vm4, %v1927_v61, 2102212464  ;;  %v1947_v46 = vsel %vm1937_vm4, %v1933_v44, 1326507024  ;;  %v2624_v7 = vadd.f32 %v3617_v16, %v6317_v57 }
 0x255   :  { %v1945_v56 = vsel %vm1935_vm9, %v1942_v0, %v1944_v12  ;;  %v1948_v25 = vsel %vm1936_vm15, %v1930_v23, %v1947_v46  ;;  %v1950_v4 = vshll.u32 %v1910_v14, 8  ;;  %v2619_v30 = vadd.f32 %v6317_v57, %v2618_v20 }
 0x256   :  { %v1780_v18 = vxor.u32 2147483648, %v1779_v54  ;;  %v1938_v53 = vsel %vm1934_vm2, %v1918_v60, %v1921_v43  ;;  %v1949_v22 = vsel %vm1935_vm9, %v1946_v63, %v1948_v25  ;;  %v2650_v5 = vmul.f32 %v2624_v7, %v6445_v21 }
 0x257   :  { %v1940_v17 = vsel %vm1936_vm15, %v1924_v26, %v1939_v24  ;;  %v6472_v40 = vmul.u32.u64.low %v1950_v4, %v1949_v22  ;;  %v6473_v13 = vmul.u32.u64.high %v1950_v4, %v1949_v22, %v6472_v40  ;;  %v2649_v23 = vmul.f32 %v2619_v30, %v6449_v2 }
 0x258   :  { %v1884_v41 = vsel %vm1801_vm13, %v1883_v55, %v1882_v59  ;;  %v6478_v36 = vmul.u32.u64.low %v1950_v4, %v1945_v56  ;;  %v6479_v61 = vmul.u32.u64.high %v1950_v4, %v1945_v56, %v6478_v36  ;;  %v6483_v43 = vmul.f32 %v2650_v5, %v6404_v9 }
 0x259   :  { %vm1698_vm0 = vcmp.lt.s32.totalorder %v5785_v42, 0  ;;  %v3362_v37 = vadd.s32 4294967294, %v2073_v62  ;;  %v6486_v48 = vmul.f32 %v2649_v23, %v2244_v52  ;;  %v7351_v26 = vand.u32 2147483647, %v5782_v51  ;;  %v6516_v62 = vpop.permute.xlu1 %2958 }
 0x25a   :  { %v1781_v59 = vsel %vm1698_vm0, %v1780_v18, %v1779_v54  ;;  %v1941_v14 = vsel %vm1935_vm9, %v1938_v53, %v1940_v17  ;;  %vm1959_vm12 = vc.u32 %v6473_v13, %v6478_v36  ;;  %v7354_v52 = vand.u32 2147483647, %v5785_v42 }
 0x25b   :  { %vm6490_vm3 = vcmp.le.f32.partialorder %v7351_v26, 0.7853982  ;;  %v1960_v50 = vadd.s32 1, %v6479_v61  ;;  %vm3363_vm7 = vcmp.lt.s32.totalorder %v3362_v37, 0  ;;  %v1957_v54 = vmul.u32 %v1950_v4, %v1941_v14 }
 0x25c   :  { %v1887_v9 = vsel %vm6490_vm3, %v5782_v51, %v1884_v41  ;;  %vm6505_vm8 = vcmp.le.f32.partialorder %v7354_v52, 0.7853982  ;;  %v1885_v0 = vsub.s32 4, %v6171_v39  ;;  %v2076_v63 = vsel %vm3363_vm7, 0, %v3362_v37 }
 0x25d   :  { %v1784_v28 = vsel %vm6505_vm8, %v5785_v42, %v1781_v59  ;;  %3885 = vcosq.f32 %v1887_v9  ;;  %v1961_v10 = vsel %vm1959_vm12, %v1960_v50, %v6479_v61  ;;  %v1782_v16 = vsub.s32 4, %v6308_v6  ;;  %v6531_v53 = vpop.permute.xlu1 %2963 }
 0x25e   :  { %3887 = vsinq.f32 %v1887_v9  ;;  %v1962_v12 = vadd.s32 %v1961_v10, %v1957_v54  ;;  %v1886_v24 = vsel %vm1801_vm13, %v1885_v0, %v6171_v39  ;;  %v2081_v46 = vsub.s32 4294967266, %v2076_v63  ;;  %v6536_v39 = vld [vmem:[%s7030_s6 + $0x1] ss:$0 sm:$0xff]  ;;  %v7357_v9 = vld [vmem:[#allocation32_spill] sm:$0xff] }
 0x25f   :  { %3889 = vcosq.f32 %v1784_v28  ;;  %v1783_v20 = vsel %vm1698_vm0, %v1782_v16, %v6308_v6  ;;  %v1888_v25 = vsel %vm6490_vm3, 0, %v1886_v24  ;;  %v2077_v6 = vsub.s32 32, %v2076_v63 }
 0x260   :  { %3891 = vsinq.f32 %v1784_v28  ;;  %v1963_v55 = vadd.s32 536870912, %v1962_v12  ;;  %v2082_v4 = vadd.s32 127, %v2081_v46  ;;  %v1785_v22 = vsel %vm6505_vm8, 0, %v1783_v20 }
 0x261   :  { %v1892_v17 = vand.u32 3, %v1888_v25  ;;  %v2061_v41 = vadd.s32 %v6377_v49, %v6384_v38  ;;  %v2357_v37 = vadd.f32 %v5918_v8, %v6536_v39  ;;  %v1789_v26 = vand.u32 3, %v1785_v22  ;;  %v6553_v8 = vld [vmem:[%s7032_s8 + $0x1] ss:$0 sm:$0xff]  ;;  %v6555_v38 = vpop.permute.xlu1 %2968 }
 0x262   :  { %v6521_v7 = vshrl.u32 %v1963_v55, 30  ;;  %v2083_v44 = vshll.u32 %v2082_v4, 23  ;;  %v2352_v14 = vadd.f32 %v6536_v39, %v5928_v1  ;;  %v2367_v52 = vadd.f32 %v7357_v9, %v6536_v39 }
 0x263   :  { %v2079_v50 = vshrl.u32 %v2061_v41, %v2077_v6  ;;  %vm1893_vm14 = vcmp.lt.s32.totalorder %v1892_v17, 2  ;;  %vm1894_vm6 = vcmp.eq.s32.totalorder %v1892_v17, 0  ;;  %vm1897_vm11 = vcmp.eq.s32.totalorder %v1892_v17, 2 }
 0x264   :  { %v1965_v56 = vshll.u32 %v6521_v7, 30  ;;  %v2078_v1 = vshll.u32 %v6427_v45, %v2076_v63  ;;  %vm1790_vm5 = vcmp.lt.s32.totalorder %v1789_v26, 2  ;;  %vm1791_vm10 = vcmp.eq.s32.totalorder %v1789_v26, 0 }
 0x265   :  { %v2084_v0 = vor.u32 4788187, %v2083_v44  ;;  %vm1794_vm4 = vcmp.eq.s32.totalorder %v1789_v26, 2  ;;  %v1958_v25 = vadd.s32 %v6478_v36, %v6473_v13  ;;  %v6565_v9 = vpop.permute.xlu1 %2973  ;;  %vm1891_vm2 = vweird.f32 %v5782_v51 }
 0x266   :  { %v6529_v30 = vsub.s32 %v1962_v12, %v1965_v56  ;;  %v2080_v24 = vor.u32 %v2079_v50, %v2078_v1  ;;  %vm1788_vm15 = vweird.f32 %v5785_v42  ;;  %vm2007_vm9 = vcmp.lt.s32.totalorder %v5818_v29, 0 }
 0x267   :  { %v3886_v18 = vpop.eup %3885  ;;  %vm1904_vm3 = vcmp.lt.s32.totalorder %v5935_v31, 0  ;;  %vm6603_vm12 = vcmp.le.f32.partialorder %v2005_v35, 0.7853982  ;;  %vm6620_vm7 = vcmp.le.f32.partialorder %v1902_v27, 0.7853982 }
 0x268   :  { %v3888_v5 = vpop.eup %3887  ;;  %v1968_v40 = vsub.s32 0, %v6529_v30  ;;  %v1898_v60 = vxor.u32 2147483648, %v3886_v18 }
 0x269   :  { %v3890_v23 = vpop.eup %3889  ;;  %v1895_v28 = vxor.u32 2147483648, %v3888_v5  ;;  %v6584_v26 = vpop.permute.xlu1 %2978 }
 0x26a   :  { %v3892_v61 = vpop.eup %3891  ;;  %v3357_v59 = vmin.u32 %v1968_v40, %v6529_v30  ;;  %v1795_v10 = vxor.u32 2147483648, %v3890_v23  ;;  %v1899_v55 = vsel %vm1897_vm11, %v1898_v60, %v3888_v5  ;;  %v2085_v40 = vand.u32 2147483647, %v2084_v0 }
 0x26b   :  { %v1792_v54 = vxor.u32 2147483648, %v3892_v61  ;;  %v1896_v56 = vsel %vm1894_vm6, %v3886_v18, %v1895_v28  ;;  %v2087_v60 = vcvt.s32.f32 %v2080_v24 }
 0x26c   :  { %v1970_v49 = vclz %v3357_v59  ;;  %v1796_v63 = vsel %vm1794_vm4, %v1795_v10, %v3892_v61  ;;  %v1900_v18 = vsel %vm1893_vm14, %v1896_v56, %v1899_v55 }
 0x26d   :  { %v1793_v45 = vsel %vm1791_vm10, %v3890_v23, %v1792_v54  ;;  %v7360_v54 = vld [vmem:[#allocation70_spill] sm:$0xff]  ;;  %v1901_v55 = vsel %vm1891_vm2, nan, %v1900_v18  ;;  %vm1994_vm2 = vweird.f32 %v5935_v31 }
 0x26e   :  { %v3358_v12 = vadd.s32 4294967294, %v1970_v49  ;;  %v3630_v16 = vpop.f32.mrb[20].mxu1  ;;  %v2362_v10 = vadd.f32 %v6536_v39, %v7360_v54  ;;  %v1797_v1 = vsel %vm1790_vm5, %v1793_v45, %v1796_v63  ;;  %v2113_v56 = vadd.f32 1.0, %v1901_v55 }
 0x26f   :  { %v2738_v46 = vadd.f32 %v3630_v16, %v6553_v8  ;;  %v2732_v20 = vpop.f32.mrb[21].mxu1  ;;  %v1798_v24 = vsel %vm1788_vm15, nan, %v1797_v1 }
 0x270   :  { %vm3359_vm13 = vcmp.lt.s32.totalorder %v3358_v12, 0  ;;  %v2733_v4 = vadd.f32 %v6553_v8, %v2732_v20  ;;  %v2112_v45 = vadd.f32 1.0, %v1798_v24 }
 0x271   :  { %v1973_v22 = vsel %vm3359_vm13, 0, %v3358_v12  ;;  %v2772_v6 = vmul.f32 %v2738_v46, %v6292_v32  ;;  %vm2097_vm13 = vweird.f32 %v5818_v29 }
 0x272   :  { %v1974_v5 = vsub.s32 32, %v1973_v22  ;;  %v1978_v41 = vsub.s32 4294967266, %v1973_v22  ;;  %v2771_v44 = vmul.f32 %v2733_v4, %v6306_v33  ;;  %v3633_v59 = vpop.f32.mrb[22].mxu1  ;;  %v1975_v61 = vshll.u32 %v6529_v30, %v1973_v22 }
 0x273   :  { %v6568_v13 = vmul.f32 %v2772_v6, %v2357_v37  ;;  %v2748_v36 = vadd.f32 %v3633_v59, %v6553_v8  ;;  %v2742_v23 = vpop.f32.mrb[23].mxu1  ;;  %v2088_v37 = vmul.f32 %v2087_v60, %v2085_v40  ;;  %v2121_v22 = vmul.f32 0.5, %v2113_v56  ;;  %v6591_v6 = vpop.permute.xlu1 %2983  ;;  %v7364_v40 = vld [vmem:[#allocation67_spill] sm:$0xff]  ;;  %v7366_v59 = vld [vmem:[#allocation36_spill] sm:$0xff]  ;;  %v7367_v60 = vld [vmem:[#allocation10_spill] sm:$0xff] }
 0x274   :  { %v1976_v50 = vshrl.u32 %v1958_v25, %v1974_v5  ;;  %v1979_v28 = vadd.s32 127, %v1978_v41  ;;  %v6572_v49 = vmul.f32 %v2771_v44, %v2352_v14  ;;  %v2743_v0 = vadd.f32 %v6553_v8, %v2742_v23  ;;  %7363 = vst [vmem:[#allocation23_spill] sm:$0xff] %v6591_v6  ;;  %v7365_v41 = vld [vmem:[#allocation18_spill] sm:$0xff] }
 0x275   :  { %7358 = vst [vmem:[#allocation50_spill] sm:$0xff] %v6568_v13  ;;  %v2774_v17 = vmul.f32 %v2748_v36, %v6445_v21  ;;  %v2089_v25 = vxor.u32 2147483648, %v2088_v37  ;;  %v2259_v5 = vadd.f32 %v7364_v40, %v6276_v3  ;;  %vm1273_vm0 = vcmp.lt.f32.partialorder %v7365_v41, 6.0 }
 0x276   :  { %7359 = vst [vmem:[#allocation45_spill] sm:$0xff] %v6572_v49  ;;  %v1977_v12 = vor.u32 %v1976_v50, %v1975_v61  ;;  %v1980_v16 = vshll.u32 %v1979_v28, 23  ;;  %v2773_v14 = vmul.f32 %v2743_v0, %v6449_v2  ;;  %v2120_v44 = vmul.f32 0.5, %v2112_v45 }
 0x277   :  { %v6581_v30 = vmul.f32 %v2774_v17, %v2367_v52  ;;  %v2090_v42 = vsel %vm2007_vm9, %v2089_v25, %v2088_v37  ;;  %v2377_v18 = vadd.f32 %v7366_v59, %v6536_v39  ;;  %v2254_v36 = vadd.f32 %v6276_v3, %v7367_v60  ;;  %v7373_v25 = vld [vmem:[#allocation63_spill] sm:$0xff] }
 0x278   :  { %v1981_v46 = vor.u32 4788187, %v1980_v16  ;;  %v6586_v20 = vmul.f32 %v2773_v14, %v2362_v10  ;;  %v1984_v51 = vcvt.s32.f32 %v1977_v12  ;;  %v7370_v10 = vld [vmem:[#allocation21_spill] sm:$0xff]  ;;  %v2093_v17 = vsel %vm6603_vm12, %v5818_v29, %v2090_v42  ;;  %v7379_v29 = vld [vmem:[#allocation56_spill] sm:$0xff] }
 0x279   :  { %7361 = vst [vmem:[#allocation49_spill] sm:$0xff] %v6581_v30  ;;  %vm1272_vm8 = vcmp.lt.f32.partialorder %v7370_v10, 6.0  ;;  %v6615_v35 = vsel %vm1273_vm0, %v2121_v22, 0.0  ;;  %3893 = vcosq.f32 %v2093_v17  ;;  %v2091_v40 = vsub.s32 4, %v6416_v15  ;;  %v6660_v10 = vpop.permute.xlu0 %2953 }
 0x27a   :  { %7362 = vst [vmem:[#allocation6_spill] sm:$0xff] %v6586_v20  ;;  %v1982_v4 = vand.u32 2147483647, %v1981_v46  ;;  %v6626_v24 = vsel %vm1272_vm8, %v2120_v44, 0.0  ;;  %3895 = vsinq.f32 %v2093_v17  ;;  %v1988_v41 = vsub.s32 4, %v6521_v7 }
 0x27b   :  { %vm3241_vm0 = vcmask 523264  }
 0x27c   :  { %v1985_v63 = vmul.f32 %v1984_v51, %v1982_v4  ;;  %v2372_v4 = vadd.f32 %v6536_v39, %v7373_v25  ;;  %v1989_v59 = vsel %vm1904_vm3, %v1988_v41, %v6521_v7  ;;  %v3392_v41 = vld [vmem:[%s7030_s6 + $0x2] ss:$0 sm:$0xff] }
 0x27e   :  { %v1986_v52 = vxor.u32 2147483648, %v1985_v63 }
 0x280   :  { %v1987_v50 = vsel %vm1904_vm3, %v1986_v52, %v1985_v63  ;;  %v6644_v52 = vpop.permute.xlu1 %2988  ;;  %vm3250_vm3 = vcmask 785408  }
 0x281   :  { %v3620_v23 = vpop.f32.mrb[16].mxu0  ;;  %v3636_v28 = vpop.f32.mrb[24].mxu1  ;;  %v1990_v46 = vsel %vm6620_vm7, %v5935_v31, %v1987_v50  ;;  %7376 = vst [vmem:[#allocation46_spill] sm:$0xff] %v6644_v52  ;;  %v1991_v50 = vsel %vm6620_vm7, 0, %v1989_v59  ;;  %v7378_v59 = vld [vmem:[#allocation17_spill] sm:$0xff]  ;;  %v7380_v31 = vld [vmem:[#allocation66_spill] sm:$0xff] }
 0x282   :  { %v2634_v54 = vadd.f32 %v3620_v23, %v6317_v57  ;;  %v2628_v1 = vpop.f32.mrb[17].mxu0  ;;  %v2758_v0 = vadd.f32 %v3636_v28, %v6553_v8  ;;  %v2752_v37 = vpop.f32.mrb[25].mxu1  ;;  %3897 = vcosq.f32 %v1990_v46  ;;  %v3438_v52 = vld [vmem:[%s7025_s1 + $0x60] sm:$0xff] }
 0x283   :  { %v2629_v12 = vadd.f32 %v6317_v57, %v2628_v1  ;;  %v2753_v55 = vadd.f32 %v6553_v8, %v2752_v37  ;;  %3899 = vsinq.f32 %v1990_v46 }
 0x284   :  { %v2652_v14 = vmul.f32 %v2634_v54, %v6615_v35  ;;  %v2776_v56 = vmul.f32 %v2758_v0, %v6615_v35  ;;  %v6651_v44 = vpop.permute.xlu1 %3025  ;;  %v1995_v0 = vand.u32 3, %v1991_v50  ;;  %v7381_v50 = vld [vmem:[#allocation69_spill] sm:$0xff] }
 0x285   :  { %v2651_v27 = vmul.f32 %v2629_v12, %v6626_v24  ;;  %v2775_v51 = vmul.f32 %v2753_v55, %v6626_v24 }
 0x286   :  { %v6636_v45 = vmul.f32 %v2652_v14, %v2259_v5  ;;  %v6638_v63 = vmul.f32 %v2776_v56, %v2377_v18  ;;  %v2092_v5 = vsel %vm2007_vm9, %v2091_v40, %v6416_v15  ;;  %v3894_v18 = vpop.eup %3893  ;;  %vm1997_vm11 = vcmp.eq.s32.totalorder %v1995_v0, 0  ;;  %v6664_v14 = vpop.permute.xlu0 %3029 }
 0x287   :  { %v6640_v22 = vmul.f32 %v2651_v27, %v2254_v36  ;;  %v6642_v42 = vmul.f32 %v2775_v51, %v2372_v4  ;;  %v3896_v60 = vpop.eup %3895  ;;  %v2094_v36 = vsel %vm6603_vm12, 0, %v2092_v5  ;;  %v2104_v17 = vxor.u32 2147483648, %v3894_v18 }
 0x288   :  { %7374 = vst [vmem:[#allocation41_spill] sm:$0xff] %v6638_v63  ;;  %v2098_v54 = vand.u32 3, %v2094_v36  ;;  %v6662_v15 = vpop.permute.xlu1 %3033  ;;  %v2101_v1 = vxor.u32 2147483648, %v3896_v60  ;;  %vm2000_vm5 = vcmp.eq.s32.totalorder %v1995_v0, 2  ;;  %vm1996_vm4 = vcmp.lt.s32.totalorder %v1995_v0, 2 }
 0x289   :  { %7375 = vst [vmem:[#allocation44_spill] sm:$0xff] %v6642_v42  ;;  %v6683_v36 = vadd.f32 %v7379_v29, %v6536_v39  ;;  %v6703_v0 = vadd.f32 %v3392_v41, %v6059_v34  ;;  %v3443_v34 = vld [vmem:[%s7025_s1 + $0x88] sm:$0xff]  ;;  %v3442_v29 = vld [vmem:[%s7025_s1 + $0x80] sm:$0xff] }
 0x28a   :  { %vm2100_vm14 = vcmp.eq.s32.totalorder %v2098_v54, 0  ;;  %vm2103_vm6 = vcmp.eq.s32.totalorder %v2098_v54, 2  ;;  %vm2099_vm10 = vcmp.lt.s32.totalorder %v2098_v54, 2  ;;  %v6670_v51 = vpop.permute.xlu0 %3041  ;;  %v6694_v54 = vadd.f32 %v6056_v11, %v3392_v41 }
 0x28b   :  { %v2102_v12 = vsel %vm2100_vm14, %v3894_v18, %v2101_v1  ;;  %v2105_v61 = vsel %vm2103_vm6, %v2104_v17, %v3896_v60  ;;  %7377 = vst [vmem:[#allocation54_spill] sm:$0xff] %v6670_v51  ;;  %v6679_v18 = vadd.f32 %v7378_v59, %v6276_v3  ;;  %v2936_v1 = vld [vmem:[%s7025_s1 + $0x8] sm:$0xff]  ;;  %v2935_v17 = vld [vmem:[%s7025_s1] sm:$0xff] }
 0x28c   :  { %v3898_v23 = vpop.eup %3897  ;;  %v6666_v46 = vpop.permute.xlu1 %3037  ;;  %v2106_v56 = vsel %vm2099_vm10, %v2102_v12, %v2105_v61  ;;  %v7384_v12 = vld [vmem:[#allocation68_spill] sm:$0xff]  ;;  %v3435_v61 = vld [vmem:[%s7025_s1 + $0x48] sm:$0xff]  ;;  %v6751_v20 = vmul.f32 %v2935_v17, %v6358_v58 }
 0x28d   :  { %v3900_v28 = vpop.eup %3899  ;;  %v2001_v7 = vxor.u32 2147483648, %v3898_v23  ;;  %v2107_v4 = vsel %vm2097_vm13, nan, %v2106_v56  ;;  %v6712_v11 = vadd.f32 %v7384_v12, %v3392_v41  ;;  %v7391_v12 = vld [vmem:[#allocation35_spill] sm:$0xff]  ;;  %v6754_v30 = vmul.f32 %v3435_v61, %v6353_v47 }
 0x28e   :  { %v1998_v37 = vxor.u32 2147483648, %v3900_v28  ;;  %v2115_v5 = vadd.f32 1.0, %v2107_v4  ;;  %vm1274_vm9 = vcmp.lt.f32.partialorder %v7391_v12, 6.0 }
 0x28f   :  { %v2002_v16 = vsel %vm2000_vm5, %v2001_v7, %v3900_v28  ;;  %v6691_v28 = vadd.f32 %v6536_v39, %v7381_v50  ;;  %v7383_v7 = vld [vmem:[#allocation40_spill] sm:$0xff]  ;;  %v6736_v50 = vpop.permute.xlu0 %3049 }
 0x290   :  { %v1999_v55 = vsel %vm1997_vm11, %v3898_v23, %v1998_v37  ;;  %v6672_v40 = vpop.permute.xlu1 %3045  ;;  %v6687_v23 = vadd.f32 %v6276_v3, %v7380_v31  ;;  %v7382_v3 = vld [vmem:[#allocation34_spill] sm:$0xff]  ;;  %v6709_v39 = vadd.f32 %v3392_v41, %v7383_v7  ;;  %v2123_v59 = vmul.f32 0.5, %v2115_v5  ;;  %v2938_v31 = vld [vmem:[%s7025_s1 + $0x18] sm:$0xff]  ;;  %7388 = vst [vmem:[#allocation57_spill] sm:$0xff] %v6736_v50 }
 0x291   :  { %v2003_v25 = vsel %vm1996_vm4, %v1999_v55, %v2002_v16  ;;  %v6706_v37 = vadd.f32 %v7382_v3, %v3392_v41  ;;  %v3434_v55 = vld [vmem:[%s7025_s1 + $0x40] sm:$0xff]  ;;  %v6741_v7 = vadd.f32 %v3392_v41, %v6266_v19  ;;  %v6745_v5 = vmul.f32 %v2936_v1, %v6353_v47 }
 0x292   :  { %v2004_v27 = vsel %vm1994_vm2, nan, %v2003_v25  ;;  %v7385_v16 = vld [vmem:[#allocation37_spill] sm:$0xff]  ;;  %v7386_v25 = vld [vmem:[#allocation12_spill] sm:$0xff]  ;;  %v6757_v19 = vmul.f32 %v3434_v55, %v6358_v58  ;;  %v6768_v50 = vmul.f32 %v3442_v29, %v6358_v58  ;;  %v6771_v61 = vmul.f32 %v2938_v31, %v6483_v43  ;;  %v3444_v31 = vld [vmem:[%s7025_s1 + $0x90] sm:$0xff] }
 0x293   :  { %v2114_v60 = vadd.f32 1.0, %v2004_v27  ;;  %v6724_v56 = vadd.f32 %v3392_v41, %v7385_v16  ;;  %v6727_v4 = vadd.f32 %v7386_v25, %v3392_v41  ;;  %v7387_v27 = vld [vmem:[#allocation28_spill] sm:$0xff]  ;;  %7390 = vst [vmem:[#allocation20_spill] sm:$0xff] %v6741_v7  ;;  %v2937_v25 = vld [vmem:[%s7025_s1 + $0x10] sm:$0xff]  ;;  %v6760_v41 = vmul.f32 %v3443_v34, %v6353_v47  ;;  %v6787_v58 = vld [vmem:[%s7032_s8 + $0x2] ss:$0 sm:$0xff] }
 0x294   :  { %vm1275_vm15 = vcmp.lt.f32.partialorder %v7387_v27, 6.0  ;;  %v6738_v3 = vpop.permute.xlu1 %3053  ;;  %v3436_v47 = vld [vmem:[%s7025_s1 + $0x50] sm:$0xff]  ;;  %v3445_v55 = vld [vmem:[%s7025_s1 + $0x98] sm:$0xff]  ;;  %v6791_v29 = vmul.f32 %v2937_v25, %v6486_v48  ;;  %v3446_v7 = vld [vmem:[%s7025_s1 + $0xa0] sm:$0xff] }
 0x295   :  { %7389 = vst [vmem:[#allocation48_spill] sm:$0xff] %v6738_v3  ;;  %v2122_v16 = vmul.f32 0.5, %v2114_v60  ;;  %v3437_v60 = vld [vmem:[%s7025_s1 + $0x58] sm:$0xff]  ;;  %v6814_v12 = vmul.f32 %v3445_v55, %v6483_v43  ;;  %v6831_v55 = vmul.f32 %v3444_v31, %v6486_v48 }
 0x2a8   :  { %v3623_v42 = vpop.f32.mrb[18].mxu0  ;;  %v3639_v63 = vpop.f32.mrb[26].mxu1 }
 0x2a9   :  { %v2644_v1 = vadd.f32 %v3623_v42, %v6317_v57  ;;  %v2638_v49 = vpop.f32.mrb[19].mxu0  ;;  %v2768_v13 = vadd.f32 %v3639_v63, %v6553_v8  ;;  %v2762_v17 = vpop.f32.mrb[27].mxu1  ;;  %v6781_v42 = vsel %vm1275_vm15, %v2123_v59, 0.0  ;;  %v6799_v59 = vsel %vm1274_vm9, %v2122_v16, 0.0  ;;  %v3439_v16 = vld [vmem:[%s7025_s1 + $0x68] sm:$0xff] }
 0x2aa   :  { %v2639_v63 = vadd.f32 %v6317_v57, %v2638_v49  ;;  %v2763_v34 = vadd.f32 %v6553_v8, %v2762_v17  ;;  %v6803_v49 = vmul.f32 %v3437_v60, %v6483_v43  ;;  %v2940_v8 = vld [vmem:[%s7025_s1 + $0x28] sm:$0xff] }
 0x2ab   :  { %v2654_v27 = vmul.f32 %v2644_v1, %v6781_v42  ;;  %v2778_v57 = vmul.f32 %v2768_v13, %v6781_v42  ;;  %v6811_v1 = vmul.f32 %v3436_v47, %v6486_v48  ;;  %v2939_v13 = vld [vmem:[%s7025_s1 + $0x20] sm:$0xff]  ;;  %v3447_v60 = vld [vmem:[%s7025_s1 + $0xa8] sm:$0xff]  ;;  %v6850_v31 = vmul.f32 %v2940_v8, %v6636_v45  ;;  %v3440_v8 = vld [vmem:[%s7025_s1 + $0x70] sm:$0xff] }
 0x2ac   :  { %v2653_v25 = vmul.f32 %v2639_v63, %v6799_v59  ;;  %v3646_v17 = vpop.f32.mrb[20].mxu0  ;;  %v2777_v3 = vmul.f32 %v2763_v34, %v6799_v59  ;;  %v3091_v63 = vpop.permute.xlu0 %3090 }
 0x2ad   :  { %v2910_v34 = vmul.f32 %v2654_v27, %v6679_v18  ;;  %v2862_v47 = vadd.f32 %v3646_v17, %v6787_v58  ;;  %v2856_v6 = vpop.f32.mrb[21].mxu0  ;;  %v6828_v43 = vmul.f32 %v2778_v57, %v6683_v36  ;;  %v2942_v18 = vld [vmem:[%s7025_s1 + $0x38] sm:$0xff]  ;;  %v3095_v27 = vpop.permute.xlu1 %3094 }
 0x2ae   :  { %v6843_v17 = vmul.f32 %v2653_v25, %v6687_v23  ;;  %v2857_v36 = vadd.f32 %v6787_v58, %v2856_v6  ;;  %v6847_v48 = vmul.f32 %v2777_v3, %v6691_v28  ;;  %v3441_v57 = vld [vmem:[%s7025_s1 + $0x78] sm:$0xff]  ;;  %v6860_v23 = vmul.f32 %v2939_v13, %v6640_v22  ;;  %v2941_v3 = vld [vmem:[%s7025_s1 + $0x30] sm:$0xff] }
 0x2af   :  { %7392 = vst [vmem:[#allocation39_spill] sm:$0xff] %v6828_v43  ;;  %v3449_v43 = vld [vmem:[%s7025_s1 + $0xb8] sm:$0xff]  ;;  %v2896_v51 = vmul.f32 %v2862_v47, %v6292_v32  ;;  %v6863_v6 = vmul.f32 %v3439_v16, %v6636_v45  ;;  %v6866_v28 = vmul.f32 %v3447_v60, %v6636_v45  ;;  %v6876_v13 = vmul.f32 %v3438_v52, %v6640_v22 }
 0x2b0   :  { %7393 = vst [vmem:[#allocation5_spill] sm:$0xff] %v6847_v48  ;;  %v2895_v25 = vmul.f32 %v2857_v36, %v6306_v33  ;;  %v3649_v32 = vpop.f32.mrb[22].mxu0  ;;  %v6879_v16 = vmul.f32 %v3446_v7, %v6640_v22  ;;  %v6881_v47 = vmul.f32 %v2942_v18, %v2910_v34  ;;  %v6892_v52 = vmul.f32 %v2941_v3, %v6843_v17  ;;  %v3103_v7 = vpop.permute.xlu0 %3102 }
 0x2b1   :  { %7394 = vst [vmem:[#allocation42_spill] sm:$0xff] %v6863_v6  ;;  %7395 = vst [vmem:[#allocation43_spill] sm:$0xff] %v6866_v28  ;;  %v2920_v45 = vmul.f32 %v2896_v51, %v6694_v54  ;;  %v2872_v60 = vadd.f32 %v3649_v32, %v6787_v58  ;;  %v2866_v48 = vpop.f32.mrb[23].mxu0  ;;  %v6885_v28 = vmul.f32 %v3441_v57, %v2910_v34 }
 0x2b2   :  { %v6887_v6 = vmul.f32 %v3449_v43, %v2910_v34  ;;  %v2919_v33 = vmul.f32 %v2895_v25, %v6703_v0  ;;  %v2867_v36 = vadd.f32 %v6787_v58, %v2866_v48  ;;  %v6895_v22 = vmul.f32 %v3440_v8, %v6843_v17  ;;  %v3099_v34 = vpop.permute.xlu1 %3098 }
 0x2b3   :  { %v2898_v51 = vmul.f32 %v2872_v60, %v6445_v21  ;;  %v2992_v54 = vmul.f32 %v6516_v62, %v2920_v45  ;;  %v3057_v18 = vmul.f32 %v6664_v14, %v2920_v45  ;;  %v3122_v57 = vmul.f32 %v3095_v27, %v2920_v45 }
 0x2b4   :  { %7396 = vst [vmem:[#allocation53_spill] sm:$0xff] %v6887_v6  ;;  %v2897_v43 = vmul.f32 %v2867_v36, %v6449_v2  ;;  %v3652_v0 = vpop.f32.mrb[24].mxu0  ;;  %v2991_v48 = vmul.f32 %v6660_v10, %v2919_v33  ;;  %v3056_v3 = vmul.f32 %v6651_v44, %v2919_v33  ;;  %v3121_v25 = vmul.f32 %v3091_v63, %v2919_v33 }
 0x2b5   :  { %v2922_v8 = vmul.f32 %v2898_v51, %v6706_v37  ;;  %v2882_v32 = vadd.f32 %v3652_v0, %v6787_v58  ;;  %v2876_v6 = vpop.f32.mrb[25].mxu0  ;;  %v3000_v21 = vadd.f32 %v2992_v54, %v6745_v5  ;;  %v3065_v62 = vadd.f32 %v3057_v18, %v6754_v30  ;;  %v7397_v54 = vld [vmem:[#allocation54_spill] sm:$0xff] }
 0x2b6   :  { %v2921_v14 = vmul.f32 %v2897_v43, %v6709_v39  ;;  %v2877_v27 = vadd.f32 %v6787_v58, %v2876_v6  ;;  %v2999_v2 = vadd.f32 %v2991_v48, %v6751_v20  ;;  %v3064_v10 = vadd.f32 %v3056_v3, %v6757_v19  ;;  %v3111_v6 = vpop.permute.xlu0 %3110  ;;  %v3107_v33 = vpop.permute.xlu1 %3106  ;;  %v7401_v3 = vld [vmem:[#allocation46_spill] sm:$0xff] }
 0x2b7   :  { %v2900_v44 = vmul.f32 %v2882_v32, %v6615_v35  ;;  %3147 = vrot.lane.b32.xlu0 %v3000_v21, %s3934_s14  ;;  %v3130_v37 = vadd.f32 %v3122_v57, %v6760_v41  ;;  %v3129_v63 = vadd.f32 %v3121_v25, %v6768_v50  ;;  %v2994_v5 = vmul.f32 %v6555_v38, %v2922_v8  ;;  %v7398_v57 = vld [vmem:[#allocation20_spill] sm:$0xff] }
 0x2b8   :  { %v2899_v30 = vmul.f32 %v2877_v27, %v6626_v24  ;;  %v3655_v39 = vpop.f32.mrb[26].mxu0  ;;  %3145 = vrot.lane.b32.xlu1 %v2999_v2, %s3934_s14  ;;  %v2993_v20 = vmul.f32 %v6531_v53, %v2921_v14  ;;  %v3059_v19 = vmul.f32 %v6666_v46, %v2922_v8  ;;  %v3058_v35 = vmul.f32 %v6662_v15, %v2921_v14  ;;  %v7399_v43 = vld [vmem:[#allocation42_spill] sm:$0xff]  ;;  %v7403_v32 = vld [vmem:[#allocation48_spill] sm:$0xff] }
 0x2b9   :  { %v2924_v45 = vmul.f32 %v2900_v44, %v6712_v11  ;;  %v2892_v41 = vadd.f32 %v3655_v39, %v6787_v58  ;;  %v2886_v60 = vpop.f32.mrb[27].mxu0  ;;  %v3002_v50 = vadd.f32 %v2994_v5, %v6771_v61  ;;  %v3124_v38 = vmul.f32 %v3103_v7, %v2922_v8 }
 0x2ba   :  { %v2923_v24 = vmul.f32 %v2899_v30, %v6724_v56  ;;  %v2887_v36 = vadd.f32 %v6787_v58, %v2886_v60  ;;  %v3001_v53 = vadd.f32 %v2993_v20, %v6791_v29  ;;  %v3067_v46 = vadd.f32 %v3059_v19, %v6803_v49  ;;  %v7407_v19 = vld [vmem:[#allocation45_spill] sm:$0xff] }
 0x2bb   :  { %v2902_v15 = vmul.f32 %v2892_v41, %v6781_v42  ;;  %3179 = vrot.lane.b32.xlu0 %v3065_v62, %s3935_s15  ;;  %v3066_v11 = vadd.f32 %v3058_v35, %v6811_v1  ;;  %v3132_v51 = vadd.f32 %v3124_v38, %v6814_v12  ;;  %v3123_v61 = vmul.f32 %v3099_v34, %v2921_v14  ;;  %v7404_v62 = vld [vmem:[#allocation57_spill] sm:$0xff] }
 0x2bc   :  { %v2901_v7 = vmul.f32 %v2887_v36, %v6799_v59  ;;  %3177 = vrot.lane.b32.xlu1 %v3064_v10, %s3935_s15  ;;  %v2996_v56 = vmul.f32 %v6584_v26, %v2924_v45  ;;  %v2995_v58 = vmul.f32 %v6565_v9, %v2923_v24  ;;  %v3061_v29 = vmul.f32 %v6672_v40, %v2924_v45  ;;  %v3448_v9 = vld [vmem:[%s7025_s1 + $0xb0] sm:$0xff]  ;;  %v3119_v26 = vpop.permute.xlu0 %3118  ;;  %v7405_v30 = vld [vmem:[#allocation53_spill] sm:$0xff]  ;;  %s3937_s1 = smov [#allocation2]  }
 0x2bd   :  { %v2926_v42 = vmul.f32 %v2902_v15, %v6727_v4  ;;  %v3131_v49 = vadd.f32 %v3123_v61, %v6831_v55  ;;  %v3060_v18 = vmul.f32 %v7397_v54, %v2923_v24  ;;  %v3126_v1 = vmul.f32 %v3111_v6, %v2924_v45  ;;  %v7400_v4 = vld [vmem:[#allocation43_spill] sm:$0xff]  ;;  %s3272_s19 = sshll.u32 %s3937_s1, 4  ;;  %s3273_s19 = int_to_ptr.vmem [resolvable:$true] %s3272_s19 }
 0x2be   :  { %v2925_v12 = vmul.f32 %v2901_v7, %v7398_v57  ;;  %v3004_v34 = vadd.f32 %v2996_v56, %v6850_v31  ;;  %v3003_v59 = vadd.f32 %v2995_v58, %v6860_v23  ;;  %v3069_v0 = vadd.f32 %v3061_v29, %v7399_v43  ;;  %v3115_v31 = vpop.permute.xlu1 %3114  ;;  %v7402_v23 = vld [vmem:[#allocation23_spill] sm:$0xff]  ;;  %v7410_v57 = vld [vmem:[#allocation41_spill] sm:$0xff]  ;;  %s3901_s20 = scalar_lea.vmem %s3273_s19, 1024  ;;  %p3906_p1 = scmp.lt.s32.totalorder %s3273_s19, %s3273_s19 }
 0x2bf   :  { %3211 = vrot.lane.b32.xlu0 %v3130_v37, %s3936_s18  ;;  %v3068_v40 = vadd.f32 %v3060_v18, %v6876_v13  ;;  %v3134_v55 = vadd.f32 %v3126_v1, %v7400_v4  ;;  %v3125_v48 = vmul.f32 %v3107_v33, %v2923_v24  ;;  %v2998_v25 = vmul.f32 %v7401_v3, %v2926_v42  ;;  %p3902_p0 = scmp.ne.s32.totalorder %s3273_s19, %s3901_s20  ;;  %p3907_p2 = scmp.lt.s32.totalorder %s3901_s20, %s3901_s20 }
 0x2c0   :  { %3209 = vrot.lane.b32.xlu1 %v3129_v63, %s3936_s18  ;;  %v2997_v8 = vmul.f32 %v7402_v23, %v2925_v12  ;;  %v3063_v21 = vmul.f32 %v7403_v32, %v2926_v42  ;;  %v3062_v14 = vmul.f32 %v7404_v62, %v2925_v12  ;;  %v3128_v27 = vmul.f32 %v3119_v26, %v2926_v42 }
 0x2c1   :  { %v3133_v2 = vadd.f32 %v3125_v48, %v6879_v16  ;;  %v3006_v10 = vadd.f32 %v2998_v25, %v6881_v47  ;;  %v3087_v13 = vmul.f32 %v3448_v9, %v6843_v17  ;;  %v3127_v44 = vmul.f32 %v3115_v31, %v2925_v12  ;;  %v7412_v31 = vld [vmem:[#allocation39_spill] sm:$0xff]  ;;  %p3908_p3 = por %p3907_p2, %p3906_p1 }
 0x2c2   :  { %v3005_v37 = vadd.f32 %v2997_v8, %v6892_v52  ;;  %v3071_v5 = vadd.f32 %v3063_v21, %v6885_v28  ;;  %v3070_v63 = vadd.f32 %v3062_v14, %v6895_v22  ;;  %v3136_v39 = vadd.f32 %v3128_v27, %v7405_v30  ;;  %v7406_v52 = vld [vmem:[#allocation50_spill] sm:$0xff]  ;;  %v7413_v8 = vld [vmem:[#allocation5_spill] sm:$0xff] }
 0x2c3   :  { %3151 = vrot.lane.b32.xlu0 %v3002_v50, %s3934_s14  ;;  %v3135_v20 = vadd.f32 %v3127_v44, %v3087_v13  ;;  %p3909_p4 = pnand %p3908_p3, %p3902_p0 }
 0x2c4   :  { %3149 = vrot.lane.b32.xlu1 %v3001_v53, %s3934_s14 }
 0x2c7   :  { %3183 = vrot.lane.b32.xlu0 %v3067_v46, %s3935_s15  ;;  %v7408_v46 = vld [vmem:[#allocation49_spill] sm:$0xff] }
 0x2c8   :  { %3181 = vrot.lane.b32.xlu1 %v3066_v11, %s3935_s15  ;;  %v7409_v11 = vld [vmem:[#allocation6_spill] sm:$0xff] }
 0x2cb   :  { %3215 = vrot.lane.b32.xlu0 %v3132_v51, %s3936_s18 }
 0x2cc   :  { %3213 = vrot.lane.b32.xlu1 %v3131_v49, %s3936_s18 }
 0x2cf   :  { %3155 = vrot.lane.b32.xlu0 %v3004_v34, %s3934_s14  ;;  %v7411_v34 = vld [vmem:[#allocation44_spill] sm:$0xff] }
 0x2d0   :  { %3153 = vrot.lane.b32.xlu1 %v3003_v59, %s3934_s14 }
 0x2d3   :  { %3187 = vrot.lane.b32.xlu0 %v3069_v0, %s3935_s15 }
 0x2d4   :  { %3185 = vrot.lane.b32.xlu1 %v3068_v40, %s3935_s15 }
 0x2d7   :  { %3219 = vrot.lane.b32.xlu0 %v3134_v55, %s3936_s18 }
 0x2d8   :  { %3217 = vrot.lane.b32.xlu1 %v3133_v2, %s3936_s18 }
 0x2db   :  { %3159 = vrot.lane.b32.xlu0 %v3006_v10, %s3934_s14 }
 0x2dc   :  { %3157 = vrot.lane.b32.xlu1 %v3005_v37, %s3934_s14 }
 0x2df   :  { %3191 = vrot.lane.b32.xlu0 %v3071_v5, %s3935_s15 }
 0x2e0   :  { %3189 = vrot.lane.b32.xlu1 %v3070_v63, %s3935_s15 }
 0x2e3   :  { %3223 = vrot.lane.b32.xlu0 %v3136_v39, %s3936_s18 }
 0x2e4   :  { %3221 = vrot.lane.b32.xlu1 %v3135_v20, %s3936_s18 }
 0x329   :  { %v3148_v17 = vpop.permute.xlu0 %3147 }
 0x32a   :  { %v3146_v28 = vpop.permute.xlu1 %3145  ;;  %v3234_v22 = vsel %vm157_vm1, %v7406_v52, %v3148_v17 }
 0x32b   :  { %v3233_v35 = vsel %vm157_vm1, %v7407_v19, %v3146_v28 }
 0x32d   :  { %v3180_v16 = vpop.permute.xlu0 %3179 }
 0x32e   :  { %v3178_v47 = vpop.permute.xlu1 %3177  ;;  %v3243_v6 = vsel %vm3241_vm0, %v3234_v22, %v3180_v16 }
 0x32f   :  { %v3242_v41 = vsel %vm3241_vm0, %v3233_v35, %v3178_v47 }
 0x331   :  { %v3212_v45 = vpop.permute.xlu0 %3211 }
 0x332   :  { %v3252_v60 = vsel %vm3250_vm3, %v3243_v6, %v3212_v45  ;;  %v3210_v50 = vpop.permute.xlu1 %3209 }
 0x333   :  { %3260 = vst [vmem:[#allocation2 + $0x8] sm:$0xff] %v3252_v60  ;;  %v3251_v38 = vsel %vm3250_vm3, %v3242_v41, %v3210_v50 }
 0x334   :  { %3259 = vst [vmem:[#allocation2] sm:$0xff] %v3251_v38 }
 0x335   :  { %v3152_v33 = vpop.permute.xlu0 %3151 }
 0x336   :  { %v3150_v24 = vpop.permute.xlu1 %3149  ;;  %v3236_v15 = vsel %vm157_vm1, %v7408_v46, %v3152_v33 }
 0x337   :  { %v3235_v51 = vsel %vm157_vm1, %v7409_v11, %v3150_v24 }
 0x339   :  { %v3184_v36 = vpop.permute.xlu0 %3183 }
 0x33a   :  { %v3182_v53 = vpop.permute.xlu1 %3181  ;;  %v3245_v61 = vsel %vm3241_vm0, %v3236_v15, %v3184_v36 }
 0x33b   :  { %v3244_v56 = vsel %vm3241_vm0, %v3235_v51, %v3182_v53 }
 0x33d   :  { %v3216_v7 = vpop.permute.xlu0 %3215 }
 0x33e   :  { %v3254_v58 = vsel %vm3250_vm3, %v3245_v61, %v3216_v7  ;;  %v3214_v29 = vpop.permute.xlu1 %3213 }
 0x33f   :  { %3262 = vst [vmem:[#allocation2 + $0x18] sm:$0xff] %v3254_v58  ;;  %v3253_v42 = vsel %vm3250_vm3, %v3244_v56, %v3214_v29 }
 0x340   :  { %3261 = vst [vmem:[#allocation2 + $0x10] sm:$0xff] %v3253_v42 }
 0x341   :  { %v3156_v49 = vpop.permute.xlu0 %3155 }
 0x342   :  { %v3154_v54 = vpop.permute.xlu1 %3153  ;;  %v3238_v12 = vsel %vm157_vm1, %v7410_v57, %v3156_v49 }
 0x343   :  { %v3237_v59 = vsel %vm157_vm1, %v7411_v34, %v3154_v54 }
 0x345   :  { %v3188_v18 = vpop.permute.xlu0 %3187 }
 0x346   :  { %v3186_v1 = vpop.permute.xlu1 %3185  ;;  %v3247_v43 = vsel %vm3241_vm0, %v3238_v12, %v3188_v18 }
 0x347   :  { %v3246_v9 = vsel %vm3241_vm0, %v3237_v59, %v3186_v1 }
 0x349   :  { %v3220_v0 = vpop.permute.xlu0 %3219 }
 0x34a   :  { %v3256_v26 = vsel %vm3250_vm3, %v3247_v43, %v3220_v0  ;;  %v3218_v40 = vpop.permute.xlu1 %3217 }
 0x34b   :  { %3264 = vst [vmem:[#allocation2 + $0x28] sm:$0xff] %v3256_v26  ;;  %v3255_v4 = vsel %vm3250_vm3, %v3246_v9, %v3218_v40 }
 0x34c   :  { %3263 = vst [vmem:[#allocation2 + $0x20] sm:$0xff] %v3255_v4 }
 0x34d   :  { %v3160_v55 = vpop.permute.xlu0 %3159 }
 0x34e   :  { %v3158_v48 = vpop.permute.xlu1 %3157  ;;  %v3240_v23 = vsel %vm157_vm1, %v7412_v31, %v3160_v55 }
 0x34f   :  { %v3239_v32 = vsel %vm157_vm1, %v7413_v8, %v3158_v48 }
 0x351   :  { %v3192_v3 = vpop.permute.xlu0 %3191 }
 0x352   :  { %v3190_v25 = vpop.permute.xlu1 %3189  ;;  %v3249_v21 = vsel %vm3241_vm0, %v3240_v23, %v3192_v3 }
 0x353   :  { %v3248_v14 = vsel %vm3241_vm0, %v3239_v32, %v3190_v25 }
 0x355   :  { %v3224_v62 = vpop.permute.xlu0 %3223 }
 0x356   :  { %v3258_v27 = vsel %vm3250_vm3, %v3249_v21, %v3224_v62  ;;  %v3222_v2 = vpop.permute.xlu1 %3221 }
 0x357   :  { %3266 = vst [vmem:[#allocation2 + $0x38] sm:$0xff] %v3258_v27  ;;  %v3257_v10 = vsel %vm3250_vm3, %v3248_v14, %v3222_v2 }
 0x358   :  { %3265 = vst [vmem:[#allocation2 + $0x30] sm:$0xff] %v3257_v10 }
 0x359   :  { %3912 = shalt.err (!%p3909_p4)
}
 0x35a   :  { %s3913_s22 = scalar_lea.hbm %s7033_s9, 1024 }
 0x35b   :  { %p3914_p5 = scmp.ne.s32.totalorder %s7033_s9, %s3913_s22  ;;  %p3917_p6 = scmp.lt.u32.totalorder %s3913_s22, %s7033_s9 }
 0x35d   :  { %p3919_p7 = pnand %p3917_p6, %p3914_p5 }
 0x35f   :  { %3922 = shalt.err (!%p3919_p7)
}
 0x360   :  { %s3938_s3 = smov 128   ;;  %s3939_s0 = smov 8  }
 0x361   :  { %3278 = dma.vmem_to_hbm [thread:$0]  %s3273_s19, 1024, %s7033_s9, [#allocation3], %s3938_s3, %s3938_s3, %s3939_s0  }
 0x362   :  { %3923 = dma.done.wait [#allocation3], 1024  }
 0x363   :  { %3924 = vsyncadd [#allocation3], 4294966272 }
 0x364   :  { %3282 = vsyncpa [#allocation3], 1 }

</bundles_post_ra>
